<compile_context>
chip_gen: v7x
topology: tpu7x:2x2x1
jax: 0.10.0
libtpu: 0.0.40
codegen_flags: <defaults>
</compile_context>

<pallas_src>
import math
from functools import partial

import jax
import jax.numpy as jnp
import numpy as np
from jax import lax
from jax.experimental import pallas as pl
from jax.experimental.pallas import tpu as pltpu


# --------------------------- fused MBConv kernel ---------------------------
def _mbconv_fused_kernel(x_ref, wexp_ref, sh0_ref, wdw_ref, sh1_ref,
                         wr_ref, br_ref, we_ref, be_ref, wproj_ref, sh2_ref,
                         o_ref, xpad_ref, *,
                         h, w, kh, kw, stride, h_out, w_out, ph0, pw0,
                         has_expand, has_se, add_skip):
    cin = x_ref.shape[-1]
    oup = xpad_ref.shape[-1]

    x_rows = x_ref[0].reshape(h * w, cin)                       # (HW, Cin)

    # ---- stage 1: expand 1x1 conv (BN0 scale folded into weight) + shift + swish ----
    if has_expand:
        y = jnp.dot(x_rows, wexp_ref[...], preferred_element_type=jnp.float32)
        y = y + sh0_ref[...]
        y = y * jax.nn.sigmoid(y)
    else:
        y = x_rows                                              # expand_ratio == 1

    # ---- stage 2: depthwise kxk conv, TF-"same" padding via zeroed VMEM scratch ----
    xpad_ref[...] = jnp.zeros_like(xpad_ref)
    xpad_ref[ph0:ph0 + h, pw0:pw0 + w, :] = y.reshape(h, w, oup)

    w_dw = wdw_ref[...]                                         # (kh, kw, oup), BN1 folded
    span_h = stride * (h_out - 1) + 1
    span_w = stride * (w_out - 1) + 1
    acc = jnp.zeros((h_out, w_out, oup), jnp.float32)
    for dy in range(kh):                                        # static unroll over taps
        for dx in range(kw):
            patch = xpad_ref[dy:dy + span_h, dx:dx + span_w, :]   # ref sub-window read
            if stride > 1:
                patch = patch[::stride, ::stride, :]
            acc = acc + patch * w_dw[dy:dy + 1, dx, :]
    y1 = acc + sh1_ref[...]
    y1 = y1 * jax.nn.sigmoid(y1)

    # ---- stage 3: squeeze-excite + project 1x1 (+BN2 shift) + identity skip ----
    xs = y1.reshape(h_out * w_out, oup)                          # (HW', oup)
    if has_se:
        pooled = jnp.mean(xs, axis=0, keepdims=True)             # adaptive_avg_pool2d
        s = jnp.dot(pooled, wr_ref[...], preferred_element_type=jnp.float32) + br_ref[...]
        s = s * jax.nn.sigmoid(s)                                # swish
        s = jnp.dot(s, we_ref[...], preferred_element_type=jnp.float32) + be_ref[...]
        xs = xs * jax.nn.sigmoid(s)                              # (1, oup) gate

    yo = jnp.dot(xs, wproj_ref[...], preferred_element_type=jnp.float32)  # (HW', cout)
    yo = yo + sh2_ref[...]
    if add_skip:                                                 # stride==1 and cin==cout
        yo = yo + x_rows                                         # input block already in VMEM
    o_ref[0] = yo.reshape(h_out, w_out, -1)


# ------------------------------- glue / wrapper -------------------------------
def tf_same_pad(size, k, s, d=1):
    out = math.ceil(size / s)
    pad = max((out - 1) * s + (k - 1) * d + 1 - size, 0)
    return pad // 2, pad - pad // 2


def fold_bn(gamma, beta, mean, var, eps):
    scale = gamma / jnp.sqrt(var + eps)
    shift = beta - mean * scale
    return scale.reshape(1, -1), shift.reshape(1, -1)


def _const_spec(arr):
    nd = arr.ndim
    return pl.BlockSpec(arr.shape, lambda b, _nd=nd: (0,) * _nd)


def mbconv_block(x_nchw, params, *, kernel_size, stride, expand_ratio, id_skip,
                 se_ratio, bn_eps):
    n, cin, h, w = x_nchw.shape
    x_nhwc = jnp.transpose(x_nchw, (0, 2, 3, 1)).astype(jnp.float32)
    oup = cin * expand_ratio
    cout = params["w_proj"].shape[1]
    has_expand = expand_ratio != 1
    has_se = (se_ratio is not None) and (0 < se_ratio <= 1)
    add_skip = bool(id_skip and stride == 1 and cin == cout)
    # TODO(synk): drop_connect (stochastic depth) not implemented; forward matches
    # eval / drop_connect_rate=None behavior (BN uses folded running stats).

    # ---- fold BN scales into conv weights; kernels only add shifts ----
    if has_expand:
        sc0, sh0 = fold_bn(*params["bn0"], bn_eps)
        wexp = params["w_exp"] * sc0                   # (cin, oup)
    else:
        wexp = jnp.zeros((1, 1), jnp.float32)          # unused dummy
        sh0 = jnp.zeros((1, 1), jnp.float32)
    sc1, sh1 = fold_bn(*params["bn1"], bn_eps)
    wdw = params["w_dw"] * sc1                         # (k, k, oup)
    sc2, sh2 = fold_bn(*params["bn2"], bn_eps)
    wproj = params["w_proj"] * sc2                     # (oup, cout)
    if has_se:
        wr, br = params["w_se_r"], params["b_se_r"]    # (oup,csq), (1,csq)
        we, be = params["w_se_e"], params["b_se_e"]    # (csq,oup), (1,oup)
    else:
        wr = br = we = be = jnp.zeros((1, 1), jnp.float32)

    ph0, ph1 = tf_same_pad(h, kernel_size, stride)
    pw0, pw1 = tf_same_pad(w, kernel_size, stride)
    hp, wp = h + ph0 + ph1, w + pw0 + pw1
    h_out, w_out = math.ceil(h / stride), math.ceil(w / stride)

    kern = partial(_mbconv_fused_kernel,
                   h=h, w=w, kh=kernel_size, kw=kernel_size, stride=stride,
                   h_out=h_out, w_out=w_out, ph0=ph0, pw0=pw0,
                   has_expand=has_expand, has_se=has_se, add_skip=add_skip)

    weights = (wexp, sh0, wdw, sh1, wr, br, we, be, wproj, sh2)
    in_specs = [pl.BlockSpec((1, h, w, cin), lambda b: (b, 0, 0, 0))] \
             + [_const_spec(a) for a in weights]
    out_specs = pl.BlockSpec((1, h_out, w_out, cout), lambda b: (b, 0, 0, 0))

    # advisory cost estimate for XLA scheduling around the custom call
    flops = 2 * n * kernel_size * kernel_size * h_out * w_out * oup
    flops += 2 * n * h_out * w_out * oup * cout
    if has_expand:
        flops += 2 * n * h * w * cin * oup
    if has_se:
        csq = params["w_se_r"].shape[1]
        flops += 2 * n * oup * csq * 2 + 2 * n * h_out * w_out * oup
    trans = n * (h * w * oup * int(has_expand) + h_out * w_out * oup + 2 * oup)
    bytes_accessed = 4 * (int(x_nhwc.size) + n * h_out * w_out * cout
                          + sum(int(a.size) for a in weights))

    y = pl.pallas_call(
        kern,
        out_shape=jax.ShapeDtypeStruct((n, h_out, w_out, cout), jnp.float32),
        grid_spec=pltpu.PrefetchScalarGridSpec(
            num_scalar_prefetch=0,
            grid=(n,),
            in_specs=in_specs,
            out_specs=out_specs,
            scratch_shapes=[pltpu.VMEM((hp, wp, oup), jnp.float32)],
        ),
        compiler_params=pltpu.CompilerParams(
            dimension_semantics=("parallel",),
            vmem_limit_bytes=32 * 1024 * 1024,
        ),
        cost_estimate=pl.CostEstimate(flops=int(flops),
                                      transcendentals=int(trans),
                                      bytes_accessed=int(bytes_accessed)),
    )(x_nhwc, *weights)
    return jnp.transpose(y, (0, 3, 1, 2))


# ------------------------------- params -------------------------------
def init_params(key, cin, cout, expand_ratio, k, se_ratio):
    oup = cin * expand_ratio
    csq = max(1, int(cin * se_ratio))
    ks = jax.random.split(key, 10)

    def bn(kk, c):
        k1, k2, k3, k4 = jax.random.split(kk, 4)
        gamma = 1.0 + 0.1 * jax.random.normal(k1, (c,))
        beta = 0.1 * jax.random.normal(k2, (c,))
        mean = 0.1 * jax.random.normal(k3, (c,))
        var = jax.random.uniform(k4, (c,), minval=0.5, maxval=1.5)
        return gamma, beta, mean, var

    params = dict(
        w_exp=0.2 * jax.random.normal(ks[0], (cin, oup)),       # (oup,cin,1,1) -> (cin,oup)
        bn0=bn(ks[1], oup),
        w_dw=0.2 * jax.random.normal(ks[2], (k, k, oup)),        # (oup,1,k,k) -> (k,k,oup)
        bn1=bn(ks[3], oup),
        w_se_r=0.2 * jax.random.normal(ks[4], (oup, csq)),
        b_se_r=0.1 * jax.random.normal(ks[5], (1, csq)),
        w_se_e=0.2 * jax.random.normal(ks[6], (csq, oup)),
        b_se_e=0.1 * jax.random.normal(ks[7], (1, oup)),
        w_proj=0.2 * jax.random.normal(ks[8], (oup, cout)),
        bn2=bn(ks[9], cout),
    )
    return jax.tree.map(lambda a: a.astype(jnp.float32), params)


# ------------------------------- pure-JAX reference -------------------------------
def mbconv_reference(x_nchw, params, *, kernel_size, stride, expand_ratio, id_skip, bn_eps):
    x = jnp.transpose(x_nchw, (0, 2, 3, 1)).astype(jnp.float32)
    inputs = x
    n, h, w, cin = x.shape

    def bn_apply(y, p):
        g, b, m, v = p
        return (y - m) / jnp.sqrt(v + bn_eps) * g + b

    def swish(y):
        return y * jax.nn.sigmoid(y)

    if expand_ratio != 1:
        y = jnp.einsum("nhwc,cd->nhwd", x, params["w_exp"])
        x = swish(bn_apply(y, params["bn0"]))
    ph0, ph1 = tf_same_pad(h, kernel_size, stride)
    pw0, pw1 = tf_same_pad(w, kernel_size, stride)
    c = x.shape[-1]
    wdw = params["w_dw"][:, :, None, :]  # HWIO, depthwise
    y = lax.conv_general_dilated(x, wdw, window_strides=(stride, stride),
                                 padding=((ph0, ph1), (pw0, pw1)),
                                 dimension_numbers=("NHWC", "HWIO", "NHWC"),
                                 feature_group_count=c)
    x = swish(bn_apply(y, params["bn1"]))
    pooled = jnp.mean(x, axis=(1, 2), keepdims=True)
    s = jnp.einsum("nhwc,cd->nhwd", pooled, params["w_se_r"]) + params["b_se_r"]
    s = swish(s)
    s = jnp.einsum("nhwd,dc->nhwc", s, params["w_se_e"]) + params["b_se_e"]
    x = jax.nn.sigmoid(s) * x
    y = jnp.einsum("nhwc,co->nhwo", x, params["w_proj"])
    y = bn_apply(y, params["bn2"])
    cout = y.shape[-1]
    if id_skip and stride == 1 and cin == cout:
        y = y + inputs
    return jnp.transpose(y, (0, 3, 1, 2))


if __name__ == "__main__":
    # block_args: input_filters=8, output_filters=8, expand_ratio=4, kernel_size=3,
    #             stride=1, se_ratio=0.25, id_skip=True ; image_size=16 ; bn_eps=1e-3
    N, CIN, H, W = 2, 8, 16, 16
    COUT, EXPAND, KSIZE, STRIDE, SE_RATIO = 8, 4, 3, 1, 0.25
    BN_EPS = 1e-3

    key = jax.random.PRNGKey(0)
    k_in, k_par = jax.random.split(key)
    x = jax.random.normal(k_in, (N, CIN, H, W), jnp.float32)   # NCHW, as in PyTorch
    params = init_params(k_par, CIN, COUT, EXPAND, KSIZE, SE_RATIO)

    out = mbconv_block(x, params, kernel_size=KSIZE, stride=STRIDE,
                       expand_ratio=EXPAND, id_skip=True, se_ratio=SE_RATIO, bn_eps=BN_EPS)
    out = jax.block_until_ready(out)

    ref = mbconv_reference(x, params, kernel_size=KSIZE, stride=STRIDE,
                           expand_ratio=EXPAND, id_skip=True, bn_eps=BN_EPS)
    np.testing.assert_allclose(np.asarray(out), np.asarray(ref), rtol=2e-3, atol=2e-3)
    print("KERNEL_OK")
</pallas_src>

<mosaic_0001>
module attributes {stable_mosaic.version = 11 : i64} {
  func.func @_mbconv_fused_kernel(%arg0: i32, %arg1: memref<1x16x16x8xf32, #tpu.memory_space<vmem>>, %arg2: memref<8x32xf32, #tpu.memory_space<vmem>>, %arg3: memref<1x32xf32, #tpu.memory_space<vmem>>, %arg4: memref<3x3x32xf32, #tpu.memory_space<vmem>>, %arg5: memref<1x32xf32, #tpu.memory_space<vmem>>, %arg6: memref<32x2xf32, #tpu.memory_space<vmem>>, %arg7: memref<1x2xf32, #tpu.memory_space<vmem>>, %arg8: memref<2x32xf32, #tpu.memory_space<vmem>>, %arg9: memref<1x32xf32, #tpu.memory_space<vmem>>, %arg10: memref<32x8xf32, #tpu.memory_space<vmem>>, %arg11: memref<1x8xf32, #tpu.memory_space<vmem>>, %arg12: memref<1x16x16x8xf32, #tpu.memory_space<vmem>>, %arg13: memref<18x18x32xf32, #tpu.memory_space<vmem>>) attributes {dimension_semantics = [#tpu.dimension_semantics<parallel>], iteration_bounds = array<i64: 2>, scalar_prefetch = 0 : i64, scratch_operands = 1 : i64, tpu.core_type = #tpu.core_type<tc>, window_params = [{transform_indices = @transform_0, window_bounds = array<i64: 1, 16, 16, 8>}, {pipeline_mode = #tpu.pipeline_mode<synchronous>, transform_indices = @transform_1, window_bounds = array<i64: 8, 32>}, {pipeline_mode = #tpu.pipeline_mode<synchronous>, transform_indices = @transform_2, window_bounds = array<i64: 1, 32>}, {pipeline_mode = #tpu.pipeline_mode<synchronous>, transform_indices = @transform_3, window_bounds = array<i64: 3, 3, 32>}, {pipeline_mode = #tpu.pipeline_mode<synchronous>, transform_indices = @transform_4, window_bounds = array<i64: 1, 32>}, {pipeline_mode = #tpu.pipeline_mode<synchronous>, transform_indices = @transform_5, window_bounds = array<i64: 32, 2>}, {pipeline_mode = #tpu.pipeline_mode<synchronous>, transform_indices = @transform_6, window_bounds = array<i64: 1, 2>}, {pipeline_mode = #tpu.pipeline_mode<synchronous>, transform_indices = @transform_7, window_bounds = array<i64: 2, 32>}, {pipeline_mode = #tpu.pipeline_mode<synchronous>, transform_indices = @transform_8, window_bounds = array<i64: 1, 32>}, {pipeline_mode = #tpu.pipeline_mode<synchronous>, transform_indices = @transform_9, window_bounds = array<i64: 32, 8>}, {pipeline_mode = #tpu.pipeline_mode<synchronous>, transform_indices = @transform_10, window_bounds = array<i64: 1, 8>}, {transform_indices = @transform_11, window_bounds = array<i64: 1, 16, 16, 8>}]} {
    %c0 = arith.constant 0 : index
    %c0_0 = arith.constant 0 : index
    %c0_1 = arith.constant 0 : index
    %c0_2 = arith.constant 0 : index
    %0 = vector.load %arg1[%c0, %c0_0, %c0_1, %c0_2] : memref<1x16x16x8xf32, #tpu.memory_space<vmem>>, vector<1x16x16x8xf32>
    %1 = vector.shape_cast %0 : vector<1x16x16x8xf32> to vector<16x16x8xf32>
    %2 = vector.shape_cast %1 : vector<16x16x8xf32> to vector<256x8xf32>
    %c0_3 = arith.constant 0 : index
    %c0_4 = arith.constant 0 : index
    %3 = vector.load %arg2[%c0_3, %c0_4] : memref<8x32xf32, #tpu.memory_space<vmem>>, vector<8x32xf32>
    %cst = arith.constant dense<0.000000e+00> : vector<256x32xf32>
    %4 = tpu.matmul %2, %3, %cst {dimension_numbers = #tpu.dot_dimension_numbers<[1], [0], [0], [1], [0, 0, 1, 1], [], []>} : vector<256x8xf32>, vector<8x32xf32>, vector<256x32xf32> -> vector<256x32xf32>
    %c0_5 = arith.constant 0 : index
    %c0_6 = arith.constant 0 : index
    %5 = vector.load %arg3[%c0_5, %c0_6] : memref<1x32xf32, #tpu.memory_space<vmem>>, vector<1x32xf32>
    %6 = vector.broadcast %5 : vector<1x32xf32> to vector<256x32xf32>
    %7 = arith.addf %4, %6 : vector<256x32xf32>
    %8 = arith.negf %7 : vector<256x32xf32>
    %9 = math.exp %8 : vector<256x32xf32>
    %cst_7 = arith.constant 1.000000e+00 : f32
    %10 = vector.broadcast %cst_7 : f32 to vector<256x32xf32>
    %11 = arith.addf %10, %9 : vector<256x32xf32>
    %12 = arith.divf %10, %11 : vector<256x32xf32>
    %13 = arith.mulf %7, %12 : vector<256x32xf32>
    %cst_8 = arith.constant 0.000000e+00 : f32
    %14 = vector.broadcast %cst_8 : f32 to vector<18x18x32xf32>
    %c0_9 = arith.constant 0 : index
    %c0_10 = arith.constant 0 : index
    %c0_11 = arith.constant 0 : index
    %15 = vector.load %arg13[%c0_9, %c0_10, %c0_11] : memref<18x18x32xf32, #tpu.memory_space<vmem>>, vector<18x18x32xf32>
    tpu.vector_store %arg13[%c0_9, %c0_10, %c0_11], %14 {strides = array<i32>} : memref<18x18x32xf32, #tpu.memory_space<vmem>>, vector<18x18x32xf32>,
    %16 = vector.shape_cast %13 : vector<256x32xf32> to vector<16x16x32xf32>
    %c1 = arith.constant 1 : index
    %c1_12 = arith.constant 1 : index
    %c0_13 = arith.constant 0 : index
    %17 = vector.load %arg13[%c1, %c1_12, %c0_13] : memref<18x18x32xf32, #tpu.memory_space<vmem>>, vector<16x16x32xf32>
    tpu.vector_store %arg13[%c1, %c1_12, %c0_13], %16 {strides = array<i32>} : memref<18x18x32xf32, #tpu.memory_space<vmem>>, vector<16x16x32xf32>,
    %c0_14 = arith.constant 0 : index
    %c0_15 = arith.constant 0 : index
    %c0_16 = arith.constant 0 : index
    %18 = vector.load %arg4[%c0_14, %c0_15, %c0_16] : memref<3x3x32xf32, #tpu.memory_space<vmem>>, vector<3x3x32xf32>
    %cst_17 = arith.constant 0.000000e+00 : f32
    %19 = vector.broadcast %cst_17 : f32 to vector<16x16x32xf32>
    %c0_18 = arith.constant 0 : index
    %c0_19 = arith.constant 0 : index
    %c0_20 = arith.constant 0 : index
    %20 = vector.load %arg13[%c0_18, %c0_19, %c0_20] : memref<18x18x32xf32, #tpu.memory_space<vmem>>, vector<16x16x32xf32>
    %21 = vector.extract_strided_slice %18 {offsets = [0, 0, 0], sizes = [1, 1, 32], strides = [1, 1, 1]} : vector<3x3x32xf32> to vector<1x1x32xf32>
    %22 = vector.shape_cast %21 : vector<1x1x32xf32> to vector<1x32xf32>
    %23 = vector.shape_cast %22 : vector<1x32xf32> to vector<1x1x32xf32>
    %24 = vector.broadcast %23 : vector<1x1x32xf32> to vector<16x16x32xf32>
    %25 = arith.mulf %20, %24 : vector<16x16x32xf32>
    %26 = arith.addf %19, %25 : vector<16x16x32xf32>
    %c0_21 = arith.constant 0 : index
    %c1_22 = arith.constant 1 : index
    %c0_23 = arith.constant 0 : index
    %27 = vector.load %arg13[%c0_21, %c1_22, %c0_23] : memref<18x18x32xf32, #tpu.memory_space<vmem>>, vector<16x16x32xf32>
    %28 = vector.extract_strided_slice %18 {offsets = [0, 1, 0], sizes = [1, 1, 32], strides = [1, 1, 1]} : vector<3x3x32xf32> to vector<1x1x32xf32>
    %29 = vector.shape_cast %28 : vector<1x1x32xf32> to vector<1x32xf32>
    %30 = vector.shape_cast %29 : vector<1x32xf32> to vector<1x1x32xf32>
    %31 = vector.broadcast %30 : vector<1x1x32xf32> to vector<16x16x32xf32>
    %32 = arith.mulf %27, %31 : vector<16x16x32xf32>
    %33 = arith.addf %26, %32 : vector<16x16x32xf32>
    %c0_24 = arith.constant 0 : index
    %c2 = arith.constant 2 : index
    %c0_25 = arith.constant 0 : index
    %34 = vector.load %arg13[%c0_24, %c2, %c0_25] : memref<18x18x32xf32, #tpu.memory_space<vmem>>, vector<16x16x32xf32>
    %35 = vector.extract_strided_slice %18 {offsets = [0, 2, 0], sizes = [1, 1, 32], strides = [1, 1, 1]} : vector<3x3x32xf32> to vector<1x1x32xf32>
    %36 = vector.shape_cast %35 : vector<1x1x32xf32> to vector<1x32xf32>
    %37 = vector.shape_cast %36 : vector<1x32xf32> to vector<1x1x32xf32>
    %38 = vector.broadcast %37 : vector<1x1x32xf32> to vector<16x16x32xf32>
    %39 = arith.mulf %34, %38 : vector<16x16x32xf32>
    %40 = arith.addf %33, %39 : vector<16x16x32xf32>
    %c1_26 = arith.constant 1 : index
    %c0_27 = arith.constant 0 : index
    %c0_28 = arith.constant 0 : index
    %41 = vector.load %arg13[%c1_26, %c0_27, %c0_28] : memref<18x18x32xf32, #tpu.memory_space<vmem>>, vector<16x16x32xf32>
    %42 = vector.extract_strided_slice %18 {offsets = [1, 0, 0], sizes = [1, 1, 32], strides = [1, 1, 1]} : vector<3x3x32xf32> to vector<1x1x32xf32>
    %43 = vector.shape_cast %42 : vector<1x1x32xf32> to vector<1x32xf32>
    %44 = vector.shape_cast %43 : vector<1x32xf32> to vector<1x1x32xf32>
    %45 = vector.broadcast %44 : vector<1x1x32xf32> to vector<16x16x32xf32>
    %46 = arith.mulf %41, %45 : vector<16x16x32xf32>
    %47 = arith.addf %40, %46 : vector<16x16x32xf32>
    %c1_29 = arith.constant 1 : index
    %c1_30 = arith.constant 1 : index
    %c0_31 = arith.constant 0 : index
    %48 = vector.load %arg13[%c1_29, %c1_30, %c0_31] : memref<18x18x32xf32, #tpu.memory_space<vmem>>, vector<16x16x32xf32>
    %49 = vector.extract_strided_slice %18 {offsets = [1, 1, 0], sizes = [1, 1, 32], strides = [1, 1, 1]} : vector<3x3x32xf32> to vector<1x1x32xf32>
    %50 = vector.shape_cast %49 : vector<1x1x32xf32> to vector<1x32xf32>
    %51 = vector.shape_cast %50 : vector<1x32xf32> to vector<1x1x32xf32>
    %52 = vector.broadcast %51 : vector<1x1x32xf32> to vector<16x16x32xf32>
    %53 = arith.mulf %48, %52 : vector<16x16x32xf32>
    %54 = arith.addf %47, %53 : vector<16x16x32xf32>
    %c1_32 = arith.constant 1 : index
    %c2_33 = arith.constant 2 : index
    %c0_34 = arith.constant 0 : index
    %55 = vector.load %arg13[%c1_32, %c2_33, %c0_34] : memref<18x18x32xf32, #tpu.memory_space<vmem>>, vector<16x16x32xf32>
    %56 = vector.extract_strided_slice %18 {offsets = [1, 2, 0], sizes = [1, 1, 32], strides = [1, 1, 1]} : vector<3x3x32xf32> to vector<1x1x32xf32>
    %57 = vector.shape_cast %56 : vector<1x1x32xf32> to vector<1x32xf32>
    %58 = vector.shape_cast %57 : vector<1x32xf32> to vector<1x1x32xf32>
    %59 = vector.broadcast %58 : vector<1x1x32xf32> to vector<16x16x32xf32>
    %60 = arith.mulf %55, %59 : vector<16x16x32xf32>
    %61 = arith.addf %54, %60 : vector<16x16x32xf32>
    %c2_35 = arith.constant 2 : index
    %c0_36 = arith.constant 0 : index
    %c0_37 = arith.constant 0 : index
    %62 = vector.load %arg13[%c2_35, %c0_36, %c0_37] : memref<18x18x32xf32, #tpu.memory_space<vmem>>, vector<16x16x32xf32>
    %63 = vector.extract_strided_slice %18 {offsets = [2, 0, 0], sizes = [1, 1, 32], strides = [1, 1, 1]} : vector<3x3x32xf32> to vector<1x1x32xf32>
    %64 = vector.shape_cast %63 : vector<1x1x32xf32> to vector<1x32xf32>
    %65 = vector.shape_cast %64 : vector<1x32xf32> to vector<1x1x32xf32>
    %66 = vector.broadcast %65 : vector<1x1x32xf32> to vector<16x16x32xf32>
    %67 = arith.mulf %62, %66 : vector<16x16x32xf32>
    %68 = arith.addf %61, %67 : vector<16x16x32xf32>
    %c2_38 = arith.constant 2 : index
    %c1_39 = arith.constant 1 : index
    %c0_40 = arith.constant 0 : index
    %69 = vector.load %arg13[%c2_38, %c1_39, %c0_40] : memref<18x18x32xf32, #tpu.memory_space<vmem>>, vector<16x16x32xf32>
    %70 = vector.extract_strided_slice %18 {offsets = [2, 1, 0], sizes = [1, 1, 32], strides = [1, 1, 1]} : vector<3x3x32xf32> to vector<1x1x32xf32>
    %71 = vector.shape_cast %70 : vector<1x1x32xf32> to vector<1x32xf32>
    %72 = vector.shape_cast %71 : vector<1x32xf32> to vector<1x1x32xf32>
    %73 = vector.broadcast %72 : vector<1x1x32xf32> to vector<16x16x32xf32>
    %74 = arith.mulf %69, %73 : vector<16x16x32xf32>
    %75 = arith.addf %68, %74 : vector<16x16x32xf32>
    %c2_41 = arith.constant 2 : index
    %c2_42 = arith.constant 2 : index
    %c0_43 = arith.constant 0 : index
    %76 = vector.load %arg13[%c2_41, %c2_42, %c0_43] : memref<18x18x32xf32, #tpu.memory_space<vmem>>, vector<16x16x32xf32>
    %77 = vector.extract_strided_slice %18 {offsets = [2, 2, 0], sizes = [1, 1, 32], strides = [1, 1, 1]} : vector<3x3x32xf32> to vector<1x1x32xf32>
    %78 = vector.shape_cast %77 : vector<1x1x32xf32> to vector<1x32xf32>
    %79 = vector.shape_cast %78 : vector<1x32xf32> to vector<1x1x32xf32>
    %80 = vector.broadcast %79 : vector<1x1x32xf32> to vector<16x16x32xf32>
    %81 = arith.mulf %76, %80 : vector<16x16x32xf32>
    %82 = arith.addf %75, %81 : vector<16x16x32xf32>
    %c0_44 = arith.constant 0 : index
    %c0_45 = arith.constant 0 : index
    %83 = vector.load %arg5[%c0_44, %c0_45] : memref<1x32xf32, #tpu.memory_space<vmem>>, vector<1x32xf32>
    %84 = vector.shape_cast %83 : vector<1x32xf32> to vector<1x1x32xf32>
    %85 = vector.broadcast %84 : vector<1x1x32xf32> to vector<16x16x32xf32>
    %86 = arith.addf %82, %85 : vector<16x16x32xf32>
    %87 = arith.negf %86 : vector<16x16x32xf32>
    %88 = math.exp %87 : vector<16x16x32xf32>
    %cst_46 = arith.constant 1.000000e+00 : f32
    %89 = vector.broadcast %cst_46 : f32 to vector<16x16x32xf32>
    %90 = arith.addf %89, %88 : vector<16x16x32xf32>
    %91 = arith.divf %89, %90 : vector<16x16x32xf32>
    %92 = arith.mulf %86, %91 : vector<16x16x32xf32>
    %93 = vector.shape_cast %92 : vector<16x16x32xf32> to vector<256x32xf32>
    %cst_47 = arith.constant dense<0.000000e+00> : vector<32xf32>
    %94 = vector.multi_reduction <add>, %93, %cst_47 [0] : vector<256x32xf32> to vector<32xf32>
    %95 = vector.shape_cast %94 : vector<32xf32> to vector<1x32xf32>
    %cst_48 = arith.constant 2.560000e+02 : f32
    %96 = vector.broadcast %cst_48 : f32 to vector<1x32xf32>
    %97 = arith.divf %95, %96 : vector<1x32xf32>
    %c0_49 = arith.constant 0 : index
    %c0_50 = arith.constant 0 : index
    %98 = vector.load %arg6[%c0_49, %c0_50] : memref<32x2xf32, #tpu.memory_space<vmem>>, vector<32x2xf32>
    %cst_51 = arith.constant dense<0.000000e+00> : vector<1x2xf32>
    %99 = tpu.matmul %97, %98, %cst_51 {dimension_numbers = #tpu.dot_dimension_numbers<[1], [0], [0], [1], [0, 0, 1, 1], [], []>} : vector<1x32xf32>, vector<32x2xf32>, vector<1x2xf32> -> vector<1x2xf32>
    %c0_52 = arith.constant 0 : index
    %c0_53 = arith.constant 0 : index
    %100 = vector.load %arg7[%c0_52, %c0_53] : memref<1x2xf32, #tpu.memory_space<vmem>>, vector<1x2xf32>
    %101 = arith.addf %99, %100 : vector<1x2xf32>
    %102 = arith.negf %101 : vector<1x2xf32>
    %103 = math.exp %102 : vector<1x2xf32>
    %cst_54 = arith.constant 1.000000e+00 : f32
    %104 = vector.broadcast %cst_54 : f32 to vector<1x2xf32>
    %105 = arith.addf %104, %103 : vector<1x2xf32>
    %106 = arith.divf %104, %105 : vector<1x2xf32>
    %107 = arith.mulf %101, %106 : vector<1x2xf32>
    %c0_55 = arith.constant 0 : index
    %c0_56 = arith.constant 0 : index
    %108 = vector.load %arg8[%c0_55, %c0_56] : memref<2x32xf32, #tpu.memory_space<vmem>>, vector<2x32xf32>
    %cst_57 = arith.constant dense<0.000000e+00> : vector<1x32xf32>
    %109 = tpu.matmul %107, %108, %cst_57 {dimension_numbers = #tpu.dot_dimension_numbers<[1], [0], [0], [1], [0, 0, 1, 1], [], []>} : vector<1x2xf32>, vector<2x32xf32>, vector<1x32xf32> -> vector<1x32xf32>
    %c0_58 = arith.constant 0 : index
    %c0_59 = arith.constant 0 : index
    %110 = vector.load %arg9[%c0_58, %c0_59] : memref<1x32xf32, #tpu.memory_space<vmem>>, vector<1x32xf32>
    %111 = arith.addf %109, %110 : vector<1x32xf32>
    %112 = arith.negf %111 : vector<1x32xf32>
    %113 = math.exp %112 : vector<1x32xf32>
    %cst_60 = arith.constant 1.000000e+00 : f32
    %114 = vector.broadcast %cst_60 : f32 to vector<1x32xf32>
    %115 = arith.addf %114, %113 : vector<1x32xf32>
    %116 = arith.divf %114, %115 : vector<1x32xf32>
    %117 = vector.broadcast %116 : vector<1x32xf32> to vector<256x32xf32>
    %118 = arith.mulf %93, %117 : vector<256x32xf32>
    %c0_61 = arith.constant 0 : index
    %c0_62 = arith.constant 0 : index
    %119 = vector.load %arg10[%c0_61, %c0_62] : memref<32x8xf32, #tpu.memory_space<vmem>>, vector<32x8xf32>
    %cst_63 = arith.constant dense<0.000000e+00> : vector<256x8xf32>
    %120 = tpu.matmul %118, %119, %cst_63 {dimension_numbers = #tpu.dot_dimension_numbers<[1], [0], [0], [1], [0, 0, 1, 1], [], []>} : vector<256x32xf32>, vector<32x8xf32>, vector<256x8xf32> -> vector<256x8xf32>
    %c0_64 = arith.constant 0 : index
    %c0_65 = arith.constant 0 : index
    %121 = vector.load %arg11[%c0_64, %c0_65] : memref<1x8xf32, #tpu.memory_space<vmem>>, vector<1x8xf32>
    %122 = vector.broadcast %121 : vector<1x8xf32> to vector<256x8xf32>
    %123 = arith.addf %120, %122 : vector<256x8xf32>
    %124 = arith.addf %123, %2 : vector<256x8xf32>
    %125 = vector.shape_cast %124 : vector<256x8xf32> to vector<16x16x8xf32>
    %c0_66 = arith.constant 0 : index
    %c0_67 = arith.constant 0 : index
    %c0_68 = arith.constant 0 : index
    %c0_69 = arith.constant 0 : index
    %126 = vector.load %arg12[%c0_66, %c0_67, %c0_68, %c0_69] : memref<1x16x16x8xf32, #tpu.memory_space<vmem>>, vector<1x16x16x8xf32>
    %127 = vector.shape_cast %126 : vector<1x16x16x8xf32> to vector<16x16x8xf32>
    %128 = vector.shape_cast %125 : vector<16x16x8xf32> to vector<1x16x16x8xf32>
    tpu.vector_store %arg12[%c0_66, %c0_67, %c0_68, %c0_69], %128 {strides = array<i32>} : memref<1x16x16x8xf32, #tpu.memory_space<vmem>>, vector<1x16x16x8xf32>,
    return
  }
  func.func @transform_0(%arg0: i32) -> (i32, i32, i32, i32) {
    %c0_i32 = arith.constant 0 : i32
    %c0_i32_0 = arith.constant 0 : i32
    %c0_i32_1 = arith.constant 0 : i32
    %c0_i32_2 = arith.constant 0 : i32
    return %arg0, %c0_i32, %c0_i32_0, %c0_i32_1 : i32, i32, i32, i32
  }
  func.func @transform_1(%arg0: i32) -> (i32, i32) {
    %c0_i32 = arith.constant 0 : i32
    %c0_i32_0 = arith.constant 0 : i32
    %c0_i32_1 = arith.constant 0 : i32
    return %c0_i32, %c0_i32_0 : i32, i32
  }
  func.func @transform_2(%arg0: i32) -> (i32, i32) {
    %c0_i32 = arith.constant 0 : i32
    %c0_i32_0 = arith.constant 0 : i32
    %c0_i32_1 = arith.constant 0 : i32
    return %c0_i32, %c0_i32_0 : i32, i32
  }
  func.func @transform_3(%arg0: i32) -> (i32, i32, i32) {
    %c0_i32 = arith.constant 0 : i32
    %c0_i32_0 = arith.constant 0 : i32
    %c0_i32_1 = arith.constant 0 : i32
    %c0_i32_2 = arith.constant 0 : i32
    return %c0_i32, %c0_i32_0, %c0_i32_1 : i32, i32, i32
  }
  func.func @transform_4(%arg0: i32) -> (i32, i32) {
    %c0_i32 = arith.constant 0 : i32
    %c0_i32_0 = arith.constant 0 : i32
    %c0_i32_1 = arith.constant 0 : i32
    return %c0_i32, %c0_i32_0 : i32, i32
  }
  func.func @transform_5(%arg0: i32) -> (i32, i32) {
    %c0_i32 = arith.constant 0 : i32
    %c0_i32_0 = arith.constant 0 : i32
    %c0_i32_1 = arith.constant 0 : i32
    return %c0_i32, %c0_i32_0 : i32, i32
  }
  func.func @transform_6(%arg0: i32) -> (i32, i32) {
    %c0_i32 = arith.constant 0 : i32
    %c0_i32_0 = arith.constant 0 : i32
    %c0_i32_1 = arith.constant 0 : i32
    return %c0_i32, %c0_i32_0 : i32, i32
  }
  func.func @transform_7(%arg0: i32) -> (i32, i32) {
    %c0_i32 = arith.constant 0 : i32
    %c0_i32_0 = arith.constant 0 : i32
    %c0_i32_1 = arith.constant 0 : i32
    return %c0_i32, %c0_i32_0 : i32, i32
  }
  func.func @transform_8(%arg0: i32) -> (i32, i32) {
    %c0_i32 = arith.constant 0 : i32
    %c0_i32_0 = arith.constant 0 : i32
    %c0_i32_1 = arith.constant 0 : i32
    return %c0_i32, %c0_i32_0 : i32, i32
  }
  func.func @transform_9(%arg0: i32) -> (i32, i32) {
    %c0_i32 = arith.constant 0 : i32
    %c0_i32_0 = arith.constant 0 : i32
    %c0_i32_1 = arith.constant 0 : i32
    return %c0_i32, %c0_i32_0 : i32, i32
  }
  func.func @transform_10(%arg0: i32) -> (i32, i32) {
    %c0_i32 = arith.constant 0 : i32
    %c0_i32_0 = arith.constant 0 : i32
    %c0_i32_1 = arith.constant 0 : i32
    return %c0_i32, %c0_i32_0 : i32, i32
  }
  func.func @transform_11(%arg0: i32) -> (i32, i32, i32, i32) {
    %c0_i32 = arith.constant 0 : i32
    %c0_i32_0 = arith.constant 0 : i32
    %c0_i32_1 = arith.constant 0 : i32
    %c0_i32_2 = arith.constant 0 : i32
    return %arg0, %c0_i32, %c0_i32_0, %c0_i32_1 : i32, i32, i32, i32
  }
}

</mosaic_0001>

<bundles_post_ra>
// kernel: tpu_custom_call.1
= control target key start
LH: loop header
LB: loop body
LE: loop exit
PB: predicated region body
PF: predicated region fallthrough
CT: control target
= control target key end

     0   :  { %s3699_s17 = smov 0   ;;  %s5271_s0 = inlined_call_operand.vmem [shape: f32[2,16,16,8], index: 0, kind: input, shape index: {}]   ;;  %s5272_s1 = inlined_call_operand.vmem [shape: f32[8,32], index: 1, kind: input, shape index: {}]   ;;  %s5273_s2 = inlined_call_operand.vmem [shape: f32[1,32], index: 2, kind: input, shape index: {}]   ;;  %s5274_s3 = inlined_call_operand.vmem [shape: f32[3,3,32], index: 3, kind: input, shape index: {}]   ;;  %s5275_s4 = inlined_call_operand.vmem [shape: f32[1,32], index: 4, kind: input, shape index: {}]   ;;  %s5276_s5 = inlined_call_operand.vmem [shape: f32[32,2], index: 5, kind: input, shape index: {}]   ;;  %s5277_s6 = inlined_call_operand.vmem [shape: f32[1,2], index: 6, kind: input, shape index: {}]   ;;  %s5278_s7 = inlined_call_operand.vmem [shape: f32[2,32], index: 7, kind: input, shape index: {}]   ;;  %s5279_s8 = inlined_call_operand.vmem [shape: f32[1,32], index: 8, kind: input, shape index: {}]   ;;  %s5280_s9 = inlined_call_operand.vmem [shape: f32[32,8], index: 9, kind: input, shape index: {}]   ;;  %s5281_s10 = inlined_call_operand.vmem [shape: f32[1,8], index: 10, kind: input, shape index: {}]   ;;  %s5282_s11 = inlined_call_operand.vmem [shape: f32[2,16,16,8], index: 11, kind: output, shape index: {}]  }
   0x1 LB: > { %s2958_s18 = sadd.s32 4294967295, %s3634_s17   ;;  %p2962_p0 = scmp.ge.s32.totalorder %s3634_s17, 1  ;;  %s3634_s17 = sphi %s3699_s17, %s21_s17  }
   0x2   : > { %p337_p1 = scmp.lt.s32.totalorder %s3634_s17, 3 }
   0x4   : > { %p338_p2 = pnand %p2962_p0, %p337_p1 }
   0x6   : > { %341 = sbr.rel (%p338_p2) target bundleno = 1308 (0x51c), region = 64 }
   0xd   : > { %v419_v0 = vld [vmem:[%s5272_s1] sm:$0xff]  ;;  %p377_p3 = scmp.lt.s32.totalorder %s2958_s18, 1  ;;  %vm427_vm0 = vcmask 64512   ;;  %vm973_vm1 = vcmask 261120   ;;  %vm976_vm2 = vcmask 254976   ;;  %v5283_v33 = vmov 0.0  }
   0xe   : > { %3183 = vmatprep.subr.mxu0 %v419_v0  ;;  %979 = vst.msk [vmem:[#allocation2 + $0x20] sm:$0xff] %vm973_vm1, %v5283_v33  ;;  %974 = vst.msk [vmem:[#allocation2] sm:$0xff] %vm973_vm1, %v5283_v33  ;;  %3244 = vmatprep.subr.mxu1 %v5283_v33  ;;  %v3896_v34 = vld [vmem:[%s5273_s2] ss:$0 sm:$0xff]  ;;  %v1097_v61 = vlaneseq  ;;  %vm3638_vm3 = vmmov 0   ;;  %vm2391_vm4 = vcmask 1041408  }
   0xf   : > { %3184 = vmatpush3.msra.mxu0 %v419_v0  ;;  %s5374_s18 = smov (!%p377_p3, %s2958_s18), 1  ;;  %980 = vst.msk [vmem:[#allocation2 + $0x28] sm:$0x3] %vm976_vm2, %v5283_v33  ;;  %977 = vst.msk [vmem:[#allocation2 + $0x10] sm:$0x3] %vm976_vm2, %v5283_v33  ;;  %vm2387_vm5 = vcmask 15360  }
  0x10   : > { %s3105_s21 = sshll.u32 %s5374_s18, 8  ;;  %975 = vst.msk [vmem:[#allocation2 + $0x8] sm:$0xff] %vm973_vm1, %v5283_v33  ;;  %978 = vst.msk [vmem:[#allocation2 + $0x18] sm:$0xff] %vm973_vm1, %v5283_v33 }
  0x11   : > { %s3718_s24 = scalar_lea.vmem %s5271_s0, %s3105_s21  ;;  %981 = vst.msk [vmem:[#allocation2 + $0x30] sm:$0xff] %vm973_vm1, %v5283_v33  ;;  %982 = vst.msk [vmem:[#allocation2 + $0x38] sm:$0xff] %vm973_vm1, %v5283_v33  ;;  %s5139_s16 = scalar_lea.vmem %s5282_s11, %s3105_s21 }
  0x12   : > { %v387_v1 = vld [vmem:[%s3718_s24] sm:$0xff]  ;;  %v388_v2 = vld [vmem:[%s3718_s24 + $0x8] sm:$0xff]  ;;  %v389_v3 = vld [vmem:[%s3718_s24 + $0x10] sm:$0xff]  ;;  %983 = vst.msk [vmem:[#allocation2 + $0x40] sm:$0x3] %vm976_vm2, %v5283_v33 }
  0x13   : > { %3185 = vmatprep.mubr.msk.f32.mxu0 %vm427_vm0, %v387_v1  ;;  %v390_v4 = vld [vmem:[%s3718_s24 + $0x18] sm:$0xff]  ;;  %v391_v5 = vld [vmem:[%s3718_s24 + $0x20] sm:$0xff]  ;;  %v392_v6 = vld [vmem:[%s3718_s24 + $0x28] sm:$0xff]  ;;  %984 = vst.msk [vmem:[#allocation2 + $0x48] sm:$0xff] %vm973_vm1, %v5283_v33 }
  0x14   : > { %3186 = vmatmul.mubr.msk.f32.vlgmr.msra.gmra.mrb[0].mxu0 %vm427_vm0, %v388_v2  ;;  %v393_v7 = vld [vmem:[%s3718_s24 + $0x30] sm:$0xff]  ;;  %v394_v8 = vld [vmem:[%s3718_s24 + $0x38] sm:$0xff]  ;;  %v395_v9 = vld [vmem:[%s3718_s24 + $0x40] sm:$0xff]  ;;  %985 = vst.msk [vmem:[#allocation2 + $0x50] sm:$0xff] %vm973_vm1, %v5283_v33 }
  0x15   : > { %3188 = vmatprep.mubr.msk.f32.mxu0 %vm427_vm0, %v389_v3  ;;  %v396_v10 = vld [vmem:[%s3718_s24 + $0x48] sm:$0xff]  ;;  %v397_v11 = vld [vmem:[%s3718_s24 + $0x50] sm:$0xff]  ;;  %v398_v12 = vld [vmem:[%s3718_s24 + $0x58] sm:$0xff]  ;;  %986 = vst.msk [vmem:[#allocation2 + $0x58] sm:$0x3] %vm976_vm2, %v5283_v33 }
  0x16   : > { %v399_v13 = vld [vmem:[%s3718_s24 + $0x60] sm:$0xff]  ;;  %v400_v14 = vld [vmem:[%s3718_s24 + $0x68] sm:$0xff]  ;;  %v401_v15 = vld [vmem:[%s3718_s24 + $0x70] sm:$0xff]  ;;  %987 = vst.msk [vmem:[#allocation2 + $0x60] sm:$0xff] %vm973_vm1, %v5283_v33 }
  0x17   : > { %v402_v16 = vld [vmem:[%s3718_s24 + $0x78] sm:$0xff]  ;;  %v403_v17 = vld [vmem:[%s3718_s24 + $0x80] sm:$0xff]  ;;  %v404_v18 = vld [vmem:[%s3718_s24 + $0x88] sm:$0xff]  ;;  %988 = vst.msk [vmem:[#allocation2 + $0x68] sm:$0xff] %vm973_vm1, %v5283_v33 }
  0x18   : > { %3189 = vmatmul.mubr.msk.f32.gmra.mrb[2].mxu0 %vm427_vm0, %v390_v4  ;;  %v405_v19 = vld [vmem:[%s3718_s24 + $0x90] sm:$0xff]  ;;  %v406_v20 = vld [vmem:[%s3718_s24 + $0x98] sm:$0xff]  ;;  %v407_v21 = vld [vmem:[%s3718_s24 + $0xa0] sm:$0xff]  ;;  %989 = vst.msk [vmem:[#allocation2 + $0x70] sm:$0x3] %vm976_vm2, %v5283_v33  ;;  %v1098_v4 = vshrl.u32 %v1097_v61, 7 }
  0x19   : > { %3191 = vmatprep.mubr.msk.f32.mxu0 %vm427_vm0, %v391_v5  ;;  %v408_v22 = vld [vmem:[%s3718_s24 + $0xa8] sm:$0xff]  ;;  %v409_v23 = vld [vmem:[%s3718_s24 + $0xb0] sm:$0xff]  ;;  %v410_v24 = vld [vmem:[%s3718_s24 + $0xb8] sm:$0xff]  ;;  %990 = vst.msk [vmem:[#allocation2 + $0x78] sm:$0xff] %vm973_vm1, %v5283_v33 }
  0x1a   : > { %v411_v25 = vld [vmem:[%s3718_s24 + $0xc0] sm:$0xff]  ;;  %v412_v26 = vld [vmem:[%s3718_s24 + $0xc8] sm:$0xff]  ;;  %v413_v27 = vld [vmem:[%s3718_s24 + $0xd0] sm:$0xff]  ;;  %991 = vst.msk [vmem:[#allocation2 + $0x80] sm:$0xff] %vm973_vm1, %v5283_v33 }
  0x1b   : > { %v414_v28 = vld [vmem:[%s3718_s24 + $0xd8] sm:$0xff]  ;;  %v415_v29 = vld [vmem:[%s3718_s24 + $0xe0] sm:$0xff]  ;;  %v416_v30 = vld [vmem:[%s3718_s24 + $0xe8] sm:$0xff]  ;;  %992 = vst.msk [vmem:[#allocation2 + $0x88] sm:$0x3] %vm976_vm2, %v5283_v33 }
  0x1c   : > { %3192 = vmatmul.mubr.msk.f32.gmra.mrb[4].mxu0 %vm427_vm0, %v392_v6  ;;  %v417_v31 = vld [vmem:[%s3718_s24 + $0xf0] sm:$0xff]  ;;  %v418_v32 = vld [vmem:[%s3718_s24 + $0xf8] sm:$0xff]  ;;  %993 = vst.msk [vmem:[#allocation2 + $0x90] sm:$0xff] %vm973_vm1, %v5283_v33  ;;  %994 = vst.msk [vmem:[#allocation2 + $0x98] sm:$0xff] %vm973_vm1, %v5283_v33 }
  0x1d   : > { %3194 = vmatprep.mubr.msk.f32.mxu0 %vm427_vm0, %v393_v7  ;;  %995 = vst.msk [vmem:[#allocation2 + $0xa0] sm:$0x3] %vm976_vm2, %v5283_v33  ;;  %998 = vst.msk [vmem:[#allocation2 + $0xb8] sm:$0x3] %vm976_vm2, %v5283_v33 }
  0x1e   : > { %996 = vst.msk [vmem:[#allocation2 + $0xa8] sm:$0xff] %vm973_vm1, %v5283_v33  ;;  %997 = vst.msk [vmem:[#allocation2 + $0xb0] sm:$0xff] %vm973_vm1, %v5283_v33 }
  0x1f   : > { %999 = vst.msk [vmem:[#allocation2 + $0xc0] sm:$0xff] %vm973_vm1, %v5283_v33  ;;  %1000 = vst.msk [vmem:[#allocation2 + $0xc8] sm:$0xff] %vm973_vm1, %v5283_v33 }
  0x20   : > { %3195 = vmatmul.mubr.msk.f32.gmra.mrb[6].mxu0 %vm427_vm0, %v394_v8  ;;  %1001 = vst.msk [vmem:[#allocation2 + $0xd0] sm:$0x3] %vm976_vm2, %v5283_v33  ;;  %1004 = vst.msk [vmem:[#allocation2 + $0xe8] sm:$0x3] %vm976_vm2, %v5283_v33 }
  0x21   : > { %3197 = vmatprep.mubr.msk.f32.mxu0 %vm427_vm0, %v395_v9  ;;  %1002 = vst.msk [vmem:[#allocation2 + $0xd8] sm:$0xff] %vm973_vm1, %v5283_v33  ;;  %1003 = vst.msk [vmem:[#allocation2 + $0xe0] sm:$0xff] %vm973_vm1, %v5283_v33 }
  0x22   : > { %1005 = vst.msk [vmem:[#allocation2 + $0xf0] sm:$0xff] %vm973_vm1, %v5283_v33  ;;  %1006 = vst.msk [vmem:[#allocation2 + $0xf8] sm:$0xff] %vm973_vm1, %v5283_v33 }
  0x23   : > { %1007 = vst.msk [vmem:[#allocation2 + $0x100] sm:$0x3] %vm976_vm2, %v5283_v33  ;;  %1010 = vst.msk [vmem:[#allocation2 + $0x118] sm:$0x3] %vm976_vm2, %v5283_v33 }
  0x24   : > { %3198 = vmatmul.mubr.msk.f32.gmra.mrb[8].mxu0 %vm427_vm0, %v396_v10  ;;  %1008 = vst.msk [vmem:[#allocation2 + $0x108] sm:$0xff] %vm973_vm1, %v5283_v33  ;;  %1009 = vst.msk [vmem:[#allocation2 + $0x110] sm:$0xff] %vm973_vm1, %v5283_v33 }
  0x25   : > { %3200 = vmatprep.mubr.msk.f32.mxu0 %vm427_vm0, %v397_v11  ;;  %1011 = vst.msk [vmem:[#allocation2 + $0x120] sm:$0xff] %vm973_vm1, %v5283_v33  ;;  %1012 = vst.msk [vmem:[#allocation2 + $0x128] sm:$0xff] %vm973_vm1, %v5283_v33 }
  0x26   : > { %1013 = vst.msk [vmem:[#allocation2 + $0x130] sm:$0x3] %vm976_vm2, %v5283_v33  ;;  %1016 = vst.msk [vmem:[#allocation2 + $0x148] sm:$0x3] %vm976_vm2, %v5283_v33 }
  0x27   : > { %1014 = vst.msk [vmem:[#allocation2 + $0x138] sm:$0xff] %vm973_vm1, %v5283_v33  ;;  %1015 = vst.msk [vmem:[#allocation2 + $0x140] sm:$0xff] %vm973_vm1, %v5283_v33 }
  0x28   : > { %3201 = vmatmul.mubr.msk.f32.gmra.mrb[10].mxu0 %vm427_vm0, %v398_v12  ;;  %1017 = vst.msk [vmem:[#allocation2 + $0x150] sm:$0xff] %vm973_vm1, %v5283_v33  ;;  %1018 = vst.msk [vmem:[#allocation2 + $0x158] sm:$0xff] %vm973_vm1, %v5283_v33  ;;  %v3933_v12 = vsub.s32 1, %v1098_v4 }
  0x29   : > { %3203 = vmatprep.mubr.msk.f32.mxu0 %vm427_vm0, %v399_v13  ;;  %1019 = vst.msk [vmem:[#allocation2 + $0x160] sm:$0x3] %vm976_vm2, %v5283_v33  ;;  %1022 = vst.msk [vmem:[#allocation2 + $0x178] sm:$0x3] %vm976_vm2, %v5283_v33  ;;  %v3935_v13 = vsub.s32 0, %v1098_v4 }
  0x2a   : > { %1020 = vst.msk [vmem:[#allocation2 + $0x168] sm:$0xff] %vm973_vm1, %v5283_v33  ;;  %1021 = vst.msk [vmem:[#allocation2 + $0x170] sm:$0xff] %vm973_vm1, %v5283_v33 }
  0x2b   : > { %1023 = vst.msk [vmem:[#allocation2 + $0x180] sm:$0xff] %vm973_vm1, %v5283_v33  ;;  %1024 = vst.msk [vmem:[#allocation2 + $0x188] sm:$0xff] %vm973_vm1, %v5283_v33 }
  0x2c   : > { %3204 = vmatmul.mubr.msk.f32.gmra.mrb[12].mxu0 %vm427_vm0, %v400_v14  ;;  %1025 = vst.msk [vmem:[#allocation2 + $0x190] sm:$0x3] %vm976_vm2, %v5283_v33  ;;  %1028 = vst.msk [vmem:[#allocation2 + $0x1a8] sm:$0x3] %vm976_vm2, %v5283_v33 }
  0x2d   : > { %3206 = vmatprep.mubr.msk.f32.mxu0 %vm427_vm0, %v401_v15  ;;  %1026 = vst.msk [vmem:[#allocation2 + $0x198] sm:$0xff] %vm973_vm1, %v5283_v33  ;;  %1027 = vst.msk [vmem:[#allocation2 + $0x1a0] sm:$0xff] %vm973_vm1, %v5283_v33 }
  0x2e   : > { %5310 = vst [vmem:[#allocation3_spill] sm:$0xff] %v3935_v13 }
  0x30   : > { %3207 = vmatmul.mubr.msk.f32.gmra.mrb[14].mxu0 %vm427_vm0, %v402_v16 }
  0x31   : > { %3209 = vmatprep.mubr.msk.f32.mxu0 %vm427_vm0, %v403_v17  ;;  %v1062_v17 = vld [vmem:[%s5274_s3] sm:$0x7] }
  0x34   : > { %3210 = vmatmul.mubr.msk.f32.gmra.mrb[16].mxu0 %vm427_vm0, %v404_v18 }
  0x35   : > { %3212 = vmatprep.mubr.msk.f32.mxu0 %vm427_vm0, %v405_v19 }
  0x38   : > { %3213 = vmatmul.mubr.msk.f32.gmra.mrb[18].mxu0 %vm427_vm0, %v406_v20 }
  0x39   : > { %3215 = vmatprep.mubr.msk.f32.mxu0 %vm427_vm0, %v407_v21 }
  0x3c   : > { %3216 = vmatmul.mubr.msk.f32.gmra.mrb[20].mxu0 %vm427_vm0, %v408_v22  ;;  %v3951_v22 = vsub.s32 2, %v1098_v4 }
  0x3d   : > { %3218 = vmatprep.mubr.msk.f32.mxu0 %vm427_vm0, %v409_v23 }
  0x40   : > { %3219 = vmatmul.mubr.msk.f32.gmra.mrb[22].mxu0 %vm427_vm0, %v410_v24 }
  0x41   : > { %3221 = vmatprep.mubr.msk.f32.mxu0 %vm427_vm0, %v411_v25 }
  0x44   : > { %3222 = vmatmul.mubr.msk.f32.gmra.mrb[24].mxu0 %vm427_vm0, %v412_v26 }
  0x45   : > { %3224 = vmatprep.mubr.msk.f32.mxu0 %vm427_vm0, %v413_v27 }
  0x48   : > { %3225 = vmatmul.mubr.msk.f32.gmra.mrb[26].mxu0 %vm427_vm0, %v414_v28  ;;  %v3958_v28 = vrot.slane %v1062_v17, %v3933_v12 }
  0x49   : > { %3227 = vmatprep.mubr.msk.f32.mxu0 %vm427_vm0, %v415_v29  ;;  %v3961_v29 = vrot.slane %v1062_v17, %v3935_v13 }
  0x4c   : > { %3228 = vmatmul.mubr.msk.f32.gmra.mrb[28].mxu0 %vm427_vm0, %v416_v30 }
  0x4d   : > { %3230 = vmatprep.mubr.msk.f32.mxu0 %vm427_vm0, %v417_v31 }
  0x50   : > { %3231 = vmatmul.mubr.msk.f32.gmra.mrb[30].mxu0 %vm427_vm0, %v418_v32 }
  0xe7   : > { %v3187_v35 = vpop.f32.mrb[0].mxu0 }
  0xe8   : > { %v3899_v36 = vadd.f32 %v3187_v35, %v3896_v34  ;;  %v590_v37 = vpop.f32.mrb[1].mxu0  ;;  %v1065_v35 = vld [vmem:[#allocation2] sm:$0xff] }
  0xe9   : > { %v3902_v38 = vadd.f32 %v3896_v34, %v590_v37  ;;  %v1165_v37 = vld [vmem:[#allocation2 + $0x1] sm:$0xff] }
  0xea   : > { %v3001_v39 = vmul.f32 -1.442695, %v3899_v36 }
  0xeb   : > { %v3000_v40 = vmul.f32 -1.442695, %v3902_v38  ;;  %v3190_v41 = vpop.f32.mrb[2].mxu0 }
  0xec   : > { %3330 = vpow2.f32 %v3001_v39  ;;  %v3907_v42 = vadd.f32 %v3190_v41, %v3896_v34  ;;  %v600_v43 = vpop.f32.mrb[3].mxu0 }
  0xed   : > { %3332 = vpow2.f32 %v3000_v40  ;;  %v3910_v44 = vadd.f32 %v3896_v34, %v600_v43  ;;  %v1166_v40 = vld [vmem:[#allocation2 + $0x9] sm:$0xff] }
  0xee   : > { %v3003_v45 = vmul.f32 -1.442695, %v3907_v42 }
  0xef   : > { %v3002_v46 = vmul.f32 -1.442695, %v3910_v44  ;;  %v3193_v47 = vpop.f32.mrb[4].mxu0 }
  0xf0   : > { %3334 = vpow2.f32 %v3003_v45  ;;  %v3915_v48 = vadd.f32 %v3193_v47, %v3896_v34  ;;  %v610_v49 = vpop.f32.mrb[5].mxu0  ;;  %v3971_v45 = vrot.slane %v1062_v17, %v3951_v22  ;;  %v1101_v47 = vmul.f32 %v3961_v29, %v1065_v35 }
  0xf1   : > { %3336 = vpow2.f32 %v3002_v46  ;;  %v3918_v50 = vadd.f32 %v3896_v34, %v610_v49  ;;  %v1201_v49 = vmul.f32 %v3958_v28, %v1165_v37 }
  0xf2   : > { %v3005_v51 = vmul.f32 -1.442695, %v3915_v48 }
  0xf3   : > { %v3004_v52 = vmul.f32 -1.442695, %v3918_v50  ;;  %v3196_v53 = vpop.f32.mrb[6].mxu0 }
  0xf4   : > { %3338 = vpow2.f32 %v3005_v51  ;;  %v3923_v54 = vadd.f32 %v3196_v53, %v3896_v34  ;;  %v620_v55 = vpop.f32.mrb[7].mxu0  ;;  %v1063_v53 = vld [vmem:[%s5274_s3 + $0x4] sm:$0x7] }
  0xf5   : > { %3340 = vpow2.f32 %v3004_v52  ;;  %v3929_v10 = vadd.f32 %v3896_v34, %v620_v55 }
  0xf6   : > { %v3331_v56 = vpop.eup %3330  ;;  %v3007_v57 = vmul.f32 -1.442695, %v3923_v54 }
  0xf7   : > { %v3333_v58 = vpop.eup %3332  ;;  %v846_v59 = vadd.f32 1.0, %v3331_v56  ;;  %v3199_v60 = vpop.f32.mrb[8].mxu0  ;;  %v3006_v24 = vmul.f32 -1.442695, %v3929_v10  ;;  %v1202_v56 = vmul.f32 %v3958_v28, %v1166_v40 }
  0xf8   : > { %v845_v62 = vadd.f32 1.0, %v3333_v58  ;;  %3342 = vpow2.f32 %v3007_v57  ;;  %v630_v63 = vpop.f32.mrb[9].mxu0  ;;  %v3938_v15 = vadd.f32 %v3199_v60, %v3896_v34  ;;  %v1265_v57 = vld [vmem:[#allocation2 + $0x2] sm:$0xff] }
  0xf9   : > { %3344 = vrcp.f32 %v846_v59  ;;  %v3946_v18 = vadd.f32 %v3896_v34, %v630_v63  ;;  %v1266_v59 = vld [vmem:[#allocation2 + $0xa] sm:$0xff]  ;;  %v1301_v63 = vmul.f32 %v3971_v45, %v1265_v57 }
  0xfa   : > { %v3335_v0 = vpop.eup %3334  ;;  %3346 = vrcp.f32 %v845_v62  ;;  %v3009_v30 = vmul.f32 -1.442695, %v3938_v15  ;;  %v1233_v62 = vadd.f32 %v1201_v49, %v1101_v47 }
  0xfb   : > { %v3337_v1 = vpop.eup %3336  ;;  %v848_v2 = vadd.f32 1.0, %v3335_v0  ;;  %v3202_v3 = vpop.f32.mrb[10].mxu0  ;;  %v3008_v39 = vmul.f32 -1.442695, %v3946_v18  ;;  %v3993_v0 = vrot.slane %v1063_v53, %v3935_v13 }
  0xfc   : > { %v847_v5 = vadd.f32 1.0, %v3337_v1  ;;  %v3926_v6 = vpop.f32.mrb[11].mxu0  ;;  %v3949_v20 = vadd.f32 %v3202_v3, %v3896_v34  ;;  %v1302_v3 = vmul.f32 %v3971_v45, %v1266_v59  ;;  %v1333_v17 = vadd.f32 %v1301_v63, %v1233_v62 }
  0xfd   : > { %3348 = vrcp.f32 %v848_v2 }
  0xfe   : > { %v3339_v7 = vpop.eup %3338  ;;  %3350 = vrcp.f32 %v847_v5  ;;  %v3011_v41 = vmul.f32 -1.442695, %v3949_v20 }
  0xff   : > { %v3341_v8 = vpop.eup %3340  ;;  %v850_v9 = vadd.f32 1.0, %v3339_v7  ;;  %v3931_v11 = vpop.f32.mrb[12].mxu0 }
 0x100   : > { %v849_v14 = vadd.f32 1.0, %v3341_v8  ;;  %v3940_v16 = vpop.f32.mrb[13].mxu0 }
 0x101   : > { %3352 = vrcp.f32 %v850_v9 }
 0x102   : > { %v3343_v19 = vpop.eup %3342  ;;  %3354 = vrcp.f32 %v849_v14 }
 0x103   : > { %v3345_v21 = vpop.eup %3344  ;;  %v852_v23 = vadd.f32 1.0, %v3343_v19  ;;  %v3954_v25 = vpop.f32.mrb[14].mxu0 }
 0x104   : > { %v3347_v26 = vpop.eup %3346  ;;  %v942_v27 = vmul.f32 %v3345_v21, %v3899_v36  ;;  %v3964_v31 = vpop.f32.mrb[15].mxu0  ;;  %v1066_v36 = vld [vmem:[#allocation2 + $0x8] sm:$0xff] }
 0x105   : > { %v941_v32 = vmul.f32 %v3347_v26, %v3902_v38  ;;  %3356 = vrcp.f32 %v852_v23  ;;  %v1102_v55 = vmul.f32 %v3961_v29, %v1066_v36 }
 0x106   : > { %1031 = vst.msk [vmem:[#allocation2 + $0x21] sm:$0xff] %vm973_vm1, %v942_v27  ;;  %3358 = vpow2.f32 %v3006_v24 }
 0x107   : > { %v3349_v43 = vpop.eup %3348  ;;  %1030 = vst.msk [vmem:[#allocation2 + $0x19] sm:$0xff] %vm973_vm1, %v941_v32  ;;  %v3974_v46 = vpop.f32.mrb[16].mxu0  ;;  %3360 = vpow2.f32 %v3009_v30  ;;  %v1234_v2 = vadd.f32 %v1202_v56, %v1102_v55  ;;  %v4010_v30 = vrot.slane %v1063_v53, %v3933_v12  ;;  %v4025_v56 = vrot.slane %v1063_v53, %v3951_v22 }
 0x108   : > { %v3351_v38 = vpop.eup %3350  ;;  %v944_v51 = vmul.f32 %v3349_v43, %v3907_v42  ;;  %v3979_v52 = vpop.f32.mrb[17].mxu0  ;;  %3362 = vpow2.f32 %v3008_v39 }
 0x109   : > { %v943_v58 = vmul.f32 %v3351_v38, %v3910_v44  ;;  %3364 = vpow2.f32 %v3011_v41  ;;  %v1334_v23 = vadd.f32 %v1302_v3, %v1234_v2 }
 0x10a   : > { %1033 = vst.msk [vmem:[#allocation2 + $0x39] sm:$0xff] %vm973_vm1, %v944_v51  ;;  %v1064_v51 = vld [vmem:[%s5274_s3 + $0x8] sm:$0x7] }
 0x10b   : > { %v3353_v42 = vpop.eup %3352  ;;  %1032 = vst.msk [vmem:[#allocation2 + $0x31] sm:$0xff] %vm973_vm1, %v943_v58  ;;  %v3989_v60 = vpop.f32.mrb[18].mxu0  ;;  %v4033_v3 = vrot.slane %v1064_v51, %v3935_v13 }
 0x10c   : > { %v3355_v61 = vpop.eup %3354  ;;  %v946_v1 = vmul.f32 %v3353_v42, %v3915_v48  ;;  %v3996_v44 = vpop.f32.mrb[19].mxu0 }
 0x10d   : > { %v945_v4 = vmul.f32 %v3355_v61, %v3918_v50  ;;  %v1168_v27 = vld [vmem:[#allocation2 + $0x21] sm:$0xff]  ;;  %v4197_v33 = vadd.f32 %v3896_v34, %v3996_v44 }
 0x10e   : > { %v1067_v5 = vld [vmem:[#allocation2 + $0x18] sm:$0xff]  ;;  %v1068_v7 = vld [vmem:[#allocation2 + $0x20] sm:$0xff]  ;;  %1035 = vst.msk [vmem:[#allocation2 + $0x51] sm:$0xff] %vm973_vm1, %v946_v1  ;;  %v1502_v42 = vmul.f32 %v4010_v30, %v1168_v27 }
 0x10f   : > { %v3357_v8 = vpop.eup %3356  ;;  %v1167_v9 = vld [vmem:[#allocation2 + $0x19] sm:$0xff]  ;;  %1034 = vst.msk [vmem:[#allocation2 + $0x49] sm:$0xff] %vm973_vm1, %v945_v4  ;;  %v4002_v14 = vpop.f32.mrb[20].mxu0  ;;  %v1401_v48 = vmul.f32 %v3993_v0, %v1067_v5  ;;  %v1402_v24 = vmul.f32 %v3993_v0, %v1068_v7  ;;  %v1103_v32 = vmul.f32 %v3961_v29, %v1067_v5  ;;  %v1104_v38 = vmul.f32 %v3961_v29, %v1068_v7  ;;  %v1268_v63 = vld [vmem:[#allocation2 + $0x22] sm:$0xff] }
 0x110   : > { %v4005_v19 = vpop.f32.mrb[21].mxu0  ;;  %v3359_v21 = vpop.eup %3358  ;;  %v948_v50 = vmul.f32 %v3357_v8, %v3923_v54  ;;  %v1203_v35 = vmul.f32 %v3958_v28, %v1167_v9  ;;  %v1204_v54 = vmul.f32 %v3958_v28, %v1168_v27  ;;  %v1267_v47 = vld [vmem:[#allocation2 + $0x1a] sm:$0xff]  ;;  %v1501_v58 = vmul.f32 %v4010_v30, %v1167_v9 }
 0x111   : > { %v3361_v26 = vpop.eup %3360  ;;  %v1433_v40 = vadd.f32 %v1401_v48, %v1333_v17  ;;  %v851_v41 = vadd.f32 1.0, %v3359_v21  ;;  %v1434_v49 = vadd.f32 %v1402_v24, %v1334_v23  ;;  %v1303_v1 = vmul.f32 %v3971_v45, %v1267_v47 }
 0x112   : > { %v3363_v37 = vpop.eup %3362  ;;  %1037 = vst.msk [vmem:[#allocation2 + $0x69] sm:$0xff] %vm973_vm1, %v948_v50  ;;  %v854_v55 = vadd.f32 1.0, %v3361_v26  ;;  %v1235_v57 = vadd.f32 %v1203_v35, %v1103_v32  ;;  %v4029_v61 = vld [vmem:[#allocation2 + $0x30] sm:$0xff]  ;;  %v1236_v4 = vadd.f32 %v1204_v54, %v1104_v38  ;;  %v4037_v5 = vadd.f32 %v3896_v34, %v3926_v6  ;;  %v4040_v9 = vld [vmem:[#allocation2 + $0x38] sm:$0xff] }
 0x113   : > { %v4015_v39 = vpop.f32.mrb[22].mxu0  ;;  %v3365_v36 = vpop.eup %3364  ;;  %v853_v59 = vadd.f32 1.0, %v3363_v37  ;;  %v1533_v2 = vadd.f32 %v1501_v58, %v1433_v40  ;;  %3366 = vrcp.f32 %v851_v41  ;;  %v1534_v53 = vadd.f32 %v1502_v42, %v1434_v49  ;;  %v1169_v50 = vld [vmem:[#allocation2 + $0x31] sm:$0xff]  ;;  %v1170_v38 = vld [vmem:[#allocation2 + $0x39] sm:$0xff] }
 0x114   : > { %v4017_v43 = vpop.f32.mrb[23].mxu0  ;;  %v856_v62 = vadd.f32 1.0, %v3365_v36  ;;  %3368 = vrcp.f32 %v854_v55  ;;  %v1335_v7 = vadd.f32 %v1303_v1, %v1235_v57  ;;  %v1601_v8 = vmul.f32 %v4025_v56, %v1267_v47  ;;  %v1269_v55 = vld [vmem:[#allocation2 + $0x32] sm:$0xff] }
 0x115   : > { %v1403_v17 = vmul.f32 %v3993_v0, %v4029_v61  ;;  %3370 = vrcp.f32 %v853_v59  ;;  %v1304_v48 = vmul.f32 %v3971_v45, %v1268_v63  ;;  %v1602_v21 = vmul.f32 %v4025_v56, %v1268_v63 }
 0x116   : > { %3372 = vrcp.f32 %v856_v62  ;;  %v4048_v23 = vadd.f32 %v3931_v11, %v3896_v34  ;;  %v1633_v6 = vadd.f32 %v1601_v8, %v1533_v2  ;;  %v4052_v24 = vadd.f32 %v3896_v34, %v3940_v16 }
 0x117   : > { %v1336_v26 = vadd.f32 %v1304_v48, %v1236_v4  ;;  %v1404_v27 = vmul.f32 %v3993_v0, %v4040_v9  ;;  %v1634_v32 = vadd.f32 %v1602_v21, %v1534_v53  ;;  %v4058_v35 = vadd.f32 %v3954_v25, %v3896_v34  ;;  %v4066_v40 = vpop.f32.mrb[24].mxu0  ;;  %v1270_v4 = vld [vmem:[#allocation2 + $0x3a] sm:$0xff] }
 0x118   : > { %v4061_v37 = vrot.slane %v1064_v51, %v3933_v12  ;;  %v1435_v11 = vadd.f32 %v1403_v17, %v1335_v7  ;;  %v1702_v36 = vmul.f32 %v4033_v3, %v4029_v61  ;;  %v3010_v16 = vmul.f32 -1.442695, %v4037_v5  ;;  %v4073_v49 = vpop.f32.mrb[25].mxu0 }
 0x119   : > { %v1703_v41 = vmul.f32 %v4033_v3, %v4040_v9  ;;  %v3013_v54 = vmul.f32 -1.442695, %v4048_v23  ;;  %v1503_v25 = vmul.f32 %v4010_v30, %v1169_v50  ;;  %v3012_v12 = vmul.f32 -1.442695, %v4052_v24 }
 0x11a   : > { %v1734_v47 = vadd.f32 %v1702_v36, %v1633_v6  ;;  %v1436_v57 = vadd.f32 %v1404_v27, %v1336_v26  ;;  %v3015_v59 = vmul.f32 -1.442695, %v4058_v35  ;;  %v4077_v62 = vrot.slane %v1064_v51, %v3951_v22  ;;  %v4083_v51 = vld [vmem:[#allocation2 + $0x48] sm:$0xff] }
 0x11b   : > { %v1735_v58 = vadd.f32 %v1703_v41, %v1634_v32  ;;  %v1535_v63 = vadd.f32 %v1503_v25, %v1435_v11  ;;  %v1802_v1 = vmul.f32 %v4061_v37, %v1169_v50  ;;  %3374 = vpow2.f32 %v3010_v16 }
 0x11c   : > { %v1504_v53 = vmul.f32 %v4010_v30, %v1170_v38  ;;  %v1803_v7 = vmul.f32 %v4061_v37, %v1170_v38  ;;  %3376 = vpow2.f32 %v3013_v54  ;;  %v1603_v17 = vmul.f32 %v4025_v56, %v1269_v55 }
 0x11d   : > { %v3367_v42 = vpop.eup %3366  ;;  %v1834_v48 = vadd.f32 %v1802_v1, %v1734_v47  ;;  %3378 = vpow2.f32 %v3012_v12  ;;  %v1604_v26 = vmul.f32 %v4025_v56, %v1270_v4  ;;  %v1902_v32 = vmul.f32 %v4077_v62, %v1269_v55  ;;  %v4093_v47 = vld [vmem:[#allocation2 + $0x50] sm:$0xff] }
 0x11e   : > { %v3369_v2 = vpop.eup %3368  ;;  %v1536_v6 = vadd.f32 %v1504_v53, %v1436_v57  ;;  %v1835_v22 = vadd.f32 %v1803_v7, %v1735_v58  ;;  %3380 = vpow2.f32 %v3015_v59  ;;  %v1635_v27 = vadd.f32 %v1603_v17, %v1535_v63  ;;  %v4100_v58 = vpop.f32.mrb[26].mxu0 }
 0x11f   : > { %v3371_v8 = vpop.eup %3370  ;;  %v947_v11 = vmul.f32 %v3367_v42, %v3929_v10  ;;  %v1903_v36 = vmul.f32 %v4077_v62, %v1270_v4  ;;  %v1105_v16 = vmul.f32 %v3961_v29, %v4029_v61  ;;  %v1205_v41 = vmul.f32 %v3958_v28, %v1169_v50  ;;  %v4105_v61 = vld [vmem:[%s5275_s4] ss:$0 sm:$0xff]  ;;  %v4108_v42 = vpop.f32.mrb[27].mxu0 }
 0x120   : > { %v3373_v21 = vpop.eup %3372  ;;  %v950_v54 = vmul.f32 %v3369_v2, %v3938_v15  ;;  %v1934_v25 = vadd.f32 %v1902_v32, %v1834_v48  ;;  %v1704_v12 = vmul.f32 %v4033_v3, %v4083_v51  ;;  %v949_v57 = vmul.f32 %v3371_v8, %v3946_v18  ;;  %v1171_v15 = vld [vmem:[#allocation2 + $0x49] sm:$0xff]  ;;  %5311 = vst [vmem:[#allocation4_spill] sm:$0xff] %v4108_v42  ;;  %v1172_v8 = vld [vmem:[#allocation2 + $0x51] sm:$0xff] }
 0x121   : > { %1036 = vst.msk [vmem:[#allocation2 + $0x61] sm:$0xff] %vm973_vm1, %v947_v11  ;;  %v952_v10 = vmul.f32 %v3373_v21, %v3949_v20  ;;  %v1935_v59 = vadd.f32 %v1903_v36, %v1835_v22  ;;  %v1636_v50 = vadd.f32 %v1604_v26, %v1536_v6  ;;  %v1206_v18 = vmul.f32 %v3958_v28, %v1170_v38  ;;  %v1271_v38 = vld [vmem:[#allocation2 + $0x4a] sm:$0xff]  ;;  %v4125_v36 = vld [vmem:[#allocation2 + $0x52] sm:$0xff] }
 0x122   : > { %1039 = vst.msk [vmem:[#allocation2 + $0x81] sm:$0xff] %vm973_vm1, %v950_v54  ;;  %v1736_v63 = vadd.f32 %v1704_v12, %v1635_v27  ;;  %1038 = vst.msk [vmem:[#allocation2 + $0x79] sm:$0xff] %vm973_vm1, %v949_v57  ;;  %v1106_v20 = vmul.f32 %v3961_v29, %v4040_v9  ;;  %v1237_v1 = vadd.f32 %v1205_v41, %v1105_v16 }
 0x123   : > { %1041 = vst.msk [vmem:[#allocation2 + $0x99] sm:$0xff] %vm973_vm1, %v952_v10  ;;  %v1705_v2 = vmul.f32 %v4033_v3, %v4093_v47  ;;  %v4118_v7 = vadd.f32 %v4105_v61, %v1934_v25  ;;  %v1804_v17 = vmul.f32 %v4061_v37, %v1171_v15  ;;  %v1305_v21 = vmul.f32 %v3971_v45, %v1269_v55 }
 0x124   : > { %v4123_v6 = vadd.f32 %v4105_v61, %v1935_v59  ;;  %v1238_v32 = vadd.f32 %v1206_v18, %v1106_v20  ;;  %v1805_v16 = vmul.f32 %v4061_v37, %v1172_v8  ;;  %v1405_v41 = vmul.f32 %v3993_v0, %v4083_v51 }
 0x125   : > { %v3375_v53 = vpop.eup %3374  ;;  %v1737_v22 = vadd.f32 %v1705_v2, %v1636_v50  ;;  %v1836_v26 = vadd.f32 %v1804_v17, %v1736_v63  ;;  %v1337_v11 = vadd.f32 %v1305_v21, %v1237_v1  ;;  %v3033_v54 = vmul.f32 -1.442695, %v4118_v7 }
 0x126   : > { %v3377_v48 = vpop.eup %3376  ;;  %v1904_v55 = vmul.f32 %v4077_v62, %v1271_v38  ;;  %v1306_v25 = vmul.f32 %v3971_v45, %v1270_v4  ;;  %v3034_v12 = vmul.f32 -1.442695, %v4123_v6  ;;  %v1905_v10 = vmul.f32 %v4077_v62, %v4125_v36 }
 0x127   : > { %v3379_v9 = vpop.eup %3378  ;;  %v1837_v57 = vadd.f32 %v1805_v16, %v1737_v22  ;;  %v855_v50 = vadd.f32 1.0, %v3375_v53  ;;  %v1406_v18 = vmul.f32 %v3993_v0, %v4093_v47  ;;  %v1437_v20 = vadd.f32 %v1405_v41, %v1337_v11 }
 0x128   : > { %v3381_v27 = vpop.eup %3380  ;;  %v1936_v59 = vadd.f32 %v1904_v55, %v1836_v26  ;;  %v1338_v63 = vadd.f32 %v1306_v25, %v1238_v32  ;;  %v858_v1 = vadd.f32 1.0, %v3377_v48  ;;  %3382 = vpow2.f32 %v3033_v54  ;;  %v4156_v41 = vld [vmem:[#allocation2 + $0x60] sm:$0xff]  ;;  %v4158_v54 = vpop.f32.mrb[28].mxu0 }
 0x129   : > { %v857_v2 = vadd.f32 1.0, %v3379_v9  ;;  %v4140_v17 = vadd.f32 %v3896_v34, %v3964_v31  ;;  %3384 = vpow2.f32 %v3034_v12  ;;  %v1505_v4 = vmul.f32 %v4010_v30, %v1171_v15  ;;  %5312 = vst [vmem:[#allocation5_spill] sm:$0xff] %v4158_v54  ;;  %v4160_v12 = vpop.f32.mrb[29].mxu0 }
 0x12a   : > { %v1937_v21 = vadd.f32 %v1905_v10, %v1837_v57  ;;  %v860_v22 = vadd.f32 1.0, %v3381_v27  ;;  %v1107_v53 = vmul.f32 %v3961_v29, %v4083_v51  ;;  %v1207_v26 = vmul.f32 %v3958_v28, %v1171_v15  ;;  %5313 = vst [vmem:[#allocation6_spill] sm:$0xff] %v4160_v12 }
 0x12b   : > { %v4147_v32 = vadd.f32 %v4105_v61, %v1936_v59  ;;  %3386 = vrcp.f32 %v855_v50  ;;  %v1438_v48 = vadd.f32 %v1406_v18, %v1338_v63  ;;  %v1537_v9 = vadd.f32 %v1505_v4, %v1437_v20  ;;  %v1173_v4 = vld [vmem:[#allocation2 + $0x61] sm:$0xff] }
 0x12c   : > { %3388 = vrcp.f32 %v858_v1  ;;  %v3014_v31 = vmul.f32 -1.442695, %v4140_v17  ;;  %v1506_v11 = vmul.f32 %v4010_v30, %v1172_v8  ;;  %v1605_v16 = vmul.f32 %v4025_v56, %v1271_v38 }
 0x12d   : > { %3390 = vrcp.f32 %v857_v2  ;;  %v4153_v27 = vadd.f32 %v4105_v61, %v1937_v21  ;;  %v1239_v51 = vadd.f32 %v1207_v26, %v1107_v53  ;;  %v3035_v15 = vmul.f32 -1.442695, %v4147_v32  ;;  %v1074_v2 = vld [vmem:[#allocation2 + $0x68] sm:$0xff] }
 0x12e   : > { %3392 = vrcp.f32 %v860_v22  ;;  %v1538_v55 = vadd.f32 %v1506_v11, %v1438_v48  ;;  %v1637_v25 = vadd.f32 %v1605_v16, %v1537_v9  ;;  %v1307_v57 = vmul.f32 %v3971_v45, %v1271_v38  ;;  %v1174_v16 = vld [vmem:[#allocation2 + $0x69] sm:$0xff] }
 0x12f   : > { %3394 = vpow2.f32 %v3014_v31  ;;  %v4165_v10 = vadd.f32 %v3974_v46, %v3896_v34  ;;  %v4169_v59 = vadd.f32 %v3896_v34, %v3979_v52  ;;  %v1208_v50 = vmul.f32 %v3958_v28, %v1172_v8 }
 0x130   : > { %v1606_v63 = vmul.f32 %v4025_v56, %v4125_v36  ;;  %v3036_v18 = vmul.f32 -1.442695, %v4153_v27  ;;  %v1706_v20 = vmul.f32 %v4033_v3, %v4156_v41  ;;  %v1108_v1 = vmul.f32 %v3961_v29, %v4093_v47 }
 0x131   : > { %v1339_v46 = vadd.f32 %v1307_v57, %v1239_v51  ;;  %3396 = vpow2.f32 %v3035_v15  ;;  %v1407_v52 = vmul.f32 %v3993_v0, %v4156_v41  ;;  %v1707_v48 = vmul.f32 %v4033_v3, %v1074_v2  ;;  %v4186_v51 = vld [vmem:[#allocation2 + $0x62] sm:$0xff] }
 0x132   : > { %v3383_v38 = vpop.eup %3382  ;;  %v1638_v21 = vadd.f32 %v1606_v63, %v1538_v55  ;;  %v1738_v22 = vadd.f32 %v1706_v20, %v1637_v25  ;;  %3398 = vpow2.f32 %v3036_v18  ;;  %v1806_v9 = vmul.f32 %v4061_v37, %v1173_v4 }
 0x133   : > { %v3385_v8 = vpop.eup %3384  ;;  %v4184_v31 = vmul.f32 -1.442695, %v4165_v10  ;;  %v1240_v11 = vadd.f32 %v1208_v50, %v1108_v1  ;;  %v1439_v15 = vadd.f32 %v1407_v52, %v1339_v46  ;;  %v4189_v57 = vmul.f32 -1.442695, %v4169_v59 }
 0x134   : > { %v4193_v55 = vadd.f32 %v3989_v60, %v3896_v34  ;;  %v2101_v63 = vadd.f32 1.0, %v3383_v38  ;;  %v1739_v18 = vadd.f32 %v1707_v48, %v1638_v21  ;;  %v1838_v20 = vadd.f32 %v1806_v9, %v1738_v22 }
 0x135   : > { %v3387_v53 = vpop.eup %3386  ;;  %v2102_v50 = vadd.f32 1.0, %v3385_v8  ;;  %v1308_v1 = vmul.f32 %v3971_v45, %v4125_v36  ;;  %v1507_v46 = vmul.f32 %v4010_v30, %v1173_v4  ;;  %v1807_v13 = vmul.f32 %v4061_v37, %v1174_v16  ;;  %v1274_v8 = vld [vmem:[#allocation2 + $0x6a] sm:$0xff] }
 0x136   : > { %v3389_v26 = vpop.eup %3388  ;;  %v951_v52 = vmul.f32 %v3387_v53, %v4037_v5  ;;  %v1906_v60 = vmul.f32 %v4077_v62, %v4186_v51  ;;  %v1210_v44 = vmul.f32 %v3958_v28, %v1174_v16  ;;  %3400 = vrcp.f32 %v2101_v63  ;;  %v4227_v63 = vpop.f32.mrb[30].mxu0 }
 0x137   : > { %v3391_v47 = vpop.eup %3390  ;;  %v954_v38 = vmul.f32 %v3389_v26, %v4048_v23  ;;  %v1340_v48 = vadd.f32 %v1308_v1, %v1240_v11  ;;  %v1539_v9 = vadd.f32 %v1507_v46, %v1439_v15  ;;  %v1408_v5 = vmul.f32 %v3993_v0, %v1074_v2  ;;  %v1075_v15 = vld [vmem:[#allocation2 + $0x78] sm:$0xff]  ;;  %5314 = vst [vmem:[#allocation7_spill] sm:$0xff] %v4227_v63 }
 0x138   : > { %v3393_v25 = vpop.eup %3392  ;;  %v953_v21 = vmul.f32 %v3391_v47, %v4052_v24  ;;  %1040 = vst.msk [vmem:[#allocation2 + $0x91] sm:$0xff] %vm973_vm1, %v951_v52  ;;  %v1839_v53 = vadd.f32 %v1807_v13, %v1739_v18  ;;  %v1938_v12 = vadd.f32 %v1906_v60, %v1838_v20  ;;  %3402 = vrcp.f32 %v2102_v50  ;;  %v4231_v50 = vpop.f32.mrb[31].mxu0 }
 0x139   : > { %v3395_v22 = vpop.eup %3394  ;;  %v956_v36 = vmul.f32 %v3393_v25, %v4058_v35  ;;  %1043 = vst.msk [vmem:[#allocation2 + $0xb1] sm:$0xff] %vm973_vm1, %v954_v38  ;;  %v1109_v24 = vmul.f32 %v3961_v29, %v4156_v41  ;;  %v1209_v26 = vmul.f32 %v3958_v28, %v1173_v4  ;;  %v1607_v47 = vmul.f32 %v4025_v56, %v4186_v51 }
 0x13a   : > { %1042 = vst.msk [vmem:[#allocation2 + $0xa9] sm:$0xff] %vm973_vm1, %v953_v21  ;;  %v1310_v35 = vmul.f32 %v3971_v45, %v1274_v8  ;;  %v1508_v13 = vmul.f32 %v4010_v30, %v1174_v16  ;;  %v1907_v11 = vmul.f32 %v4077_v62, %v1274_v8  ;;  %v4225_v25 = vadd.f32 %v4002_v14, %v3896_v34 }
 0x13b   : > { %v3397_v23 = vpop.eup %3396  ;;  %1045 = vst.msk [vmem:[#allocation2 + $0xc9] sm:$0xff] %vm973_vm1, %v956_v36  ;;  %v1608_v41 = vmul.f32 %v4025_v56, %v1274_v8  ;;  %v1110_v4 = vmul.f32 %v3961_v29, %v1074_v2  ;;  %v1639_v18 = vadd.f32 %v1607_v47, %v1539_v9  ;;  %v859_v20 = vadd.f32 1.0, %v3395_v22  ;;  %5315 = vst [vmem:[#allocation8_spill] sm:$0xff] %v4231_v50  ;;  %v1175_v22 = vld [vmem:[#allocation2 + $0x79] sm:$0xff] }
 0x13c   : > { %v3399_v1 = vpop.eup %3398  ;;  %v2103_v46 = vadd.f32 1.0, %v3397_v23  ;;  %v1440_v16 = vadd.f32 %v1408_v5, %v1340_v48  ;;  %v1939_v52 = vadd.f32 %v1907_v11, %v1839_v53  ;;  %v4234_v60 = vadd.f32 %v4105_v61, %v1938_v12 }
 0x13d   : > { %v1241_v38 = vadd.f32 %v1209_v26, %v1109_v24  ;;  %v1708_v14 = vmul.f32 %v4033_v3, %v1075_v15  ;;  %v4238_v21 = vmul.f32 -1.442695, %v4193_v55  ;;  %v4242_v2 = vadd.f32 %v3896_v34, %v4005_v19 }
 0x13e   : > { %v4245_v8 = vmul.f32 -1.442695, %v4197_v33  ;;  %v4248_v48 = vmul.f32 -1.442695, %v4225_v25  ;;  %v4252_v12 = vadd.f32 %v4015_v39, %v3896_v34  ;;  %v4256_v9 = vadd.f32 %v3896_v34, %v4017_v43  ;;  %v1076_v39 = vld [vmem:[#allocation2 + $0x80] sm:$0xff] }
 0x13f   : > { %v2104_v36 = vadd.f32 1.0, %v3399_v1  ;;  %v1242_v5 = vadd.f32 %v1210_v44, %v1110_v4  ;;  %v1309_v19 = vmul.f32 %v3971_v45, %v4186_v51  ;;  %v1740_v53 = vadd.f32 %v1708_v14, %v1639_v18  ;;  %v1176_v4 = vld [vmem:[#allocation2 + $0x81] sm:$0xff] }
 0x140   : > { %5316 = vst [vmem:[#allocation9_spill] sm:$0xff] %v4252_v12  ;;  %5317 = vst [vmem:[#allocation10_spill] sm:$0xff] %v4256_v9  ;;  %3404 = vrcp.f32 %v2103_v46  ;;  %v1540_v23 = vadd.f32 %v1508_v13, %v1440_v16  ;;  %v4261_v24 = vadd.f32 %v4105_v61, %v1939_v52  ;;  %v3037_v26 = vmul.f32 -1.442695, %v4234_v60  ;;  %v3401_v44 = vpop.eup %3400  ;;  %v1275_v18 = vld [vmem:[#allocation2 + $0x7a] sm:$0xff] }
 0x141   : > { %v1341_v47 = vadd.f32 %v1309_v19, %v1241_v38  ;;  %v1409_v11 = vmul.f32 %v3993_v0, %v1075_v15  ;;  %v1808_v43 = vmul.f32 %v4061_v37, %v1175_v22  ;;  %v4267_v1 = vmul.f32 -1.442695, %v4242_v2 }
 0x142   : > { %v1111_v51 = vmul.f32 %v3961_v29, %v1075_v15  ;;  %v4271_v13 = vmul.f32 -1.442695, %v4252_v12  ;;  %v4274_v46 = vmul.f32 -1.442695, %v4256_v9  ;;  %v4278_v16 = vadd.f32 %v4066_v40, %v3896_v34  ;;  %v3403_v52 = vpop.eup %3402 }
 0x143   : > { %3406 = vrcp.f32 %v2104_v36  ;;  %v1211_v38 = vmul.f32 %v3958_v28, %v1175_v22  ;;  %v1342_v14 = vadd.f32 %v1310_v35, %v1242_v5  ;;  %v1840_v19 = vadd.f32 %v1808_v43, %v1740_v53  ;;  %v1276_v35 = vld [vmem:[#allocation2 + $0x82] sm:$0xff] }
 0x144   : > { %5318 = vst [vmem:[#allocation11_spill] sm:$0xff] %v4274_v46  ;;  %3408 = vpow2.f32 %v3037_v26  ;;  %v3038_v15 = vmul.f32 -1.442695, %v4261_v24  ;;  %v1410_v50 = vmul.f32 %v3993_v0, %v1076_v39  ;;  %v1640_v63 = vadd.f32 %v1608_v41, %v1540_v23 }
 0x145   : > { %v1212_v54 = vmul.f32 %v3958_v28, %v1176_v4  ;;  %v1441_v9 = vadd.f32 %v1409_v11, %v1341_v47  ;;  %v1908_v12 = vmul.f32 %v4077_v62, %v1275_v18  ;;  %3410 = vrcp.f32 %v859_v20 }
 0x146   : > { %v4286_v40 = vmul.f32 %v3401_v44, %v4118_v7  ;;  %v4289_v36 = vmul.f32 %v3403_v52, %v4123_v6  ;;  %v1709_v5 = vmul.f32 %v4033_v3, %v1076_v39  ;;  %3412 = vpow2.f32 %v4184_v31 }
 0x147   : > { %v1112_v53 = vmul.f32 %v3961_v29, %v1076_v39  ;;  %v1509_v41 = vmul.f32 %v4010_v30, %v1175_v22  ;;  %v1940_v23 = vadd.f32 %v1908_v12, %v1840_v19  ;;  %3414 = vpow2.f32 %v4189_v57 }
 0x148   : > { %5319 = vst [vmem:[#allocation12_spill] sm:$0xff] %v4286_v40  ;;  %5320 = vst [vmem:[#allocation13_spill] sm:$0xff] %v4289_v36  ;;  %3416 = vpow2.f32 %v3038_v15  ;;  %v1243_v20 = vadd.f32 %v1211_v38, %v1111_v51  ;;  %v1442_v26 = vadd.f32 %v1410_v50, %v1342_v14  ;;  %v1741_v7 = vadd.f32 %v1709_v5, %v1640_v63  ;;  %v1178_v50 = vld [vmem:[#allocation2 + $0x99] sm:$0xff]  ;;  %v1077_v51 = vld [vmem:[#allocation2 + $0x90] sm:$0xff] }
 0x149   : > { %v1312_v47 = vmul.f32 %v3971_v45, %v1276_v35  ;;  %v1510_v6 = vmul.f32 %v4010_v30, %v1176_v4  ;;  %v1541_v11 = vadd.f32 %v1509_v41, %v1441_v9  ;;  %v4300_v43 = vadd.f32 %v3896_v34, %v4073_v49  ;;  %v1278_v49 = vld [vmem:[#allocation2 + $0x9a] sm:$0xff] }
 0x14a   : > { %v3405_v31 = vpop.eup %3404  ;;  %v2229_v22 = vsel %vm973_vm1, %v4286_v40, 0.0  ;;  %v2230_v57 = vsel %vm973_vm1, %v4289_v36, 0.0  ;;  %v1809_v12 = vmul.f32 %v4061_v37, %v1176_v4  ;;  %v1311_v63 = vmul.f32 %v3971_v45, %v1275_v18 }
 0x14b   : > { %5321 = vst [vmem:[#allocation14_spill] sm:$0xff] %v4300_v43  ;;  %v1610_v39 = vmul.f32 %v4025_v56, %v1276_v35  ;;  %v1244_v44 = vadd.f32 %v1212_v54, %v1112_v53  ;;  %v1609_v9 = vmul.f32 %v4025_v56, %v1275_v18  ;;  %v4311_v34 = vadd.f32 %v4105_v61, %v1940_v23  ;;  %v2302_v43 = vld [vmem:[%s5276_s5 + $0x10] sm:$0xff] }
 0x14c   : > { %v1909_v52 = vmul.f32 %v4077_v62, %v1276_v35  ;;  %v1343_v38 = vadd.f32 %v1311_v63, %v1243_v20  ;;  %v1542_v14 = vadd.f32 %v1510_v6, %v1442_v26  ;;  %v1841_v19 = vadd.f32 %v1809_v12, %v1741_v7 }
 0x14d   : > { %v3407_v15 = vpop.eup %3406  ;;  %v2231_v4 = vadd.f32 %v2230_v57, %v2229_v22  ;;  %v4315_v5 = vmul.f32 %v3405_v31, %v4147_v32  ;;  %v1641_v41 = vadd.f32 %v1609_v9, %v1541_v11  ;;  %v4318_v54 = vmul.f32 %v3958_v28, %v1178_v50  ;;  %v1078_v11 = vld [vmem:[#allocation2 + $0x98] sm:$0xff] }
 0x14e   : > { %v3409_v18 = vpop.eup %3408  ;;  %v4321_v53 = vmul.f32 %v3971_v45, %v1278_v49  ;;  %v4324_v23 = vmul.f32 %v4010_v30, %v1178_v50  ;;  %v4327_v35 = vmul.f32 %v4025_v56, %v1278_v49  ;;  %v1411_v20 = vmul.f32 %v3993_v0, %v1077_v51  ;;  %v1177_v31 = vld [vmem:[#allocation2 + $0x91] sm:$0xff] }
 0x14f   : > { %5322 = vst [vmem:[#allocation15_spill] sm:$0xff] %v4315_v5  ;;  %v3411_v26 = vpop.eup %3410  ;;  %v3039_v32 = vmul.f32 -1.442695, %v4311_v34  ;;  %v1811_v7 = vmul.f32 %v4061_v37, %v1178_v50  ;;  %v4333_v6 = vmul.f32 %v4077_v62, %v1278_v49  ;;  %v1344_v22 = vadd.f32 %v1312_v47, %v1244_v44 }
 0x150   : > { %v3413_v57 = vpop.eup %3412  ;;  %v4336_v12 = vmul.f32 %v3407_v15, %v4153_v27  ;;  %v1941_v63 = vadd.f32 %v1909_v52, %v1841_v19  ;;  %v1642_v9 = vadd.f32 %v1610_v39, %v1542_v14  ;;  %3418 = vpow2.f32 %v4238_v21 }
 0x151   : > { %v3415_v36 = vpop.eup %3414  ;;  %v2232_v40 = vsel %vm973_vm1, %v4315_v5, 0.0  ;;  %v1113_v50 = vmul.f32 %v3961_v29, %v1077_v51  ;;  %v1710_v49 = vmul.f32 %v4033_v3, %v1077_v51  ;;  %3420 = vpow2.f32 %v4245_v8 }
 0x152   : > { %5323 = vst [vmem:[#allocation16_spill] sm:$0xff] %v4336_v12  ;;  %v3417_v42 = vpop.eup %3416  ;;  %v1213_v47 = vmul.f32 %v3958_v28, %v1177_v31  ;;  %v1443_v44 = vadd.f32 %v1411_v20, %v1343_v38  ;;  %v1711_v27 = vmul.f32 %v4033_v3, %v1078_v11  ;;  %v955_v39 = vmul.f32 %v3411_v26, %v4140_v17  ;;  %v1277_v38 = vld [vmem:[#allocation2 + $0x92] sm:$0xff] }
 0x153   : > { %v2105_v52 = vadd.f32 1.0, %v3409_v18  ;;  %3422 = vpow2.f32 %v3039_v32  ;;  %v1412_v21 = vmul.f32 %v3993_v0, %v1078_v11  ;;  %v1742_v14 = vadd.f32 %v1710_v49, %v1641_v41  ;;  %v1079_v49 = vld [vmem:[#allocation2 + $0xa8] sm:$0xff] }
 0x154   : > { %v1511_v19 = vmul.f32 %v4010_v30, %v1177_v31  ;;  %v1743_v15 = vadd.f32 %v1711_v27, %v1642_v9  ;;  %1044 = vst.msk [vmem:[#allocation2 + $0xc1] sm:$0xff] %vm973_vm1, %v955_v39  ;;  %v862_v51 = vadd.f32 1.0, %v3413_v57  ;;  %v861_v8 = vadd.f32 1.0, %v3415_v36  ;;  %v1180_v57 = vld [vmem:[#allocation2 + $0xb1] sm:$0xff]  ;;  %v1179_v27 = vld [vmem:[#allocation2 + $0xa9] sm:$0xff] }
 0x155   : > { %v2106_v5 = vadd.f32 1.0, %v3417_v42  ;;  %v4351_v46 = vadd.f32 %v4105_v61, %v1941_v63  ;;  %v1810_v20 = vmul.f32 %v4061_v37, %v1177_v31  ;;  %3424 = vpow2.f32 %v4248_v48 }
 0x156   : > { %v1114_v17 = vmul.f32 %v3961_v29, %v1078_v11  ;;  %v1245_v18 = vadd.f32 %v1213_v47, %v1113_v50  ;;  %v1543_v41 = vadd.f32 %v1511_v19, %v1443_v44  ;;  %3426 = vrcp.f32 %v862_v51  ;;  %v1279_v19 = vld [vmem:[#allocation2 + $0xaa] sm:$0xff] }
 0x157   : > { %v2233_v26 = vadd.f32 %v2232_v40, %v2231_v4  ;;  %3428 = vrcp.f32 %v2105_v52  ;;  %v1444_v32 = vadd.f32 %v1412_v21, %v1344_v22  ;;  %v1842_v9 = vadd.f32 %v1810_v20, %v1742_v14  ;;  %v1080_v4 = vld [vmem:[#allocation2 + $0xb0] sm:$0xff] }
 0x158   : > { %v1313_v42 = vmul.f32 %v3971_v45, %v1277_v38  ;;  %v1611_v36 = vmul.f32 %v4025_v56, %v1277_v38  ;;  %v1843_v63 = vadd.f32 %v1811_v7, %v1743_v15  ;;  %3430 = vrcp.f32 %v861_v8  ;;  %v4364_v7 = vld [vmem:[#allocation2 + $0xb2] sm:$0xff] }
 0x159   : > { %3432 = vrcp.f32 %v2106_v5  ;;  %v2234_v48 = vsel %vm973_vm1, %v4336_v12, 0.0  ;;  %v3040_v11 = vmul.f32 -1.442695, %v4351_v46  ;;  %v1910_v40 = vmul.f32 %v4077_v62, %v1277_v38 }
 0x15a   : > { %v3419_v31 = vpop.eup %3418  ;;  %v1246_v22 = vadd.f32 %v4318_v54, %v1114_v17  ;;  %v1345_v50 = vadd.f32 %v1313_v42, %v1245_v18  ;;  %v1643_v47 = vadd.f32 %v1611_v36, %v1543_v41  ;;  %v1216_v44 = vmul.f32 %v3958_v28, %v1180_v57 }
 0x15b   : > { %v3421_v39 = vpop.eup %3420  ;;  %v1544_v5 = vadd.f32 %v4324_v23, %v1444_v32  ;;  %v1942_v52 = vadd.f32 %v1910_v40, %v1842_v9  ;;  %v1115_v21 = vmul.f32 %v3961_v29, %v1079_v49  ;;  %v1215_v14 = vmul.f32 %v3958_v28, %v1179_v27 }
 0x15c   : > { %v1943_v15 = vadd.f32 %v4333_v6, %v1843_v63  ;;  %v1116_v51 = vmul.f32 %v3961_v29, %v1080_v4  ;;  %v1413_v54 = vmul.f32 %v3993_v0, %v1079_v49  ;;  %v1712_v8 = vmul.f32 %v4033_v3, %v1079_v49 }
 0x15d   : > { %v3423_v38 = vpop.eup %3422  ;;  %v4373_v20 = vadd.f32 %v2234_v48, %v2233_v26  ;;  %3434 = vpow2.f32 %v3040_v11  ;;  %v1316_v23 = vmul.f32 %v3971_v45, %v4364_v7  ;;  %v4378_v17 = vmul.f32 %v4010_v30, %v1180_v57 }
 0x15e   : > { %v4382_v18 = vmul.f32 %v4025_v56, %v4364_v7  ;;  %v1813_v6 = vmul.f32 %v4061_v37, %v1180_v57  ;;  %v1315_v41 = vmul.f32 %v3971_v45, %v1279_v19  ;;  %v1744_v32 = vadd.f32 %v1712_v8, %v1643_v47 }
 0x15f   : > { %v3425_v9 = vpop.eup %3424  ;;  %v4387_v26 = vadd.f32 %v4105_v61, %v1942_v52  ;;  %v1247_v42 = vadd.f32 %v1215_v14, %v1115_v21  ;;  %v1346_v36 = vadd.f32 %v4321_v53, %v1246_v22  ;;  %v1644_v63 = vadd.f32 %v4327_v35, %v1544_v5  ;;  %v1081_v21 = vld [vmem:[#allocation2 + $0xc0] sm:$0xff]  ;;  %v2301_v35 = vld [vmem:[%s5276_s5 + $0x8] sm:$0xff] }
 0x160   : > { %v3427_v49 = vpop.eup %3426  ;;  %v4392_v48 = vadd.f32 %v4105_v61, %v1943_v15  ;;  %v1248_v11 = vadd.f32 %v1216_v44, %v1116_v51  ;;  %v1445_v40 = vadd.f32 %v1413_v54, %v1345_v50  ;;  %v1812_v57 = vmul.f32 %v4061_v37, %v1179_v27  ;;  %v2300_v53 = vld [vmem:[%s5276_s5] sm:$0xff] }
 0x161   : > { %v3429_v12 = vpop.eup %3428  ;;  %v1414_v47 = vmul.f32 %v3993_v0, %v1080_v4  ;;  %v1513_v8 = vmul.f32 %v4010_v30, %v1179_v27  ;;  %v1713_v52 = vmul.f32 %v4033_v3, %v1080_v4  ;;  %v864_v14 = vadd.f32 1.0, %v3419_v31 }
 0x162   : > { %v3431_v22 = vpop.eup %3430  ;;  %v1844_v50 = vadd.f32 %v1812_v57, %v1744_v32  ;;  %v958_v44 = vmul.f32 %v3427_v49, %v4165_v10  ;;  %v863_v5 = vadd.f32 1.0, %v3421_v39  ;;  %v1347_v27 = vadd.f32 %v1315_v41, %v1247_v42  ;;  %v2303_v32 = vld [vmem:[%s5276_s5 + $0x18] sm:$0xff] }
 0x163   : > { %v4405_v15 = vpop.eup %3432  ;;  %v1745_v51 = vadd.f32 %v1713_v52, %v1644_v63  ;;  %v957_v4 = vmul.f32 %v3431_v22, %v4169_v59  ;;  %v866_v31 = vadd.f32 1.0, %v3425_v9  ;;  %v3637_v54 = vmov 0.0|0.0   ;;  %v1082_v63 = vld [vmem:[#allocation2 + $0xc8] sm:$0xff] }
 0x164   : > { %3305 = vmatprep.subr.bf16.mxu0 %v3637_v54  ;;  %v1545_v57 = vadd.f32 %v1513_v8, %v1445_v40  ;;  %v1912_v10 = vmul.f32 %v4077_v62, %v1279_v19  ;;  %v1415_v39 = vmul.f32 %v3993_v0, %v1081_v21  ;;  %1047 = vst.msk [vmem:[#allocation2 + $0xe1] sm:$0xff] %vm973_vm1, %v958_v44  ;;  %v3041_v59 = vmul.f32 -1.442695, %v4387_v26 }
 0x165   : > { %v3306_v41 = vpack.c.bf16 %v2301_v35, %v2300_v53  ;;  %v1446_v9 = vadd.f32 %v1414_v47, %v1346_v36  ;;  %v1613_v42 = vmul.f32 %v4025_v56, %v1279_v19  ;;  %1046 = vst.msk [vmem:[#allocation2 + $0xd9] sm:$0xff] %vm973_vm1, %v957_v4  ;;  %3436 = vrcp.f32 %v864_v14  ;;  %v1181_v53 = vld [vmem:[#allocation2 + $0xc1] sm:$0xff] }
 0x166   : > { %v1944_v49 = vadd.f32 %v1912_v10, %v1844_v50  ;;  %3438 = vrcp.f32 %v863_v5  ;;  %v3309_v40 = vpack.c.bf16 %v2303_v32, %v2302_v43  ;;  %v2107_v52 = vadd.f32 1.0, %v3423_v38  ;;  %v1182_v50 = vld [vmem:[#allocation2 + $0xc9] sm:$0xff] }
 0x167   : > { %3307 = vmatpush3.bf16.msra.mxu0 %v3306_v41  ;;  %v3435_v8 = vpop.eup %3434  ;;  %v1913_v22 = vmul.f32 %v4077_v62, %v4364_v7  ;;  %v1845_v44 = vadd.f32 %v1813_v6, %v1745_v51  ;;  %3440 = vrcp.f32 %v866_v31  ;;  %v5324_v36 = vmov 0.0   ;;  %v1282_v51 = vld [vmem:[#allocation2 + $0xca] sm:$0xff] }
 0x168   : > { %3308 = vmatprep.subr.bf16.mxu0 %v3637_v54  ;;  %3241 = vmatprep.mubr.msk.f32.mxu0 %vm3638_vm3, %v5324_v36  ;;  %v1645_v19 = vadd.f32 %v1613_v42, %v1545_v57  ;;  %v1348_v47 = vadd.f32 %v1316_v23, %v1248_v11  ;;  %v1416_v14 = vmul.f32 %v3993_v0, %v1082_v63  ;;  %v3042_v38 = vmul.f32 -1.442695, %v4392_v48 }
 0x169   : > { %v1447_v35 = vadd.f32 %v1415_v39, %v1347_v27  ;;  %3246 = vmatprep.mubr.msk.f32.mxu1 %vm3638_vm3, %v5324_v36  ;;  %v4426_v43 = vmul.f32 %v3429_v12, %v4234_v60  ;;  %v1546_v7 = vadd.f32 %v4378_v17, %v1446_v9  ;;  %3442 = vpow2.f32 %v4267_v1  ;;  %v1281_v27 = vld [vmem:[#allocation2 + $0xc2] sm:$0xff] }
 0x16a   : > { %3444 = vpow2.f32 %v3041_v59  ;;  %v4432_v6 = vadd.f32 %v4105_v61, %v1944_v49  ;;  %v1515_v23 = vmul.f32 %v4010_v30, %v1181_v53  ;;  %v1714_v11 = vmul.f32 %v4033_v3, %v1081_v21 }
 0x16b   : > { %5325 = vst [vmem:[#allocation17_spill] sm:$0xff] %v4426_v43  ;;  %3310 = vmatpush3.bf16.msra.mxu0 %v3309_v40  ;;  %3446 = vrcp.f32 %v2107_v52  ;;  %v1945_v5 = vadd.f32 %v1913_v22, %v1845_v44  ;;  %v1117_v60 = vmul.f32 %v3961_v29, %v1081_v21  ;;  %v1217_v12 = vmul.f32 %v3958_v28, %v1181_v53 }
 0x16c   : > { %v2108_v17 = vadd.f32 1.0, %v3435_v8  ;;  %v1448_v1 = vadd.f32 %v1416_v14, %v1348_v47  ;;  %v1547_v4 = vadd.f32 %v1515_v23, %v1447_v35  ;;  %v1746_v31 = vadd.f32 %v1714_v11, %v1645_v19  ;;  %v4450_v8 = vld [vmem:[#allocation2 + $0xd8] sm:$0xff] }
 0x16d   : > { %3448 = vpow2.f32 %v3042_v38  ;;  %v1218_v54 = vmul.f32 %v3958_v28, %v1182_v50  ;;  %v1118_v32 = vmul.f32 %v3961_v29, %v1082_v63  ;;  %v1646_v57 = vadd.f32 %v4382_v18, %v1546_v7 }
 0x16e   : > { %v3043_v10 = vmul.f32 -1.442695, %v4432_v6  ;;  %v1516_v39 = vmul.f32 %v4010_v30, %v1182_v50  ;;  %v1615_v21 = vmul.f32 %v4025_v56, %v1281_v27  ;;  %v1814_v41 = vmul.f32 %v4061_v37, %v1181_v53 }
 0x16f   : > { %v3437_v59 = vpop.eup %3436  ;;  %v4446_v9 = vadd.f32 %v4105_v61, %v1945_v5  ;;  %v1318_v42 = vmul.f32 %v3971_v45, %v1282_v51  ;;  %v1249_v49 = vadd.f32 %v1217_v12, %v1117_v60  ;;  %v1715_v40 = vmul.f32 %v4033_v3, %v1082_v63  ;;  %v1084_v60 = vld [vmem:[#allocation2 + $0xe0] sm:$0xff] }
 0x170   : > { %v3439_v18 = vpop.eup %3438  ;;  %v1616_v52 = vmul.f32 %v4025_v56, %v1282_v51  ;;  %v1548_v22 = vadd.f32 %v1516_v39, %v1448_v1  ;;  %v1647_v44 = vadd.f32 %v1615_v21, %v1547_v4  ;;  %v1846_v36 = vadd.f32 %v1814_v41, %v1746_v31  ;;  %v1183_v12 = vld [vmem:[#allocation2 + $0xd9] sm:$0xff] }
 0x171   : > { %v3441_v19 = vpop.eup %3440  ;;  %v1815_v53 = vmul.f32 %v4061_v37, %v1182_v50  ;;  %v1250_v47 = vadd.f32 %v1218_v54, %v1118_v32  ;;  %v1317_v14 = vmul.f32 %v3971_v45, %v1281_v27  ;;  %v1747_v35 = vadd.f32 %v1715_v40, %v1646_v57 }
 0x172   : > { %3450 = vpow2.f32 %v3043_v10  ;;  %v1914_v38 = vmul.f32 %v4077_v62, %v1281_v27  ;;  %v1716_v63 = vmul.f32 %v4033_v3, %v4450_v8  ;;  %v960_v7 = vmul.f32 %v3437_v59, %v4193_v55 }
 0x173   : > { %v3443_v23 = vpop.eup %3442  ;;  %v3044_v11 = vmul.f32 -1.442695, %v4446_v9  ;;  %v1349_v5 = vadd.f32 %v1317_v14, %v1249_v49  ;;  %v1417_v50 = vmul.f32 %v3993_v0, %v4450_v8  ;;  %v959_v1 = vmul.f32 %v3439_v18, %v4197_v33  ;;  %v1283_v18 = vld [vmem:[#allocation2 + $0xda] sm:$0xff] }
 0x174   : > { %v3445_v4 = vpop.eup %3444  ;;  %v1946_v31 = vadd.f32 %v1914_v38, %v1846_v36  ;;  %v1648_v54 = vadd.f32 %v1616_v52, %v1548_v22  ;;  %v1748_v27 = vadd.f32 %v1716_v63, %v1647_v44  ;;  %1049 = vst.msk [vmem:[#allocation2 + $0xf9] sm:$0xff] %vm973_vm1, %v960_v7  ;;  %v962_v32 = vmul.f32 %v3441_v19, %v4225_v25 }
 0x175   : > { %v3447_v55 = vpop.eup %3446  ;;  %v2236_v57 = vsel %vm973_vm1, %v4426_v43, 0.0  ;;  %3452 = vrcp.f32 %v2108_v17  ;;  %v1847_v10 = vadd.f32 %v1815_v53, %v1747_v35  ;;  %v1350_v39 = vadd.f32 %v1318_v42, %v1250_v47  ;;  %1048 = vst.msk [vmem:[#allocation2 + $0xf1] sm:$0xff] %vm973_vm1, %v959_v1  ;;  %v1184_v42 = vld [vmem:[#allocation2 + $0xe1] sm:$0xff] }
 0x176   : > { %v1418_v21 = vmul.f32 %v3993_v0, %v1084_v60  ;;  %v1717_v33 = vmul.f32 %v4033_v3, %v1084_v60  ;;  %v1816_v41 = vmul.f32 %v4061_v37, %v1183_v12  ;;  %1051 = vst.msk [vmem:[#allocation2 + $0x111] sm:$0xff] %vm973_vm1, %v962_v32  ;;  %v865_v59 = vadd.f32 1.0, %v3443_v23 }
 0x177   : > { %v3449_v49 = vpop.eup %3448  ;;  %v4474_v25 = vmul.f32 %v4405_v15, %v4261_v24  ;;  %v2109_v40 = vadd.f32 1.0, %v3445_v4  ;;  %v1915_v17 = vmul.f32 %v4077_v62, %v1282_v51  ;;  %v1449_v52 = vadd.f32 %v1417_v50, %v1349_v5  ;;  %v1284_v24 = vld [vmem:[#allocation2 + $0xe2] sm:$0xff] }
 0x178   : > { %3454 = vpow2.f32 %v3044_v11  ;;  %v4478_v22 = vadd.f32 %v4105_v61, %v1946_v31  ;;  %v1749_v44 = vadd.f32 %v1717_v33, %v1648_v54  ;;  %v1848_v36 = vadd.f32 %v1816_v41, %v1748_v27 }
 0x179   : > { %5326 = vst [vmem:[#allocation18_spill] sm:$0xff] %v4474_v25  ;;  %v2237_v19 = vadd.f32 %v2236_v57, %v4373_v20  ;;  %v1947_v53 = vadd.f32 %v1915_v17, %v1847_v10  ;;  %v1517_v47 = vmul.f32 %v4010_v30, %v1183_v12  ;;  %3456 = vpow2.f32 %v4271_v13 }
 0x17a   : > { %v1817_v15 = vmul.f32 %v4061_v37, %v1184_v42  ;;  %v1450_v51 = vadd.f32 %v1418_v21, %v1350_v39  ;;  %v1916_v14 = vmul.f32 %v4077_v62, %v1283_v18  ;;  %3458 = vrcp.f32 %v865_v59  ;;  %v4507_v21 = vld [vmem:[%s5273_s2] ss:$0 sm:$0xff] }
 0x17b   : > { %v4486_v35 = vmul.f32 %v3447_v55, %v4311_v34  ;;  %v2110_v38 = vadd.f32 1.0, %v3449_v49  ;;  %3460 = vrcp.f32 %v2109_v40  ;;  %v1549_v63 = vadd.f32 %v1517_v47, %v1449_v52 }
 0x17c   : > { %v3451_v7 = vpop.eup %3450  ;;  %v3045_v20 = vmul.f32 -1.442695, %v4478_v22  ;;  %v1518_v23 = vmul.f32 %v4010_v30, %v1184_v42  ;;  %v1849_v11 = vadd.f32 %v1817_v15, %v1749_v44  ;;  %v1948_v13 = vadd.f32 %v1916_v14, %v1848_v36  ;;  %v4500_v32 = vld [vmem:[#allocation2 + $0xf0] sm:$0xff]  ;;  %v4518_v49 = vld [vmem:[#allocation2 + $0xf8] sm:$0xff] }
 0x17d   : > { %5327 = vst [vmem:[#allocation19_spill] sm:$0xff] %v4486_v35  ;;  %v4491_v5 = vadd.f32 %v4105_v61, %v1947_v53  ;;  %v1220_v50 = vmul.f32 %v3958_v28, %v1184_v42  ;;  %v1917_v1 = vmul.f32 %v4077_v62, %v1284_v24  ;;  %v1617_v34 = vmul.f32 %v4025_v56, %v1283_v18  ;;  %v4524_v44 = vld [vmem:[#allocation2 + $0xf1] sm:$0xff] }
 0x17e   : > { %v1119_v4 = vmul.f32 %v3961_v29, %v4450_v8  ;;  %v1120_v31 = vmul.f32 %v3961_v29, %v1084_v60  ;;  %v1219_v54 = vmul.f32 %v3958_v28, %v1183_v12  ;;  %v1550_v27 = vadd.f32 %v1518_v23, %v1450_v51 }
 0x17f   : > { %v3453_v55 = vpop.eup %3452  ;;  %v2238_v57 = vsel %vm973_vm1, %v4474_v25, 0.0  ;;  %v2111_v10 = vadd.f32 1.0, %v3451_v7  ;;  %v1649_v39 = vadd.f32 %v1617_v34, %v1549_v63  ;;  %v4511_v8 = vadd.f32 %v4507_v21, %v4100_v58 }
 0x180   : > { %3462 = vpow2.f32 %v3045_v20  ;;  %v1618_v60 = vmul.f32 %v4025_v56, %v1284_v24  ;;  %v1949_v12 = vadd.f32 %v1917_v1, %v1849_v11  ;;  %v4515_v33 = vadd.f32 %v4105_v61, %v1948_v13 }
 0x181   : > { %v2239_v41 = vadd.f32 %v2238_v57, %v2237_v19  ;;  %3464 = vrcp.f32 %v2110_v38  ;;  %v3046_v59 = vmul.f32 -1.442695, %v4491_v5  ;;  %v1718_v40 = vmul.f32 %v4033_v3, %v4500_v32 }
 0x182   : > { %v3455_v17 = vpop.eup %3454  ;;  %v2240_v58 = vsel %vm973_vm1, %v4486_v35, 0.0  ;;  %v1251_v42 = vadd.f32 %v1219_v54, %v1119_v4  ;;  %v1252_v52 = vadd.f32 %v1220_v50, %v1120_v31  ;;  %v1650_v36 = vadd.f32 %v1618_v60, %v1550_v27  ;;  %v4541_v50 = vld [vmem:[#allocation2 + $0xf2] sm:$0xff] }
 0x183   : > { %v3457_v53 = vpop.eup %3456  ;;  %v4527_v19 = vmul.f32 %v3453_v55, %v4351_v46  ;;  %3466 = vrcp.f32 %v2111_v10  ;;  %v1320_v47 = vmul.f32 %v3971_v45, %v1284_v24  ;;  %v1750_v15 = vadd.f32 %v1718_v40, %v1649_v39  ;;  %v4537_v46 = vld [vmem:[#allocation2 + $0xf9] sm:$0xff] }
 0x184   : > { %v3459_v51 = vpop.eup %3458  ;;  %v1319_v14 = vmul.f32 %v3971_v45, %v1283_v18  ;;  %v4532_v38 = vadd.f32 %v4105_v61, %v1949_v12  ;;  %v3047_v63 = vmul.f32 -1.442695, %v4515_v33  ;;  %v1719_v7 = vmul.f32 %v4033_v3, %v4518_v49  ;;  %v4554_v10 = vld [vmem:[#allocation2 + $0xfa] sm:$0xff]  ;;  %v5330_v12 = vld [vmem:[#allocation14_spill] sm:$0xff] }
 0x185   : > { %5328 = vst [vmem:[#allocation20_spill] sm:$0xff] %v4527_v19  ;;  %v3461_v20 = vpop.eup %3460  ;;  %v2241_v23 = vadd.f32 %v2240_v58, %v2239_v41  ;;  %v2112_v11 = vadd.f32 1.0, %v3455_v17  ;;  %3468 = vpow2.f32 %v3046_v59  ;;  %v1818_v24 = vmul.f32 %v4061_v37, %v4524_v44 }
 0x186   : > { %v1351_v13 = vadd.f32 %v1319_v14, %v1251_v42  ;;  %v1352_v18 = vadd.f32 %v1320_v47, %v1252_v52  ;;  %v1751_v61 = vadd.f32 %v1719_v7, %v1650_v36  ;;  %v868_v1 = vadd.f32 1.0, %v3457_v53  ;;  %v5331_v7 = vld [vmem:[#allocation11_spill] sm:$0xff] }
 0x187   : > { %v1419_v34 = vmul.f32 %v3993_v0, %v4500_v32  ;;  %v1420_v4 = vmul.f32 %v3993_v0, %v4518_v49  ;;  %v1850_v31 = vadd.f32 %v1818_v24, %v1750_v15  ;;  %v961_v54 = vmul.f32 %v3459_v51, %v4242_v2 }
 0x188   : > { %v4549_v27 = vmul.f32 %v3461_v20, %v4387_v26  ;;  %3470 = vpow2.f32 %v3047_v63  ;;  %v3048_v55 = vmul.f32 -1.442695, %v4532_v38  ;;  %v1819_v57 = vmul.f32 %v4061_v37, %v4537_v46 }
 0x189   : > { %v1918_v39 = vmul.f32 %v4077_v62, %v4541_v50  ;;  %1050 = vst.msk [vmem:[#allocation2 + $0x109] sm:$0xff] %vm973_vm1, %v961_v54  ;;  %v3025_v60 = vmul.f32 -1.442695, %v4278_v16  ;;  %v3024_v2 = vmul.f32 -1.442695, %v5330_v12  ;;  %v2242_v26 = vsel %vm973_vm1, %v4527_v19, 0.0 }
 0x18a   : > { %5329 = vst [vmem:[#allocation21_spill] sm:$0xff] %v4549_v27  ;;  %v3463_v41 = vpop.eup %3462  ;;  %3472 = vrcp.f32 %v2112_v11  ;;  %v1851_v59 = vadd.f32 %v1819_v57, %v1751_v61  ;;  %v3027_v40 = vmul.f32 -1.442695, %v4511_v8  ;;  %v1451_v58 = vadd.f32 %v1419_v34, %v1351_v13 }
 0x18b   : > { %v3465_v17 = vpop.eup %3464  ;;  %v1452_v42 = vadd.f32 %v1420_v4, %v1352_v18  ;;  %v1950_v52 = vadd.f32 %v1918_v39, %v1850_v31  ;;  %3474 = vrcp.f32 %v868_v1  ;;  %v2243_v36 = vadd.f32 %v2242_v26, %v2241_v23  ;;  %v4579_v18 = vld [vmem:[%s5275_s4] ss:$0 sm:$0xff] }
 0x18c   : > { %v2244_v53 = vsel %vm973_vm1, %v4549_v27, 0.0  ;;  %3476 = vpow2.f32 %v3048_v55  ;;  %v1919_v47 = vmul.f32 %v4077_v62, %v4554_v10  ;;  %v2113_v51 = vadd.f32 1.0, %v3463_v41 }
 0x18d   : > { %v3467_v15 = vpop.eup %3466  ;;  %v1520_v14 = vmul.f32 %v4010_v30, %v4537_v46  ;;  %v1519_v63 = vmul.f32 %v4010_v30, %v4524_v44  ;;  %3478 = vpow2.f32 %v5331_v7  ;;  %v4574_v20 = vmul.f32 %v3465_v17, %v4392_v48 }
 0x18e   : > { %v1951_v23 = vadd.f32 %v1919_v47, %v1851_v59  ;;  %3480 = vpow2.f32 %v3025_v60  ;;  %v4582_v61 = vadd.f32 %v4579_v18, %v1950_v52  ;;  %v2245_v1 = vadd.f32 %v2244_v53, %v2243_v36 }
 0x18f   : > { %5332 = vst [vmem:[#allocation14_spill] sm:$0xff] %v4574_v20  ;;  %v3469_v11 = vpop.eup %3468  ;;  %v1551_v24 = vadd.f32 %v1519_v63, %v1451_v58  ;;  %v1552_v13 = vadd.f32 %v1520_v14, %v1452_v42  ;;  %3482 = vpow2.f32 %v3024_v2  ;;  %v4585_v34 = vmul.f32 %v3467_v15, %v4432_v6  ;;  %v4610_v15 = vld [vmem:[#allocation2 + $0x111] sm:$0xff] }
 0x190   : > { %3484 = vpow2.f32 %v3027_v40  ;;  %v1620_v48 = vmul.f32 %v4025_v56, %v4554_v10  ;;  %v1619_v4 = vmul.f32 %v4025_v56, %v4541_v50  ;;  %v2114_v54 = vadd.f32 1.0, %v3469_v11  ;;  %v4594_v57 = vld [vmem:[#allocation2 + $0x108] sm:$0xff]  ;;  %v4596_v39 = vld [vmem:[#allocation2 + $0x110] sm:$0xff] }
 0x191   : > { %5333 = vst [vmem:[#allocation11_spill] sm:$0xff] %v4585_v34  ;;  %3486 = vrcp.f32 %v2113_v51  ;;  %v4592_v55 = vadd.f32 %v4579_v18, %v1951_v23  ;;  %v2246_v6 = vsel %vm973_vm1, %v4574_v20, 0.0  ;;  %v3049_v2 = vmul.f32 -1.442695, %v4582_v61  ;;  %v4601_v40 = vld [vmem:[#allocation2 + $0x109] sm:$0xff]  ;;  %v5334_v51 = vld [vmem:[#allocation4_spill] sm:$0xff] }
 0x192   : > { %v3471_v31 = vpop.eup %3470  ;;  %v1651_v60 = vadd.f32 %v1619_v4, %v1551_v24  ;;  %v1652_v41 = vadd.f32 %v1620_v48, %v1552_v13  ;;  %v2247_v59 = vadd.f32 %v2246_v6, %v2245_v1  ;;  %v2248_v58 = vsel %vm973_vm1, %v4585_v34, 0.0  ;;  %v4621_v48 = vld [vmem:[#allocation2 + $0x10a] sm:$0xff]  ;;  %v5336_v4 = vld [vmem:[#allocation9_spill] sm:$0xff] }
 0x193   : > { %v2115_v42 = vadd.f32 1.0, %v3471_v31  ;;  %v1720_v52 = vmul.f32 %v4033_v3, %v4594_v57  ;;  %v1721_v36 = vmul.f32 %v4033_v3, %v4596_v39  ;;  %3488 = vrcp.f32 %v2114_v54  ;;  %v5337_v54 = vld [vmem:[#allocation5_spill] sm:$0xff] }
 0x194   : > { %v3473_v26 = vpop.eup %3472  ;;  %v3050_v47 = vmul.f32 -1.442695, %v4592_v55  ;;  %v4614_v14 = vadd.f32 %v4507_v21, %v5334_v51  ;;  %3490 = vpow2.f32 %v3049_v2  ;;  %v1820_v11 = vmul.f32 %v4061_v37, %v4601_v40 }
 0x195   : > { %v3475_v17 = vpop.eup %3474  ;;  %v1752_v7 = vadd.f32 %v1720_v52, %v1651_v60  ;;  %v1753_v23 = vadd.f32 %v1721_v36, %v1652_v41  ;;  %v4619_v13 = vmul.f32 %v3473_v26, %v4446_v9  ;;  %v2249_v1 = vadd.f32 %v2248_v58, %v2247_v59  ;;  %v4630_v9 = vld [vmem:[#allocation2 + $0x112] sm:$0xff] }
 0x196   : > { %v3477_v53 = vpop.eup %3476  ;;  %v964_v31 = vmul.f32 %v3475_v17, %v5336_v4  ;;  %v4626_v6 = vadd.f32 %v4507_v21, %v5337_v54  ;;  %3492 = vrcp.f32 %v2115_v42  ;;  %v1821_v60 = vmul.f32 %v4061_v37, %v4610_v15 }
 0x197   : > { %v3479_v63 = vpop.eup %3478  ;;  %5335 = vst [vmem:[#allocation4_spill] sm:$0xff] %v4619_v13  ;;  %v1852_v2 = vadd.f32 %v1820_v11, %v1752_v7  ;;  %v2116_v36 = vadd.f32 1.0, %v3477_v53  ;;  %3494 = vpow2.f32 %v3050_v47  ;;  %v1920_v4 = vmul.f32 %v4077_v62, %v4621_v48 }
 0x198   : > { %v3481_v24 = vpop.eup %3480  ;;  %v867_v41 = vadd.f32 1.0, %v3479_v63  ;;  %1053 = vst.msk [vmem:[#allocation2 + $0x129] sm:$0xff] %vm973_vm1, %v964_v31  ;;  %v1853_v58 = vadd.f32 %v1821_v60, %v1753_v23  ;;  %v1222_v7 = vmul.f32 %v3958_v28, %v4537_v46  ;;  %v1121_v53 = vmul.f32 %v3961_v29, %v4500_v32 }
 0x199   : > { %v3483_v51 = vpop.eup %3482  ;;  %v870_v26 = vadd.f32 1.0, %v3481_v24  ;;  %v1221_v47 = vmul.f32 %v3958_v28, %v4524_v44  ;;  %v1122_v63 = vmul.f32 %v3961_v29, %v4518_v49  ;;  %v1921_v23 = vmul.f32 %v4077_v62, %v4630_v9 }
 0x19a   : > { %v3485_v52 = vpop.eup %3484  ;;  %v869_v59 = vadd.f32 1.0, %v3483_v51  ;;  %3496 = vrcp.f32 %v867_v41  ;;  %v1952_v11 = vadd.f32 %v1920_v4, %v1852_v2  ;;  %v3026_v46 = vmul.f32 -1.442695, %v4614_v14 }
 0x19b   : > { %v3487_v17 = vpop.eup %3486  ;;  %v872_v42 = vadd.f32 1.0, %v3485_v52  ;;  %3498 = vrcp.f32 %v870_v26  ;;  %v1953_v32 = vadd.f32 %v1921_v23, %v1853_v58  ;;  %v3029_v31 = vmul.f32 -1.442695, %v4626_v6 }
 0x19c   : > { %3500 = vrcp.f32 %v869_v59  ;;  %v4646_v24 = vmul.f32 %v3487_v17, %v4478_v22  ;;  %v2250_v54 = vsel %vm973_vm1, %v4619_v13, 0.0  ;;  %v1253_v49 = vadd.f32 %v1221_v47, %v1121_v53  ;;  %v5339_v22 = vld [vmem:[#allocation6_spill] sm:$0xff]  ;;  %v5340_v59 = vld [vmem:[#allocation7_spill] sm:$0xff] }
 0x19d   : > { %3502 = vrcp.f32 %v872_v42  ;;  %v3489_v44 = vpop.eup %3488  ;;  %v2251_v60 = vadd.f32 %v2250_v54, %v2249_v1  ;;  %v1254_v41 = vadd.f32 %v1222_v7, %v1122_v63  ;;  %v4653_v2 = vadd.f32 %v4579_v18, %v1952_v11  ;;  %v5341_v42 = vld [vmem:[#allocation8_spill] sm:$0xff] }
 0x19e   : > { %5338 = vst [vmem:[#allocation9_spill] sm:$0xff] %v4646_v24  ;;  %3504 = vrcp.f32 %v2116_v36  ;;  %v3491_v51 = vpop.eup %3490  ;;  %v4657_v52 = vadd.f32 %v4507_v21, %v5339_v22  ;;  %v2252_v36 = vsel %vm973_vm1, %v4646_v24, 0.0  ;;  %v1321_v26 = vmul.f32 %v3971_v45, %v4541_v50 }
 0x19f   : > { %3506 = vpow2.f32 %v3026_v46  ;;  %v4665_v17 = vadd.f32 %v4507_v21, %v5340_v59  ;;  %v1322_v58 = vmul.f32 %v3971_v45, %v4554_v10  ;;  %v4670_v4 = vadd.f32 %v4579_v18, %v1953_v32 }
 0x1a0   : > { %v3493_v1 = vpop.eup %3492  ;;  %3508 = vpow2.f32 %v3029_v31  ;;  %v4674_v7 = vadd.f32 %v4507_v21, %v5341_v42  ;;  %v4677_v50 = vmul.f32 %v3489_v44, %v4491_v5  ;;  %v1353_v47 = vadd.f32 %v1321_v26, %v1253_v49  ;;  %v5344_v49 = vld [vmem:[#allocation10_spill] sm:$0xff] }
 0x1a1   : > { %v3495_v53 = vpop.eup %3494  ;;  %v2117_v63 = vadd.f32 1.0, %v3491_v51  ;;  %v1421_v23 = vmul.f32 %v3993_v0, %v4594_v57  ;;  %v2253_v46 = vadd.f32 %v2252_v36, %v2251_v60  ;;  %v1123_v10 = vmul.f32 %v3961_v29, %v4594_v57 }
 0x1a2   : > { %5342 = vst [vmem:[#allocation5_spill] sm:$0xff] %v4677_v50  ;;  %v1354_v32 = vadd.f32 %v1322_v58, %v1254_v41  ;;  %v3051_v31 = vmul.f32 -1.442695, %v4653_v2  ;;  %v4685_v21 = vmul.f32 %v3493_v1, %v4515_v33  ;;  %v1223_v5 = vmul.f32 %v3958_v28, %v4601_v40 }
 0x1a3   : > { %v1422_v44 = vmul.f32 %v3993_v0, %v4596_v39  ;;  %v1224_v60 = vmul.f32 %v3958_v28, %v4610_v15  ;;  %v1124_v57 = vmul.f32 %v3961_v29, %v4596_v39  ;;  %v3052_v41 = vmul.f32 -1.442695, %v4670_v4 }
 0x1a4   : > { %v3497_v11 = vpop.eup %3496  ;;  %5343 = vst [vmem:[#allocation6_spill] sm:$0xff] %v4685_v21  ;;  %v2254_v26 = vsel %vm973_vm1, %v4677_v50, 0.0  ;;  %3510 = vrcp.f32 %v2117_v63  ;;  %v1453_v59 = vadd.f32 %v1421_v23, %v1353_v47  ;;  %v1521_v47 = vmul.f32 %v4010_v30, %v4601_v40  ;;  %v1696_v23 = vld [vmem:[#allocation2 + $0x198] sm:$0xff] }
 0x1a5   : > { %v3499_v54 = vpop.eup %3498  ;;  %v963_v51 = vmul.f32 %v3497_v11, %v5344_v49  ;;  %v2255_v42 = vadd.f32 %v2254_v26, %v2253_v46  ;;  %v2118_v11 = vadd.f32 1.0, %v3495_v53  ;;  %3512 = vpow2.f32 %v3051_v31 }
 0x1a6   : > { %v3501_v22 = vpop.eup %3500  ;;  %v966_v33 = vmul.f32 %v3499_v54, %v4278_v16  ;;  %v2256_v16 = vsel %vm973_vm1, %v4685_v21, 0.0  ;;  %v1255_v54 = vadd.f32 %v1223_v5, %v1123_v10  ;;  %v1454_v49 = vadd.f32 %v1422_v44, %v1354_v32 }
 0x1a7   : > { %v3503_v36 = vpop.eup %3502  ;;  %1052 = vst.msk [vmem:[#allocation2 + $0x121] sm:$0xff] %vm973_vm1, %v963_v51  ;;  %v965_v1 = vmul.f32 %v3501_v22, %v5330_v12  ;;  %v1256_v63 = vadd.f32 %v1224_v60, %v1124_v57  ;;  %3514 = vpow2.f32 %v3052_v41  ;;  %v3028_v12 = vmul.f32 -1.442695, %v4657_v52  ;;  %v1697_v57 = vld [vmem:[#allocation2 + $0x1a0] sm:$0xff] }
 0x1a8   : > { %v3505_v58 = vpop.eup %3504  ;;  %1055 = vst.msk [vmem:[#allocation2 + $0x141] sm:$0xff] %vm973_vm1, %v966_v33  ;;  %v968_v39 = vmul.f32 %v3503_v36, %v4511_v8  ;;  %v3031_v53 = vmul.f32 -1.442695, %v4665_v17  ;;  %v1522_v10 = vmul.f32 %v4010_v30, %v4610_v15  ;;  %v1323_v40 = vmul.f32 %v3971_v45, %v4621_v48 }
 0x1a9   : > { %1054 = vst.msk [vmem:[#allocation2 + $0x139] sm:$0xff] %vm973_vm1, %v965_v1  ;;  %v3507_v8 = vpop.eup %3506  ;;  %v4713_v46 = vmul.f32 %v3505_v58, %v4532_v38  ;;  %v1553_v32 = vadd.f32 %v1521_v47, %v1453_v59  ;;  %v2257_v5 = vadd.f32 %v2256_v16, %v2255_v42  ;;  %3516 = vrcp.f32 %v2118_v11  ;;  %v1190_v42 = vld [vmem:[#allocation2 + $0x129] sm:$0xff] }
 0x1aa   : > { %1057 = vst.msk [vmem:[#allocation2 + $0x159] sm:$0xff] %vm973_vm1, %v968_v39  ;;  %v3509_v31 = vpop.eup %3508  ;;  %v1324_v44 = vmul.f32 %v3971_v45, %v4630_v9  ;;  %v3030_v51 = vmul.f32 -1.442695, %v4674_v7  ;;  %v1355_v22 = vadd.f32 %v1323_v40, %v1255_v54  ;;  %v1554_v60 = vadd.f32 %v1522_v10, %v1454_v49 }
 0x1ab   : > { %5345 = vst [vmem:[#allocation7_spill] sm:$0xff] %v4713_v46  ;;  %v1621_v38 = vmul.f32 %v4025_v56, %v4621_v48  ;;  %v4725_v15 = vmul.f32 %v4033_v3, %v1696_v23  ;;  %v1622_v41 = vmul.f32 %v4025_v56, %v4630_v9  ;;  %v871_v59 = vadd.f32 1.0, %v3507_v8 }
 0x1ac   : > { %v1356_v26 = vadd.f32 %v1324_v44, %v1256_v63  ;;  %3518 = vpow2.f32 %v3028_v12  ;;  %v2258_v1 = vsel %vm973_vm1, %v4713_v46, 0.0  ;;  %v874_v39 = vadd.f32 1.0, %v3509_v31  ;;  %v1290_v31 = vld [vmem:[#allocation2 + $0x12a] sm:$0xff] }
 0x1ad   : > { %v1653_v58 = vadd.f32 %v1621_v38, %v1553_v32  ;;  %v4732_v16 = vadd.f32 %v2258_v1, %v2257_v5  ;;  %3520 = vpow2.f32 %v3031_v53  ;;  %v4736_v9 = vmul.f32 %v4033_v3, %v1697_v57 }
 0x1ae   : > { %v1089_v33 = vld [vmem:[#allocation2 + $0x120] sm:$0xff]  ;;  %v1090_v36 = vld [vmem:[#allocation2 + $0x128] sm:$0xff]  ;;  %v3511_v49 = vpop.eup %3510  ;;  %v1654_v63 = vadd.f32 %v1622_v41, %v1554_v60  ;;  %3522 = vpow2.f32 %v3030_v51  ;;  %v1226_v8 = vmul.f32 %v3958_v28, %v1190_v42  ;;  %v1524_v53 = vmul.f32 %v4010_v30, %v1190_v42 }
 0x1af   : > { %v1189_v11 = vld [vmem:[#allocation2 + $0x121] sm:$0xff]  ;;  %v1423_v48 = vmul.f32 %v3993_v0, %v1089_v33  ;;  %v1424_v54 = vmul.f32 %v3993_v0, %v1090_v36  ;;  %v1722_v12 = vmul.f32 %v4033_v3, %v1089_v33  ;;  %v3513_v23 = vpop.eup %3512  ;;  %3524 = vrcp.f32 %v871_v59 }
 0x1b0   : > { %v1289_v10 = vld [vmem:[#allocation2 + $0x122] sm:$0xff]  ;;  %v1523_v32 = vmul.f32 %v4010_v30, %v1189_v11  ;;  %v1822_v44 = vmul.f32 %v4061_v37, %v1189_v11  ;;  %3526 = vrcp.f32 %v874_v39  ;;  %v1125_v60 = vmul.f32 %v3961_v29, %v1089_v33  ;;  %v1091_v46 = vld [vmem:[#allocation2 + $0x138] sm:$0xff] }
 0x1b1   : > { %v1455_v47 = vadd.f32 %v1423_v48, %v1355_v22  ;;  %v1456_v40 = vadd.f32 %v1424_v54, %v1356_v26  ;;  %v1754_v5 = vadd.f32 %v1722_v12, %v1653_v58  ;;  %v3515_v22 = vpop.eup %3514  ;;  %v1225_v51 = vmul.f32 %v3958_v28, %v1189_v11  ;;  %v1092_v21 = vld [vmem:[#allocation2 + $0x140] sm:$0xff] }
 0x1b2   : > { %v1723_v57 = vmul.f32 %v4033_v3, %v1090_v36  ;;  %v4747_v41 = vmul.f32 %v3511_v49, %v4582_v61  ;;  %v2119_v26 = vadd.f32 1.0, %v3513_v23  ;;  %v1922_v1 = vmul.f32 %v4077_v62, %v1289_v10 }
 0x1b3   : > { %v1555_v38 = vadd.f32 %v1523_v32, %v1455_v47  ;;  %v1854_v59 = vadd.f32 %v1822_v44, %v1754_v5  ;;  %v3517_v48 = vpop.eup %3516  ;;  %v1326_v58 = vmul.f32 %v3971_v45, %v1290_v31  ;;  %v1556_v54 = vadd.f32 %v1524_v53, %v1456_v40  ;;  %v1191_v53 = vld [vmem:[#allocation2 + $0x139] sm:$0xff] }
 0x1b4   : > { %5346 = vst [vmem:[#allocation8_spill] sm:$0xff] %v4747_v41  ;;  %v1623_v39 = vmul.f32 %v4025_v56, %v1289_v10  ;;  %v1755_v12 = vadd.f32 %v1723_v57, %v1654_v63  ;;  %v2120_v33 = vadd.f32 1.0, %v3515_v22  ;;  %v1624_v11 = vmul.f32 %v4025_v56, %v1290_v31 }
 0x1b5   : > { %v1126_v47 = vmul.f32 %v3961_v29, %v1090_v36  ;;  %v1954_v32 = vadd.f32 %v1922_v1, %v1854_v59  ;;  %v1823_v49 = vmul.f32 %v4061_v37, %v1190_v42  ;;  %v1923_v23 = vmul.f32 %v4077_v62, %v1290_v31  ;;  %v1192_v31 = vld [vmem:[#allocation2 + $0x141] sm:$0xff] }
 0x1b6   : > { %v3519_v61 = vpop.eup %3518  ;;  %v1257_v5 = vadd.f32 %v1225_v51, %v1125_v60  ;;  %v1655_v44 = vadd.f32 %v1623_v39, %v1555_v38  ;;  %v4757_v40 = vmul.f32 %v3517_v48, %v4592_v55  ;;  %v4761_v63 = vsel %vm973_vm1, %v4747_v41, 0.0  ;;  %v4768_v59 = vld [vmem:[#allocation2 + $0x142] sm:$0xff]  ;;  %v4770_v1 = vld [vmem:[#allocation2 + $0x13a] sm:$0xff] }
 0x1b7   : > { %3528 = vrcp.f32 %v2119_v26  ;;  %v4764_v36 = vadd.f32 %v4579_v18, %v1954_v32  ;;  %v3521_v22 = vpop.eup %3520  ;;  %v1325_v42 = vmul.f32 %v3971_v45, %v1289_v10  ;;  %v1855_v57 = vadd.f32 %v1823_v49, %v1755_v12 }
 0x1b8   : > { %5347 = vst [vmem:[#allocation10_spill] sm:$0xff] %v4757_v40  ;;  %v1656_v60 = vadd.f32 %v1624_v11, %v1556_v54  ;;  %v1724_v51 = vmul.f32 %v4033_v3, %v1091_v46  ;;  %v3523_v38 = vpop.eup %3522  ;;  %3530 = vrcp.f32 %v2120_v33  ;;  %v1258_v55 = vadd.f32 %v1226_v8, %v1126_v47 }
 0x1b9   : > { %v1725_v26 = vmul.f32 %v4033_v3, %v1092_v21  ;;  %v873_v48 = vadd.f32 1.0, %v3519_v61  ;;  %v3525_v39 = vpop.eup %3524  ;;  %v1357_v32 = vadd.f32 %v1325_v42, %v1257_v5  ;;  %v1425_v41 = vmul.f32 %v3993_v0, %v1091_v46 }
 0x1ba   : > { %v1756_v10 = vadd.f32 %v1724_v51, %v1655_v44  ;;  %v1824_v12 = vmul.f32 %v4061_v37, %v1191_v53  ;;  %v3527_v54 = vpop.eup %3526  ;;  %v3053_v11 = vmul.f32 -1.442695, %v4764_v36  ;;  %v1228_v33 = vmul.f32 %v3958_v28, %v1192_v31 }
 0x1bb   : > { %v1825_v8 = vmul.f32 %v4061_v37, %v1192_v31  ;;  %v1757_v47 = vadd.f32 %v1725_v26, %v1656_v60  ;;  %v1955_v49 = vadd.f32 %v1923_v23, %v1855_v57  ;;  %v1925_v50 = vmul.f32 %v4077_v62, %v4768_v59 }
 0x1bc   : > { %v1856_v61 = vadd.f32 %v1824_v12, %v1756_v10  ;;  %v1924_v5 = vmul.f32 %v4077_v62, %v4770_v1  ;;  %v1127_v44 = vmul.f32 %v3961_v29, %v1091_v46  ;;  %v1358_v42 = vadd.f32 %v1326_v58, %v1258_v55  ;;  %v1796_v10 = vld [vmem:[#allocation2 + $0x199] sm:$0xff]  ;;  %v1797_v46 = vld [vmem:[#allocation2 + $0x1a1] sm:$0xff] }
 0x1bd   : > { %v1426_v51 = vmul.f32 %v3993_v0, %v1092_v21  ;;  %v1857_v24 = vadd.f32 %v1825_v8, %v1757_v47  ;;  %v1227_v13 = vmul.f32 %v3958_v28, %v1191_v53  ;;  %v1457_v34 = vadd.f32 %v1425_v41, %v1357_v32 }
 0x1be   : > { %v1956_v20 = vadd.f32 %v1924_v5, %v1856_v61  ;;  %v967_v60 = vmul.f32 %v3525_v39, %v4614_v14  ;;  %3532 = vpow2.f32 %v3053_v11  ;;  %v970_v23 = vmul.f32 %v3527_v54, %v4626_v6  ;;  %v1194_v61 = vld [vmem:[#allocation2 + $0x159] sm:$0xff] }
 0x1bf   : > { %v876_v57 = vadd.f32 1.0, %v3521_v22  ;;  %v875_v26 = vadd.f32 1.0, %v3523_v38  ;;  %3534 = vrcp.f32 %v873_v48  ;;  %v1957_v58 = vadd.f32 %v1925_v50, %v1857_v24  ;;  %v1896_v22 = vld [vmem:[#allocation2 + $0x19a] sm:$0xff]  ;;  %v1897_v38 = vld [vmem:[#allocation2 + $0x1a2] sm:$0xff] }
 0x1c0   : > { %1056 = vst.msk [vmem:[#allocation2 + $0x151] sm:$0xff] %vm973_vm1, %v967_v60  ;;  %v4789_v55 = vadd.f32 %v4579_v18, %v1955_v49  ;;  %v4792_v12 = vadd.f32 %v4579_v18, %v1956_v20  ;;  %v1128_v14 = vmul.f32 %v3961_v29, %v1092_v21  ;;  %v1458_v39 = vadd.f32 %v1426_v51, %v1358_v42  ;;  %v1294_v5 = vld [vmem:[#allocation2 + $0x15a] sm:$0xff] }
 0x1c1   : > { %v3529_v41 = vpop.eup %3528  ;;  %v1525_v6 = vmul.f32 %v4010_v30, %v1191_v53  ;;  %1059 = vst.msk [vmem:[#allocation2 + $0x171] sm:$0xff] %vm973_vm1, %v970_v23  ;;  %3536 = vrcp.f32 %v876_v57  ;;  %v4798_v24 = vadd.f32 %v4579_v18, %v1957_v58  ;;  %v2261_v21 = vadd.f32 %v4761_v63, %v4732_v16 }
 0x1c2   : > { %3538 = vrcp.f32 %v875_v26  ;;  %v3054_v50 = vmul.f32 -1.442695, %v4789_v55  ;;  %v3055_v20 = vmul.f32 -1.442695, %v4792_v12  ;;  %v3531_v48 = vpop.eup %3530  ;;  %v1526_v32 = vmul.f32 %v4010_v30, %v1192_v31 }
 0x1c3   : > { %v4806_v53 = vmul.f32 %v4061_v37, %v1796_v10  ;;  %v4809_v54 = vmul.f32 %v4061_v37, %v1797_v46  ;;  %v1259_v11 = vadd.f32 %v1227_v13, %v1127_v44  ;;  %v1557_v8 = vadd.f32 %v1525_v6, %v1457_v34 }
 0x1c4   : > { %v4812_v47 = vmul.f32 %v4077_v62, %v1896_v22  ;;  %3540 = vpow2.f32 %v3054_v50  ;;  %v1558_v49 = vadd.f32 %v1526_v32, %v1458_v39  ;;  %v4815_v42 = vmul.f32 %v4077_v62, %v1897_v38 }
 0x1c5   : > { %3542 = vpow2.f32 %v3055_v20  ;;  %v2262_v16 = vsel %vm973_vm1, %v4757_v40, 0.0  ;;  %v1260_v63 = vadd.f32 %v1228_v33, %v1128_v14  ;;  %v1327_v31 = vmul.f32 %v3971_v45, %v4770_v1 }
 0x1c6   : > { %v1625_v34 = vmul.f32 %v4025_v56, %v4770_v1  ;;  %v3056_v13 = vmul.f32 -1.442695, %v4798_v24  ;;  %v4825_v44 = vmul.f32 %v3529_v41, %v4653_v2  ;;  %v1328_v51 = vmul.f32 %v3971_v45, %v4768_v59 }
 0x1c7   : > { %v1626_v60 = vmul.f32 %v4025_v56, %v4768_v59  ;;  %v1093_v23 = vld [vmem:[#allocation2 + $0x150] sm:$0xff]  ;;  %v2263_v57 = vadd.f32 %v2262_v16, %v2261_v21  ;;  %v1359_v33 = vadd.f32 %v1327_v31, %v1259_v11  ;;  %v1230_v10 = vmul.f32 %v3958_v28, %v1194_v61  ;;  %v1094_v1 = vld [vmem:[#allocation2 + $0x158] sm:$0xff] }
 0x1c8   : > { %5348 = vst [vmem:[#allocation22_spill] sm:$0xff] %v4825_v44  ;;  %v1657_v26 = vadd.f32 %v1625_v34, %v1557_v8  ;;  %v4833_v46 = vmul.f32 %v3971_v45, %v1294_v5  ;;  %v1193_v58 = vld [vmem:[#allocation2 + $0x151] sm:$0xff]  ;;  %v3533_v14 = vpop.eup %3532  ;;  %v1528_v2 = vmul.f32 %v4010_v30, %v1194_v61  ;;  %v4837_v41 = vmul.f32 %v4025_v56, %v1294_v5 }
 0x1c9   : > { %v1427_v39 = vmul.f32 %v3993_v0, %v1093_v23  ;;  %v1658_v59 = vadd.f32 %v1626_v60, %v1558_v49  ;;  %v3535_v6 = vpop.eup %3534  ;;  %v1827_v22 = vmul.f32 %v4061_v37, %v1194_v61  ;;  %v1293_v38 = vld [vmem:[#allocation2 + $0x152] sm:$0xff]  ;;  %v1360_v50 = vadd.f32 %v1328_v51, %v1260_v63 }
 0x1ca   : > { %v1726_v20 = vmul.f32 %v4033_v3, %v1093_v23  ;;  %3544 = vpow2.f32 %v3056_v13  ;;  %v1129_v32 = vmul.f32 %v3961_v29, %v1093_v23  ;;  %v1229_v11 = vmul.f32 %v3958_v28, %v1193_v58 }
 0x1cb   : > { %v3537_v21 = vpop.eup %3536  ;;  %v1428_v8 = vmul.f32 %v3993_v0, %v1094_v1  ;;  %v1727_v16 = vmul.f32 %v4033_v3, %v1094_v1  ;;  %v1826_v49 = vmul.f32 %v4061_v37, %v1193_v58  ;;  %v4848_v61 = vmul.f32 %v3531_v48, %v4670_v4 }
 0x1cc   : > { %v3539_v31 = vpop.eup %3538  ;;  %v1758_v34 = vadd.f32 %v1726_v20, %v1657_v26  ;;  %v2264_v63 = vsel %vm973_vm1, %v4825_v44, 0.0  ;;  %v1130_v13 = vmul.f32 %v3961_v29, %v1094_v1  ;;  %v1459_v51 = vadd.f32 %v1427_v39, %v1359_v33 }
 0x1cd   : > { %5349 = vst [vmem:[#allocation23_spill] sm:$0xff] %v4848_v61  ;;  %v1759_v60 = vadd.f32 %v1727_v16, %v1658_v59  ;;  %v1926_v23 = vmul.f32 %v4077_v62, %v1293_v38  ;;  %v969_v19 = vmul.f32 %v3535_v6, %v4657_v52  ;;  %v972_v26 = vmul.f32 %v3537_v21, %v4665_v17  ;;  %v1196_v59 = vld [vmem:[#allocation2 + $0x171] sm:$0xff] }
 0x1ce   : > { %v3541_v40 = vpop.eup %3540  ;;  %v1858_v27 = vadd.f32 %v1826_v49, %v1758_v34  ;;  %v971_v20 = vmul.f32 %v3539_v31, %v4674_v7  ;;  %v2121_v4 = vadd.f32 1.0, %v3533_v14  ;;  %v1261_v48 = vadd.f32 %v1229_v11, %v1129_v32  ;;  %v1296_v6 = vld [vmem:[#allocation2 + $0x172] sm:$0xff] }
 0x1cf   : > { %v3543_v35 = vpop.eup %3542  ;;  %v1460_v25 = vadd.f32 %v1428_v8, %v1360_v50  ;;  %v1527_v44 = vmul.f32 %v4010_v30, %v1193_v58  ;;  %v1927_v1 = vmul.f32 %v4077_v62, %v1294_v5  ;;  %1058 = vst.msk [vmem:[#allocation2 + $0x169] sm:$0xff] %vm973_vm1, %v969_v19  ;;  %1061 = vst.msk [vmem:[#allocation2 + $0x189] sm:$0xff] %vm973_vm1, %v972_v26  ;;  %v2122_v50 = vadd.f32 1.0, %v3541_v40 }
 0x1d0   : > { %1060 = vst.msk [vmem:[#allocation2 + $0x181] sm:$0xff] %vm973_vm1, %v971_v20  ;;  %v1859_v33 = vadd.f32 %v1827_v22, %v1759_v60  ;;  %v1958_v52 = vadd.f32 %v1926_v23, %v1858_v27  ;;  %v4862_v39 = vadd.f32 %v2264_v63, %v2263_v57  ;;  %v1262_v17 = vadd.f32 %v1230_v10, %v1130_v13 }
 0x1d1   : > { %v1329_v7 = vmul.f32 %v3971_v45, %v1293_v38  ;;  %v1559_v14 = vadd.f32 %v1527_v44, %v1459_v51  ;;  %v2123_v19 = vadd.f32 1.0, %v3543_v35  ;;  %v4870_v21 = vsel %vm973_vm1, %v4848_v61, 0.0 }
 0x1d2   : > { %v1959_v58 = vadd.f32 %v1927_v1, %v1859_v33  ;;  %v4866_v5 = vadd.f32 %v4579_v18, %v1958_v52  ;;  %3546 = vrcp.f32 %v2121_v4  ;;  %v1627_v57 = vmul.f32 %v4025_v56, %v1293_v38 }
 0x1d3   : > { %v1361_v27 = vadd.f32 %v1329_v7, %v1261_v48  ;;  %v1560_v10 = vadd.f32 %v1528_v2, %v1460_v25  ;;  %v1232_v44 = vmul.f32 %v3958_v28, %v1196_v59  ;;  %v1332_v32 = vmul.f32 %v3971_v45, %v1296_v6 }
 0x1d4   : > { %v3545_v22 = vpop.eup %3544  ;;  %v4876_v40 = vadd.f32 %v4579_v18, %v1959_v58  ;;  %v3057_v11 = vmul.f32 -1.442695, %v4866_v5  ;;  %v1659_v35 = vadd.f32 %v1627_v57, %v1559_v14  ;;  %v1530_v8 = vmul.f32 %v4010_v30, %v1196_v59 }
 0x1d5   : > { %v1362_v16 = vadd.f32 %v4833_v46, %v1262_v17  ;;  %3548 = vrcp.f32 %v2122_v50  ;;  %v1630_v31 = vmul.f32 %v4025_v56, %v1296_v6  ;;  %v1829_v25 = vmul.f32 %v4061_v37, %v1196_v59 }
 0x1d6   : > { %5350 = vst [vmem:[#allocation24_spill] sm:$0xff] %v4876_v40  ;;  %v4884_v2 = vmul.f32 %v4077_v62, %v1296_v6  ;;  %3550 = vrcp.f32 %v2123_v19  ;;  %v1095_v38 = vld [vmem:[#allocation2 + $0x168] sm:$0xff]  ;;  %v1096_v34 = vld [vmem:[#allocation2 + $0x170] sm:$0xff]  ;;  %v1660_v63 = vadd.f32 %v4837_v41, %v1560_v10  ;;  %v4888_v13 = vmul.f32 -1.442695, %v4876_v40 }
 0x1d7   : > { %v1195_v49 = vld [vmem:[#allocation2 + $0x169] sm:$0xff]  ;;  %3552 = vpow2.f32 %v3057_v11  ;;  %v4890_v51 = vadd.f32 1.0, %v3545_v22  ;;  %v1131_v46 = vmul.f32 %v3961_v29, %v1095_v38  ;;  %v1132_v60 = vmul.f32 %v3961_v29, %v1096_v34  ;;  %v1395_v4 = vld [vmem:[#allocation2 + $0x180] sm:$0xff] }
 0x1d8   : > { %v1231_v23 = vmul.f32 %v3958_v28, %v1195_v49  ;;  %v1295_v26 = vld [vmem:[#allocation2 + $0x16a] sm:$0xff]  ;;  %v1429_v20 = vmul.f32 %v3993_v0, %v1095_v38  ;;  %v1430_v41 = vmul.f32 %v3993_v0, %v1096_v34  ;;  %v1529_v33 = vmul.f32 %v4010_v30, %v1195_v49  ;;  %v1495_v17 = vld [vmem:[#allocation2 + $0x181] sm:$0xff] }
 0x1d9   : > { %v1396_v48 = vld [vmem:[#allocation2 + $0x188] sm:$0xff]  ;;  %v1331_v1 = vmul.f32 %v3971_v45, %v1295_v26  ;;  %v1629_v52 = vmul.f32 %v4025_v56, %v1295_v26  ;;  %v1728_v29 = vmul.f32 %v4033_v3, %v1095_v38  ;;  %v1729_v28 = vmul.f32 %v4033_v3, %v1096_v34 }
 0x1da   : > { %v1496_v7 = vld [vmem:[#allocation2 + $0x189] sm:$0xff]  ;;  %v1263_v14 = vadd.f32 %v1231_v23, %v1131_v46  ;;  %v1461_v59 = vadd.f32 %v1429_v20, %v1361_v27  ;;  %v1828_v58 = vmul.f32 %v4061_v37, %v1195_v49  ;;  %v1431_v45 = vmul.f32 %v3993_v0, %v1395_v4 }
 0x1db   : > { %v1595_v6 = vld [vmem:[#allocation2 + $0x182] sm:$0xff]  ;;  %v1596_v50 = vld [vmem:[#allocation2 + $0x18a] sm:$0xff]  ;;  %v1264_v19 = vadd.f32 %v1232_v44, %v1132_v60  ;;  %v1432_v57 = vmul.f32 %v3993_v0, %v1396_v48  ;;  %v1462_v22 = vadd.f32 %v1430_v41, %v1362_v16  ;;  %v1531_v11 = vmul.f32 %v4010_v30, %v1495_v17 }
 0x1dc   : > { %v1363_v10 = vadd.f32 %v1331_v1, %v1263_v14  ;;  %v1532_v46 = vmul.f32 %v4010_v30, %v1496_v7  ;;  %v3547_v27 = vpop.eup %3546  ;;  %v1561_v38 = vadd.f32 %v1529_v33, %v1461_v59  ;;  %v1631_v34 = vmul.f32 %v4025_v56, %v1595_v6 }
 0x1dd   : > { %v1364_v23 = vadd.f32 %v1332_v32, %v1264_v19  ;;  %v1632_v20 = vmul.f32 %v4025_v56, %v1596_v50  ;;  %v1562_v49 = vadd.f32 %v1530_v8, %v1462_v22  ;;  %v1730_v43 = vmul.f32 %v4033_v3, %v1395_v4 }
 0x1de   : > { %v1463_v61 = vadd.f32 %v1431_v45, %v1363_v10  ;;  %v1731_v44 = vmul.f32 %v4033_v3, %v1396_v48  ;;  %v1661_v16 = vadd.f32 %v1629_v52, %v1561_v38  ;;  %v1760_v1 = vadd.f32 %v1728_v29, %v1659_v35 }
 0x1df   : > { %v3549_v0 = vpop.eup %3548  ;;  %v1464_v60 = vadd.f32 %v1432_v57, %v1364_v23  ;;  %v1761_v41 = vadd.f32 %v1729_v28, %v1660_v63  ;;  %v1662_v40 = vadd.f32 %v1630_v31, %v1562_v49  ;;  %v1830_v32 = vmul.f32 %v4061_v37, %v1495_v17 }
 0x1e0   : > { %v3551_v14 = vpop.eup %3550  ;;  %v1563_v30 = vadd.f32 %v1531_v11, %v1463_v61  ;;  %v1831_v33 = vmul.f32 %v4061_v37, %v1496_v7  ;;  %v1762_v45 = vadd.f32 %v1730_v43, %v1661_v16  ;;  %v1860_v8 = vadd.f32 %v1828_v58, %v1760_v1 }
 0x1e1   : > { %v3553_v59 = vpop.eup %3552  ;;  %v1564_v56 = vadd.f32 %v1532_v46, %v1464_v60  ;;  %v1861_v19 = vadd.f32 %v1829_v25, %v1761_v41  ;;  %v1763_v10 = vadd.f32 %v1731_v44, %v1662_v40  ;;  %v1928_v3 = vmul.f32 %v4077_v62, %v1295_v26 }
 0x1e2   : > { %v1663_v4 = vadd.f32 %v1631_v34, %v1563_v30  ;;  %v1930_v48 = vmul.f32 %v4077_v62, %v1595_v6  ;;  %v1862_v63 = vadd.f32 %v1830_v32, %v1762_v45  ;;  %v1931_v61 = vmul.f32 %v4077_v62, %v1596_v50 }
 0x1e3   : > { %v1664_v35 = vadd.f32 %v1632_v20, %v1564_v56  ;;  %v1961_v31 = vadd.f32 %v4884_v2, %v1861_v19  ;;  %v1863_v37 = vadd.f32 %v1831_v33, %v1763_v10  ;;  %v1960_v17 = vadd.f32 %v1928_v3, %v1860_v8 }
 0x1e4   : > { %v1764_v52 = vadd.f32 %v4725_v15, %v1663_v4  ;;  %3554 = vpow2.f32 %v4888_v13  ;;  %v1962_v25 = vadd.f32 %v1930_v48, %v1862_v63  ;;  %v2125_v26 = vadd.f32 1.0, %v3553_v59  ;;  %v5351_v4 = vld [vmem:[#allocation24_spill] sm:$0xff] }
 0x1e5   : > { %v1765_v43 = vadd.f32 %v4736_v9, %v1664_v35  ;;  %v4921_v40 = vadd.f32 %v4579_v18, %v1961_v31  ;;  %v1963_v29 = vadd.f32 %v1931_v61, %v1863_v37  ;;  %v4925_v62 = vadd.f32 %v4579_v18, %v1960_v17 }
 0x1e6   : > { %v1864_v7 = vadd.f32 %v4806_v53, %v1764_v52  ;;  %v4928_v2 = vmul.f32 %v3547_v27, %v4764_v36  ;;  %v4932_v13 = vadd.f32 %v4579_v18, %v1962_v25  ;;  %3556 = vrcp.f32 %v4890_v51 }
 0x1e7   : > { %v1865_v15 = vadd.f32 %v4809_v54, %v1765_v43  ;;  %v3060_v9 = vmul.f32 -1.442695, %v4921_v40  ;;  %v4938_v53 = vadd.f32 %v4579_v18, %v1963_v29  ;;  %v3059_v6 = vmul.f32 -1.442695, %v4925_v62 }
 0x1e8   : > { %v1964_v28 = vadd.f32 %v4812_v47, %v1864_v7  ;;  %3558 = vrcp.f32 %v2125_v26  ;;  %v3061_v54 = vmul.f32 -1.442695, %v4932_v13  ;;  %v2267_v50 = vadd.f32 %v4870_v21, %v4862_v39 }
 0x1e9   : > { %v1965_v36 = vadd.f32 %v4815_v42, %v1865_v15  ;;  %3560 = vpow2.f32 %v3060_v9  ;;  %v3062_v51 = vmul.f32 -1.442695, %v4938_v53  ;;  %v2268_v47 = vsel %vm973_vm1, %v4928_v2, 0.0 }
 0x1ea   : > { %v2003_v58 = vadd.f32 %v4579_v18, %v1964_v28  ;;  %3562 = vpow2.f32 %v3059_v6  ;;  %v4953_v22 = vmul.f32 %v3549_v0, %v4789_v55  ;;  %v2269_v39 = vadd.f32 %v2268_v47, %v2267_v50 }
 0x1eb   : > { %v4950_v57 = vadd.f32 %v4579_v18, %v1965_v36  ;;  %3564 = vpow2.f32 %v3061_v54  ;;  %v4957_v46 = vmul.f32 %v3551_v14, %v4792_v12 }
 0x1ec   : > { %3566 = vpow2.f32 %v3062_v51  ;;  %v3063_v42 = vmul.f32 -1.442695, %v2003_v58  ;;  %v2270_v18 = vsel %vm973_vm1, %v4953_v22, 0.0 }
 0x1ed   : > { %v3064_v11 = vmul.f32 -1.442695, %v4950_v57  ;;  %v2271_v38 = vadd.f32 %v2270_v18, %v2269_v39  ;;  %v2272_v55 = vsel %vm973_vm1, %v4957_v46, 0.0  ;;  %v2304_v18 = vld [vmem:[%s5277_s6] sm:$0x1] }
 0x1ee   : > { %v3555_v21 = vpop.eup %3554  ;;  %3568 = vpow2.f32 %v3063_v42 }
 0x1ef   : > { %3570 = vpow2.f32 %v3064_v11  ;;  %v2126_v27 = vadd.f32 1.0, %v3555_v21  ;;  %v2273_v16 = vadd.f32 %v2272_v55, %v2271_v38 }
 0x1f0   : > { %v3557_v23 = vpop.eup %3556 }
 0x1f1   : > { %3572 = vrcp.f32 %v2126_v27  ;;  %v4964_v0 = vmul.f32 %v3557_v23, %v4798_v24  ;;  %v2385_v27 = vld [vmem:[%s5278_s7] sm:$0x3] }
 0x1f2   : > { %v3559_v34 = vpop.eup %3558  ;;  %3245 = vmatpush3.msk.msra.mxu1 %vm2391_vm4, %v2385_v27  ;;  %v5366_v27 = vld [vmem:[#allocation5_spill] sm:$0xff] }
 0x1f3   : > { %v3561_v20 = vpop.eup %3560  ;;  %v4967_v14 = vmul.f32 %v3559_v34, %v4866_v5  ;;  %v2274_v33 = vsel %vm973_vm1, %v4964_v0, 0.0 }
 0x1f4   : > { %v3563_v49 = vpop.eup %3562  ;;  %v2128_v44 = vadd.f32 1.0, %v3561_v20  ;;  %v2275_v24 = vadd.f32 %v2274_v33, %v2273_v16  ;;  %v2508_v16 = vld [vmem:[%s5280_s9 + $0x8] sm:$0xff]  ;;  %v2386_v33 = vld [vmem:[%s5279_s8] sm:$0x1] }
 0x1f5   : > { %v3565_v12 = vpop.eup %3564  ;;  %v2127_v60 = vadd.f32 1.0, %v3563_v49  ;;  %v2276_v8 = vsel %vm973_vm1, %v4967_v14, 0.0 }
 0x1f6   : > { %v3567_v1 = vpop.eup %3566  ;;  %v2129_v41 = vadd.f32 1.0, %v3565_v12  ;;  %3574 = vrcp.f32 %v2128_v44  ;;  %v2277_v10 = vadd.f32 %v2276_v8, %v2275_v24 }
 0x1f7   : > { %v2130_v30 = vadd.f32 1.0, %v3567_v1  ;;  %3576 = vrcp.f32 %v2127_v60  ;;  %v2507_v60 = vld [vmem:[%s5280_s9] sm:$0xff]  ;;  %v2509_v1 = vld [vmem:[%s5280_s9 + $0x10] sm:$0xff] }
 0x1f8   : > { %v3569_v32 = vpop.eup %3568  ;;  %3578 = vrcp.f32 %v2129_v41  ;;  %v3311_v41 = vpack.c.bf16 %v2508_v16, %v2507_v60  ;;  %v5371_v60 = vld [vmem:[#allocation22_spill] sm:$0xff] }
 0x1f9   : > { %v3571_v59 = vpop.eup %3570  ;;  %v2131_v56 = vadd.f32 1.0, %v3569_v32  ;;  %3580 = vrcp.f32 %v2130_v30  ;;  %v2510_v30 = vld [vmem:[%s5280_s9 + $0x18] sm:$0xff] }
 0x1fa   : > { %v2132_v45 = vadd.f32 1.0, %v3571_v59  ;;  %v3315_v32 = vpack.c.bf16 %v2510_v30, %v2509_v1  ;;  %3312 = vmatprep.subr.bf16.mxu1 %v3311_v41  ;;  %v5372_v1 = vld [vmem:[#allocation23_spill] sm:$0xff] }
 0x1fb   : > { %v3573_v19 = vpop.eup %3572  ;;  %3582 = vrcp.f32 %v2131_v56 }
 0x1fc   : > { %v4974_v5 = vmul.f32 %v3573_v19, %v5351_v4  ;;  %3584 = vrcp.f32 %v2132_v45 }
 0x1fe   : > { %v2278_v48 = vsel %vm973_vm1, %v4974_v5, 0.0 }
 0x1ff   : > { %v2279_v63 = vadd.f32 %v2278_v48, %v2277_v10  ;;  %v5352_v10 = vld [vmem:[#allocation3_spill] sm:$0xff]  ;;  %v5353_v48 = vld [vmem:[#allocation12_spill] sm:$0xff] }
 0x200   : > { %v3575_v3 = vpop.eup %3574 }
 0x201   : > { %v3577_v35 = vpop.eup %3576  ;;  %v4982_v52 = vmul.f32 %v3575_v3, %v4921_v40 }
 0x202   : > { %v3579_v61 = vpop.eup %3578  ;;  %v4979_v31 = vmul.f32 %v3577_v35, %v4925_v62 }
 0x203   : > { %v3581_v37 = vpop.eup %3580  ;;  %v4985_v17 = vmul.f32 %v3579_v61, %v4932_v13  ;;  %v2282_v62 = vsel %vm973_vm1, %v4982_v52, 0.0 }
 0x204   : > { %v2280_v43 = vsel %vm973_vm1, %v4979_v31, 0.0  ;;  %v4990_v7 = vmul.f32 %v3581_v37, %v4938_v53  ;;  %v5355_v37 = vld [vmem:[#allocation15_spill] sm:$0xff] }
 0x205   : > { %v3583_v25 = vpop.eup %3582  ;;  %v2281_v26 = vadd.f32 %v2280_v43, %v2279_v63  ;;  %v2284_v40 = vsel %vm973_vm1, %v4985_v17, 0.0  ;;  %v5354_v63 = vld [vmem:[#allocation13_spill] sm:$0xff] }
 0x206   : > { %v4992_v29 = vmul.f32 %v3583_v25, %v2003_v58  ;;  %v3585_v15 = vpop.eup %3584  ;;  %v2286_v6 = vsel %vm973_vm1, %v4990_v7, 0.0  ;;  %v5356_v25 = vld [vmem:[#allocation16_spill] sm:$0xff] }
 0x207   : > { %v2283_v9 = vadd.f32 %v2282_v62, %v2281_v26  ;;  %v4999_v28 = vmul.f32 %v3585_v15, %v4950_v57  ;;  %v5357_v62 = vld [vmem:[#allocation17_spill] sm:$0xff]  ;;  %v5358_v15 = vld [vmem:[#allocation18_spill] sm:$0xff] }
 0x208   : > { %v2288_v53 = vsel %vm973_vm1, %v4992_v29, 0.0 }
 0x209   : > { %v2285_v13 = vadd.f32 %v2284_v40, %v2283_v9  ;;  %v2290_v50 = vsel %vm973_vm1, %v4999_v28, 0.0 }
 0x20b   : > { %v2287_v36 = vadd.f32 %v2286_v6, %v2285_v13  ;;  %v5359_v13 = vld [vmem:[#allocation19_spill] sm:$0xff] }
 0x20d   : > { %v2289_v54 = vadd.f32 %v2288_v53, %v2287_v36  ;;  %v5360_v53 = vld [vmem:[#allocation20_spill] sm:$0xff] }
 0x20f   : > { %v2291_v58 = vadd.f32 %v2290_v50, %v2289_v54  ;;  %v5361_v54 = vld [vmem:[#allocation21_spill] sm:$0xff] }
 0x211   : > { %v2292_v51 = vrot.slane %v2291_v58, 4 }
 0x213   : > { %v2293_v47 = vadd.f32 %v2292_v51, %v2291_v58  ;;  %v5362_v58 = vld [vmem:[#allocation14_spill] sm:$0xff] }
 0x215   : > { %v2294_v42 = vrot.slane %v2293_v47, 2 }
 0x217   : > { %v2295_v11 = vadd.f32 %v2294_v42, %v2293_v47  ;;  %v5363_v47 = vld [vmem:[#allocation11_spill] sm:$0xff] }
 0x219   : > { %v2296_v39 = vrot.slane %v2295_v11, 1 }
 0x21b   : > { %v2297_v21 = vadd.f32 %v2296_v39, %v2295_v11  ;;  %v5364_v11 = vld [vmem:[#allocation4_spill] sm:$0xff] }
 0x21d   : > { %v2299_v57 = vmul.f32 0.00390625, %v2297_v21  ;;  %v5365_v21 = vld [vmem:[#allocation9_spill] sm:$0xff] }
 0x21f   : > { %3242 = vmatmul.mubr.msk.f32.vlgmr.msra.gmra.mrb[32].mxu0 %vm973_vm1, %v2299_v57 }
 0x2f2   : > { %v2374_v23 = vpop.f32.mrb[32].mxu0 }
 0x2f3   : > { %v2375_v38 = vadd.f32 %v2374_v23, %v2304_v18  ;;  %v3243_v34 = vpop.f32.mrb[33].mxu0  ;;  %v5367_v23 = vld [vmem:[#allocation6_spill] sm:$0xff] }
 0x2f4   : > { %v5368_v34 = vld [vmem:[#allocation7_spill] sm:$0xff] }
 0x2f5   : > { %v3066_v55 = vmul.f32 -1.442695, %v2375_v38 }
 0x2f7   : > { %3586 = vpow2.f32 %v3066_v55 }
 0x301   : > { %v3587_v20 = vpop.eup %3586 }
 0x302   : > { %v2381_v49 = vadd.f32 1.0, %v3587_v20  ;;  %v5369_v20 = vld [vmem:[#allocation8_spill] sm:$0xff] }
 0x304   : > { %3588 = vrcp.f32 %v2381_v49 }
 0x30e   : > { %v3589_v44 = vpop.eup %3588 }
 0x30f   : > { %v2384_v12 = vmul.f32 %v3589_v44, %v2375_v38  ;;  %v5370_v44 = vld [vmem:[#allocation10_spill] sm:$0xff] }
 0x311   : > { %3247 = vmatmul.mubr.msk.f32.vlgmr.msra.gmra.mrb[0].mxu1 %vm2387_vm5, %v2384_v12 }
 0x312   : > { %3314 = vmatpush3.bf16.msra.mxu1 %v3311_v41 }
 0x313   : > { %3316 = vmatprep.subr.bf16.mxu1 %v3315_v32 }
 0x316   : > { %3318 = vmatpush3.bf16.msra.mxu1 %v3315_v32 }
 0x3e4   : > { %v2461_v59 = vpop.f32.mrb[0].mxu1 }
 0x3e5   : > { %v2462_v56 = vadd.f32 %v2461_v59, %v2386_v33  ;;  %v3248_v24 = vpop.f32.mrb[1].mxu1 }
 0x3e6   : > { %v3596_v24 = vld [vmem:[%s3718_s24 + $0x8] sm:$0xff] }
 0x3e7   : > { %v3069_v45 = vmul.f32 -1.442695, %v2462_v56 }
 0x3e9   : > { %3590 = vpow2.f32 %v3069_v45 }
 0x3f3   : > { %v3591_v8 = vpop.eup %3590 }
 0x3f4   : > { %v2468_v19 = vadd.f32 1.0, %v3591_v8  ;;  %v3597_v8 = vld [vmem:[%s3718_s24] sm:$0xff] }
 0x3f6   : > { %3592 = vrcp.f32 %v2468_v19 }
 0x400   : > { %v3593_v4 = vpop.eup %3592 }
 0x401   : > { %v5030_v3 = vrot.slane %v3593_v4, %v5352_v10 }
 0x403   : > { %v2475_v35 = vmul.f32 %v5030_v3, %v5353_v48  ;;  %v2476_v61 = vmul.f32 %v5030_v3, %v5354_v63  ;;  %v2477_v43 = vmul.f32 %v5030_v3, %v5355_v37  ;;  %v2478_v26 = vmul.f32 %v5030_v3, %v5356_v25 }
 0x404   : > { %v2479_v40 = vmul.f32 %v5030_v3, %v5357_v62  ;;  %v2480_v9 = vmul.f32 %v5030_v3, %v5358_v15  ;;  %v2481_v6 = vmul.f32 %v5030_v3, %v5359_v13  ;;  %v2482_v36 = vmul.f32 %v5030_v3, %v5360_v53 }
 0x405   : > { %3257 = vmatprep.mubr.msk.f32.mxu1 %vm973_vm1, %v2475_v35  ;;  %v2483_v50 = vmul.f32 %v5030_v3, %v5361_v54  ;;  %v2484_v51 = vmul.f32 %v5030_v3, %v5362_v58  ;;  %v2485_v42 = vmul.f32 %v5030_v3, %v5363_v47  ;;  %v2486_v39 = vmul.f32 %v5030_v3, %v5364_v11  ;;  %v3598_v35 = vld [vmem:[%s3718_s24 + $0x18] sm:$0xff] }
 0x406   : > { %3258 = vmatmul.mubr.msk.f32.vlgmr.msra.gmra.mrb[2].mxu1 %vm973_vm1, %v2476_v61  ;;  %v2487_v57 = vmul.f32 %v5030_v3, %v5365_v21  ;;  %v2488_v18 = vmul.f32 %v5030_v3, %v5366_v27  ;;  %v2489_v38 = vmul.f32 %v5030_v3, %v5367_v23  ;;  %v2490_v55 = vmul.f32 %v5030_v3, %v5368_v34  ;;  %v3599_v61 = vld [vmem:[%s3718_s24 + $0x10] sm:$0xff] }
 0x407   : > { %3260 = vmatprep.mubr.msk.f32.mxu1 %vm973_vm1, %v2477_v43  ;;  %v2491_v49 = vmul.f32 %v5030_v3, %v5369_v20  ;;  %v2492_v12 = vmul.f32 %v5030_v3, %v5370_v44  ;;  %v2493_v16 = vmul.f32 %v5030_v3, %v5371_v60  ;;  %v2494_v41 = vmul.f32 %v5030_v3, %v5372_v1 }
 0x408   : > { %v2495_v30 = vmul.f32 %v5030_v3, %v4928_v2  ;;  %v2496_v32 = vmul.f32 %v5030_v3, %v4953_v22  ;;  %v2497_v33 = vmul.f32 %v5030_v3, %v4957_v46  ;;  %v2498_v59 = vmul.f32 %v5030_v3, %v4964_v0 }
 0x409   : > { %v2499_v2 = vmul.f32 %v5030_v3, %v4967_v14  ;;  %v2500_v22 = vmul.f32 %v5030_v3, %v4974_v5  ;;  %v2501_v46 = vmul.f32 %v5030_v3, %v4979_v31  ;;  %v2502_v0 = vmul.f32 %v5030_v3, %v4982_v52 }
 0x40a   : > { %3261 = vmatmul.mubr.msk.f32.gmra.mrb[4].mxu1 %vm973_vm1, %v2478_v26  ;;  %v2503_v14 = vmul.f32 %v5030_v3, %v4985_v17  ;;  %v2504_v5 = vmul.f32 %v5030_v3, %v4990_v7  ;;  %v2505_v31 = vmul.f32 %v5030_v3, %v4992_v29  ;;  %v2506_v52 = vmul.f32 %v5030_v3, %v4999_v28  ;;  %v5131_v17 = vld [vmem:[%s5281_s10] ss:$0 sm:$0xff] }
 0x40b   : > { %3263 = vmatprep.mubr.msk.f32.mxu1 %vm973_vm1, %v2479_v40  ;;  %v3600_v40 = vld [vmem:[%s3718_s24 + $0x28] sm:$0xff] }
 0x40e   : > { %3264 = vmatmul.mubr.msk.f32.gmra.mrb[6].mxu1 %vm973_vm1, %v2480_v9  ;;  %v3601_v9 = vld [vmem:[%s3718_s24 + $0x20] sm:$0xff] }
 0x40f   : > { %3266 = vmatprep.mubr.msk.f32.mxu1 %vm973_vm1, %v2481_v6 }
 0x412   : > { %3267 = vmatmul.mubr.msk.f32.gmra.mrb[8].mxu1 %vm973_vm1, %v2482_v36 }
 0x413   : > { %3269 = vmatprep.mubr.msk.f32.mxu1 %vm973_vm1, %v2483_v50  ;;  %v3602_v50 = vld [vmem:[%s3718_s24 + $0x38] sm:$0xff] }
 0x416   : > { %3270 = vmatmul.mubr.msk.f32.gmra.mrb[10].mxu1 %vm973_vm1, %v2484_v51  ;;  %v3603_v51 = vld [vmem:[%s3718_s24 + $0x30] sm:$0xff] }
 0x417   : > { %3272 = vmatprep.mubr.msk.f32.mxu1 %vm973_vm1, %v2485_v42 }
 0x41a   : > { %3273 = vmatmul.mubr.msk.f32.gmra.mrb[12].mxu1 %vm973_vm1, %v2486_v39 }
 0x41b   : > { %3275 = vmatprep.mubr.msk.f32.mxu1 %vm973_vm1, %v2487_v57  ;;  %v3604_v57 = vld [vmem:[%s3718_s24 + $0x48] sm:$0xff] }
 0x41e   : > { %3276 = vmatmul.mubr.msk.f32.gmra.mrb[14].mxu1 %vm973_vm1, %v2488_v18  ;;  %v3605_v18 = vld [vmem:[%s3718_s24 + $0x40] sm:$0xff] }
 0x41f   : > { %3278 = vmatprep.mubr.msk.f32.mxu1 %vm973_vm1, %v2489_v38 }
 0x422   : > { %3279 = vmatmul.mubr.msk.f32.gmra.mrb[16].mxu1 %vm973_vm1, %v2490_v55 }
 0x423   : > { %3281 = vmatprep.mubr.msk.f32.mxu1 %vm973_vm1, %v2491_v49  ;;  %v3606_v49 = vld [vmem:[%s3718_s24 + $0x58] sm:$0xff] }
 0x426   : > { %3282 = vmatmul.mubr.msk.f32.gmra.mrb[18].mxu1 %vm973_vm1, %v2492_v12  ;;  %v3607_v12 = vld [vmem:[%s3718_s24 + $0x50] sm:$0xff] }
 0x427   : > { %3284 = vmatprep.mubr.msk.f32.mxu1 %vm973_vm1, %v2493_v16 }
 0x42a   : > { %3285 = vmatmul.mubr.msk.f32.gmra.mrb[20].mxu1 %vm973_vm1, %v2494_v41 }
 0x42b   : > { %3287 = vmatprep.mubr.msk.f32.mxu1 %vm973_vm1, %v2495_v30 }
 0x42e   : > { %3288 = vmatmul.mubr.msk.f32.gmra.mrb[22].mxu1 %vm973_vm1, %v2496_v32  ;;  %v3608_v32 = vld [vmem:[%s3718_s24 + $0x68] sm:$0xff] }
 0x42f   : > { %3290 = vmatprep.mubr.msk.f32.mxu1 %vm973_vm1, %v2497_v33 }
 0x432   : > { %3291 = vmatmul.mubr.msk.f32.gmra.mrb[24].mxu1 %vm973_vm1, %v2498_v59  ;;  %v3609_v59 = vld [vmem:[%s3718_s24 + $0x60] sm:$0xff] }
 0x433   : > { %3293 = vmatprep.mubr.msk.f32.mxu1 %vm973_vm1, %v2499_v2 }
 0x436   : > { %3294 = vmatmul.mubr.msk.f32.gmra.mrb[26].mxu1 %vm973_vm1, %v2500_v22 }
 0x437   : > { %3296 = vmatprep.mubr.msk.f32.mxu1 %vm973_vm1, %v2501_v46 }
 0x43a   : > { %3297 = vmatmul.mubr.msk.f32.gmra.mrb[28].mxu1 %vm973_vm1, %v2502_v0 }
 0x43b   : > { %3299 = vmatprep.mubr.msk.f32.mxu1 %vm973_vm1, %v2503_v14 }
 0x43e   : > { %3300 = vmatmul.mubr.msk.f32.gmra.mrb[30].mxu1 %vm973_vm1, %v2504_v5  ;;  %v3610_v5 = vld [vmem:[%s3718_s24 + $0x78] sm:$0xff] }
 0x43f   : > { %3302 = vmatprep.mubr.msk.f32.mxu1 %vm973_vm1, %v2505_v31 }
 0x442   : > { %3303 = vmatmul.mubr.msk.f32.gmra.mrb[32].mxu1 %vm973_vm1, %v2506_v52  ;;  %v3611_v52 = vld [vmem:[%s3718_s24 + $0x70] sm:$0xff] }
 0x4d9   : > { %v3259_v56 = vpop.f32.mrb[2].mxu1 }
 0x4da   : > { %v2686_v7 = vadd.f32 %v3259_v56, %v5131_v17  ;;  %v2680_v29 = vpop.f32.mrb[3].mxu1 }
 0x4db   : > { %v2681_v28 = vadd.f32 %v5131_v17, %v2680_v29 }
 0x4dc   : > { %v2840_v45 = vadd.f32 %v3596_v24, %v2686_v7 }
 0x4dd   : > { %v2839_v19 = vadd.f32 %v3597_v8, %v2681_v28  ;;  %v3262_v4 = vpop.f32.mrb[4].mxu1 }
 0x4de   : > { %2872 = vst.msk [vmem:[%s5139_s16 + $0x8] sm:$0xff] %vm427_vm0, %v2840_v45  ;;  %v2696_v10 = vadd.f32 %v3262_v4, %v5131_v17  ;;  %v2690_v3 = vpop.f32.mrb[5].mxu1  ;;  %v3612_v45 = vld [vmem:[%s3718_s24 + $0x88] sm:$0xff] }
 0x4df   : > { %2871 = vst.msk [vmem:[%s5139_s16] sm:$0xff] %vm427_vm0, %v2839_v19  ;;  %v2691_v48 = vadd.f32 %v5131_v17, %v2690_v3  ;;  %v3613_v19 = vld [vmem:[%s3718_s24 + $0x80] sm:$0xff] }
 0x4e0   : > { %v2842_v63 = vadd.f32 %v3598_v35, %v2696_v10 }
 0x4e1   : > { %v2841_v37 = vadd.f32 %v3599_v61, %v2691_v48  ;;  %v3265_v43 = vpop.f32.mrb[6].mxu1 }
 0x4e2   : > { %2874 = vst.msk [vmem:[%s5139_s16 + $0x18] sm:$0xff] %vm427_vm0, %v2842_v63  ;;  %v2706_v25 = vadd.f32 %v3265_v43, %v5131_v17  ;;  %v2700_v26 = vpop.f32.mrb[7].mxu1  ;;  %v3614_v63 = vld [vmem:[%s3718_s24 + $0x98] sm:$0xff] }
 0x4e3   : > { %2873 = vst.msk [vmem:[%s5139_s16 + $0x10] sm:$0xff] %vm427_vm0, %v2841_v37  ;;  %v2701_v62 = vadd.f32 %v5131_v17, %v2700_v26  ;;  %v3615_v37 = vld [vmem:[%s3718_s24 + $0x90] sm:$0xff] }
 0x4e4   : > { %v2844_v15 = vadd.f32 %v3600_v40, %v2706_v25 }
 0x4e5   : > { %v2843_v13 = vadd.f32 %v3601_v9, %v2701_v62  ;;  %v3268_v6 = vpop.f32.mrb[8].mxu1 }
 0x4e6   : > { %2876 = vst.msk [vmem:[%s5139_s16 + $0x28] sm:$0xff] %vm427_vm0, %v2844_v15  ;;  %v2716_v53 = vadd.f32 %v3268_v6, %v5131_v17  ;;  %v2710_v36 = vpop.f32.mrb[9].mxu1  ;;  %v3616_v15 = vld [vmem:[%s3718_s24 + $0xa8] sm:$0xff] }
 0x4e7   : > { %2875 = vst.msk [vmem:[%s5139_s16 + $0x20] sm:$0xff] %vm427_vm0, %v2843_v13  ;;  %v2711_v54 = vadd.f32 %v5131_v17, %v2710_v36  ;;  %v3617_v13 = vld [vmem:[%s3718_s24 + $0xa0] sm:$0xff] }
 0x4e8   : > { %v2846_v58 = vadd.f32 %v3602_v50, %v2716_v53 }
 0x4e9   : > { %v2845_v47 = vadd.f32 %v3603_v51, %v2711_v54  ;;  %v3271_v42 = vpop.f32.mrb[10].mxu1 }
 0x4ea   : > { %2878 = vst.msk [vmem:[%s5139_s16 + $0x38] sm:$0xff] %vm427_vm0, %v2846_v58  ;;  %v2726_v11 = vadd.f32 %v3271_v42, %v5131_v17  ;;  %v2720_v39 = vpop.f32.mrb[11].mxu1  ;;  %v3618_v58 = vld [vmem:[%s3718_s24 + $0xb8] sm:$0xff] }
 0x4eb   : > { %2877 = vst.msk [vmem:[%s5139_s16 + $0x30] sm:$0xff] %vm427_vm0, %v2845_v47  ;;  %v2721_v21 = vadd.f32 %v5131_v17, %v2720_v39  ;;  %v3619_v47 = vld [vmem:[%s3718_s24 + $0xb0] sm:$0xff] }
 0x4ec   : > { %v2848_v27 = vadd.f32 %v3604_v57, %v2726_v11 }
 0x4ed   : > { %v2847_v23 = vadd.f32 %v3605_v18, %v2721_v21  ;;  %v3274_v38 = vpop.f32.mrb[12].mxu1 }
 0x4ee   : > { %2880 = vst.msk [vmem:[%s5139_s16 + $0x48] sm:$0xff] %vm427_vm0, %v2848_v27  ;;  %v2736_v34 = vadd.f32 %v3274_v38, %v5131_v17  ;;  %v2730_v55 = vpop.f32.mrb[13].mxu1  ;;  %v3620_v27 = vld [vmem:[%s3718_s24 + $0xc8] sm:$0xff] }
 0x4ef   : > { %2879 = vst.msk [vmem:[%s5139_s16 + $0x40] sm:$0xff] %vm427_vm0, %v2847_v23  ;;  %v2731_v20 = vadd.f32 %v5131_v17, %v2730_v55  ;;  %v3621_v23 = vld [vmem:[%s3718_s24 + $0xc0] sm:$0xff] }
 0x4f0   : > { %v2850_v44 = vadd.f32 %v3606_v49, %v2736_v34 }
 0x4f1   : > { %v2849_v60 = vadd.f32 %v3607_v12, %v2731_v20  ;;  %v3277_v16 = vpop.f32.mrb[14].mxu1 }
 0x4f2   : > { %2882 = vst.msk [vmem:[%s5139_s16 + $0x58] sm:$0xff] %vm427_vm0, %v2850_v44  ;;  %v2746_v1 = vadd.f32 %v3277_v16, %v5131_v17  ;;  %v2740_v41 = vpop.f32.mrb[15].mxu1  ;;  %v3622_v44 = vld [vmem:[%s3718_s24 + $0xd8] sm:$0xff] }
 0x4f3   : > { %2881 = vst.msk [vmem:[%s5139_s16 + $0x50] sm:$0xff] %vm427_vm0, %v2849_v60  ;;  %v2741_v30 = vadd.f32 %v5131_v17, %v2740_v41  ;;  %v3623_v60 = vld [vmem:[%s3718_s24 + $0xd0] sm:$0xff] }
 0x4f4   : > { %v2852_v33 = vadd.f32 %v3608_v32, %v2746_v1 }
 0x4f5   : > { %v2851_v2 = vadd.f32 %v3609_v59, %v2741_v30  ;;  %v3280_v22 = vpop.f32.mrb[16].mxu1 }
 0x4f6   : > { %2884 = vst.msk [vmem:[%s5139_s16 + $0x68] sm:$0xff] %vm427_vm0, %v2852_v33  ;;  %v2756_v46 = vadd.f32 %v3280_v22, %v5131_v17  ;;  %v2750_v0 = vpop.f32.mrb[17].mxu1  ;;  %v3624_v33 = vld [vmem:[%s3718_s24 + $0xe8] sm:$0xff] }
 0x4f7   : > { %2883 = vst.msk [vmem:[%s5139_s16 + $0x60] sm:$0xff] %vm427_vm0, %v2851_v2  ;;  %v2751_v14 = vadd.f32 %v5131_v17, %v2750_v0  ;;  %v3625_v2 = vld [vmem:[%s3718_s24 + $0xe0] sm:$0xff] }
 0x4f8   : > { %v2854_v31 = vadd.f32 %v3610_v5, %v2756_v46 }
 0x4f9   : > { %v2853_v56 = vadd.f32 %v3611_v52, %v2751_v14  ;;  %v3283_v7 = vpop.f32.mrb[18].mxu1 }
 0x4fa   : > { %2886 = vst.msk [vmem:[%s5139_s16 + $0x78] sm:$0xff] %vm427_vm0, %v2854_v31  ;;  %v2766_v29 = vadd.f32 %v3283_v7, %v5131_v17  ;;  %v2760_v28 = vpop.f32.mrb[19].mxu1  ;;  %v3626_v31 = vld [vmem:[%s3718_s24 + $0xf8] sm:$0xff] }
 0x4fb   : > { %2885 = vst.msk [vmem:[%s5139_s16 + $0x70] sm:$0xff] %vm427_vm0, %v2853_v56  ;;  %v2761_v24 = vadd.f32 %v5131_v17, %v2760_v28  ;;  %v3627_v56 = vld [vmem:[%s3718_s24 + $0xf0] sm:$0xff] }
 0x4fc   : > { %v2856_v8 = vadd.f32 %v3612_v45, %v2766_v29 }
 0x4fd   : > { %v2855_v4 = vadd.f32 %v3613_v19, %v2761_v24  ;;  %v3286_v10 = vpop.f32.mrb[20].mxu1 }
 0x4fe   : > { %2888 = vst.msk [vmem:[%s5139_s16 + $0x88] sm:$0xff] %vm427_vm0, %v2856_v8  ;;  %v2776_v3 = vadd.f32 %v3286_v10, %v5131_v17  ;;  %v2770_v48 = vpop.f32.mrb[21].mxu1 }
 0x4ff   : > { %2887 = vst.msk [vmem:[%s5139_s16 + $0x80] sm:$0xff] %vm427_vm0, %v2855_v4  ;;  %v2771_v35 = vadd.f32 %v5131_v17, %v2770_v48 }
 0x500   : > { %v2858_v61 = vadd.f32 %v3614_v63, %v2776_v3 }
 0x501   : > { %v2857_v43 = vadd.f32 %v3615_v37, %v2771_v35  ;;  %v3289_v25 = vpop.f32.mrb[22].mxu1 }
 0x502   : > { %2890 = vst.msk [vmem:[%s5139_s16 + $0x98] sm:$0xff] %vm427_vm0, %v2858_v61  ;;  %v2786_v26 = vadd.f32 %v3289_v25, %v5131_v17  ;;  %v2780_v62 = vpop.f32.mrb[23].mxu1 }
 0x503   : > { %2889 = vst.msk [vmem:[%s5139_s16 + $0x90] sm:$0xff] %vm427_vm0, %v2857_v43  ;;  %v2781_v40 = vadd.f32 %v5131_v17, %v2780_v62 }
 0x504   : > { %v2860_v9 = vadd.f32 %v3616_v15, %v2786_v26 }
 0x505   : > { %v2859_v6 = vadd.f32 %v3617_v13, %v2781_v40  ;;  %v3292_v53 = vpop.f32.mrb[24].mxu1 }
 0x506   : > { %2892 = vst.msk [vmem:[%s5139_s16 + $0xa8] sm:$0xff] %vm427_vm0, %v2860_v9  ;;  %v2796_v36 = vadd.f32 %v3292_v53, %v5131_v17  ;;  %v2790_v54 = vpop.f32.mrb[25].mxu1 }
 0x507   : > { %2891 = vst.msk [vmem:[%s5139_s16 + $0xa0] sm:$0xff] %vm427_vm0, %v2859_v6  ;;  %v2791_v50 = vadd.f32 %v5131_v17, %v2790_v54 }
 0x508   : > { %v2862_v51 = vadd.f32 %v3618_v58, %v2796_v36 }
 0x509   : > { %v2861_v42 = vadd.f32 %v3619_v47, %v2791_v50  ;;  %v3295_v11 = vpop.f32.mrb[26].mxu1 }
 0x50a   : > { %2894 = vst.msk [vmem:[%s5139_s16 + $0xb8] sm:$0xff] %vm427_vm0, %v2862_v51  ;;  %v2806_v39 = vadd.f32 %v3295_v11, %v5131_v17  ;;  %v2800_v21 = vpop.f32.mrb[27].mxu1 }
 0x50b   : > { %2893 = vst.msk [vmem:[%s5139_s16 + $0xb0] sm:$0xff] %vm427_vm0, %v2861_v42  ;;  %v2801_v57 = vadd.f32 %v5131_v17, %v2800_v21 }
 0x50c   : > { %v2864_v18 = vadd.f32 %v3620_v27, %v2806_v39 }
 0x50d   : > { %v2863_v38 = vadd.f32 %v3621_v23, %v2801_v57  ;;  %v3298_v34 = vpop.f32.mrb[28].mxu1 }
 0x50e   : > { %2896 = vst.msk [vmem:[%s5139_s16 + $0xc8] sm:$0xff] %vm427_vm0, %v2864_v18  ;;  %v2816_v55 = vadd.f32 %v3298_v34, %v5131_v17  ;;  %v2810_v20 = vpop.f32.mrb[29].mxu1 }
 0x50f   : > { %2895 = vst.msk [vmem:[%s5139_s16 + $0xc0] sm:$0xff] %vm427_vm0, %v2863_v38  ;;  %v2811_v49 = vadd.f32 %v5131_v17, %v2810_v20 }
 0x510   : > { %v2866_v12 = vadd.f32 %v3622_v44, %v2816_v55 }
 0x511   : > { %v2865_v16 = vadd.f32 %v3623_v60, %v2811_v49  ;;  %v3301_v1 = vpop.f32.mrb[30].mxu1 }
 0x512   : > { %2898 = vst.msk [vmem:[%s5139_s16 + $0xd8] sm:$0xff] %vm427_vm0, %v2866_v12  ;;  %v2826_v41 = vadd.f32 %v3301_v1, %v5131_v17  ;;  %v2820_v30 = vpop.f32.mrb[31].mxu1 }
 0x513   : > { %2897 = vst.msk [vmem:[%s5139_s16 + $0xd0] sm:$0xff] %vm427_vm0, %v2865_v16  ;;  %v2821_v32 = vadd.f32 %v5131_v17, %v2820_v30 }
 0x514   : > { %v2868_v59 = vadd.f32 %v3624_v33, %v2826_v41 }
 0x515   : > { %v2867_v22 = vadd.f32 %v3625_v2, %v2821_v32  ;;  %v3304_v46 = vpop.f32.mrb[32].mxu1 }
 0x516   : > { %2900 = vst.msk [vmem:[%s5139_s16 + $0xe8] sm:$0xff] %vm427_vm0, %v2868_v59  ;;  %v2836_v0 = vadd.f32 %v3304_v46, %v5131_v17  ;;  %v2830_v14 = vpop.f32.mrb[33].mxu1 }
 0x517   : > { %2899 = vst.msk [vmem:[%s5139_s16 + $0xe0] sm:$0xff] %vm427_vm0, %v2867_v22  ;;  %v2831_v5 = vadd.f32 %v5131_v17, %v2830_v14 }
 0x518   : > { %v2870_v52 = vadd.f32 %v3626_v31, %v2836_v0 }
 0x519   : > { %v2869_v7 = vadd.f32 %v3627_v56, %v2831_v5 }
 0x51a   : > { %2902 = vst.msk [vmem:[%s5139_s16 + $0xf8] sm:$0xff] %vm427_vm0, %v2870_v52 }
 0x51b   : > { %2901 = vst.msk [vmem:[%s5139_s16 + $0xf0] sm:$0xff] %vm427_vm0, %v2869_v7 }
 0x51c PF: > { %s21_s17 = sadd.s32 1, %s3634_s17  }
 0x51d   : > { %p18_p4 = scmp.ge.s32.totalorder %s21_s17, 4  }
 0x51f   :  { %20 = sbr.rel (!%p18_p4) target bundleno = 1 (0x1), region = 96 }

</bundles_post_ra>
